<compile_context>
chip_gen: v7x
topology: tpu7x:2x2x1
jax: 0.10.0
libtpu: 0.0.40
codegen_flags: <defaults>
</compile_context>

<pallas_src>
import functools
import math

import jax
import jax.numpy as jnp
import numpy as np
from jax.experimental import pallas as pl
from jax.experimental.pallas import tpu as pltpu

GT = 128      # one gate per 128-lane tile
B_PAD = 8     # batch padded to one full sublane group per direction


# ----------------------------------------------------------------------------
# Fused kernel factory
# ----------------------------------------------------------------------------
def make_fused_gru_kernel(T, F, H, n_layers, C):
    R = 2 * B_PAD   # rows per recurrence step: [fwd batch block ; bwd batch block]

    def kernel(*refs):
        in0_ref = refs[0]
        layer_refs = refs[1:1 + 4 * n_layers]
        wp_ref = refs[1 + 4 * n_layers]
        bp_ref = refs[2 + 4 * n_layers]
        y_ref = refs[3 + 4 * n_layers]
        gx_scr = refs[4 + 4 * n_layers]            # (2*T*B_PAD, 3*GT) reused per layer
        in_scrs = refs[5 + 4 * n_layers:]          # block-diag inputs of layers 1..L-1

        # Off-block zeros are load-bearing: they keep the two directions from
        # leaking into each other through the block-diagonal matmuls.
        for s in in_scrs:
            s[...] = jnp.zeros(s.shape, jnp.float32)

        h_fwd_last = None
        h_bwd_last = None
        for l in range(n_layers):
            wih_ref, whh_ref, bias_ref, bhhn_ref = layer_refs[4 * l:4 * l + 4]

            # ---- hoisted input projection: ONE dot for all T steps, both
            # directions and all 3 gates (off the serial chain); biases pre-folded.
            inp = in0_ref[...] if l == 0 else in_scrs[l - 1][...]
            gx = jnp.dot(inp, wih_ref[...], preferred_element_type=jnp.float32)
            bias = bias_ref[...]                                   # (R, 3*GT)
            for k in range(T):
                gx_scr[k * R:(k + 1) * R, :] = gx[k * R:(k + 1) * R, :] + bias

            # ---- serial recurrence: one (R, 2H) x (2H, 3*GT) dot per step ------
            w_hh = whh_ref[...]                                    # (2H, 3*GT)
            bhh_n = bhhn_ref[...]                                  # (R, GT)
            h_bd = jnp.zeros((R, 2 * H), jnp.float32)   # block-diag fwd|bwd hidden
            for k in range(T):                          # fully unrolled (T small)
                gx_k = gx_scr[k * R:(k + 1) * R, :]     # aligned sublane slice
                ghh = jnp.dot(h_bd, w_hh, preferred_element_type=jnp.float32)
                r = jax.nn.sigmoid(gx_k[:, 0:GT] + ghh[:, 0:GT])
                z = jax.nn.sigmoid(gx_k[:, GT:2 * GT] + ghh[:, GT:2 * GT])
                n = jnp.tanh(gx_k[:, 2 * GT:3 * GT]
                             + r * (ghh[:, 2 * GT:3 * GT] + bhh_n))
                # off-block lanes stay exactly 0: gx/ghh/bias are 0 there, so
                # n = tanh(0) = 0 and h <- 0.5*0 + 0.5*0 = 0.
                h_bd = (1.0 - z[:, :2 * H]) * n[:, :2 * H] + z[:, :2 * H] * h_bd

                if l < n_layers - 1:
                    # stream hidden states into the NEXT layer's block-diagonal
                    # input (keyed by original time index); off the serial chain.
                    nxt = in_scrs[l]
                    t = T - 1 - k
                    hf = h_bd[0:B_PAD, 0:H]            # forward hidden at time k
                    hb = h_bd[B_PAD:R, H:2 * H]        # backward hidden at time t
                    nxt[k * R:k * R + B_PAD, 0:H] = hf
                    nxt[t * R + B_PAD:t * R + R, 2 * H:3 * H] = hf
                    nxt[t * R:t * R + B_PAD, H:2 * H] = hb
                    nxt[k * R + B_PAD:k * R + R, 3 * H:4 * H] = hb
                elif k == 0:
                    # backward hidden after its first step = out[:, T-1, H:2H]
                    h_bwd_last = h_bd[B_PAD:R, H:2 * H]

            if l == n_layers - 1:
                h_fwd_last = h_bd[0:B_PAD, 0:H]

        # ---- fused final Linear on out[:, -1, :] ------------------------------
        wp = wp_ref[...]
        y = (jnp.dot(h_fwd_last, wp[0:H, :], preferred_element_type=jnp.float32)
             + jnp.dot(h_bwd_last, wp[H:2 * H, :], preferred_element_type=jnp.float32)
             + bp_ref[...])
        y_ref[...] = y

    return kernel


# ----------------------------------------------------------------------------
# Host-side weight packing (layout plumbing only; runs under jit as XLA ops)
# ----------------------------------------------------------------------------
def _pack_layer(params, l, in_l, H):
    """Pack one layer: gate-per-lane-tile, direction-per-sub-block, biases folded."""
    wih = jnp.zeros((2 * in_l, 3 * GT), jnp.float32)
    whh = jnp.zeros((2 * H, 3 * GT), jnp.float32)
    bias = jnp.zeros((2 * B_PAD, 3 * GT), jnp.float32)
    bhhn = jnp.zeros((2 * B_PAD, GT), jnp.float32)
    for d in range(2):
        pw = params[f"l{l}_d{d}_wih"]    # (3, in_l, H)
        ph = params[f"l{l}_d{d}_whh"]    # (3, H, H)
        pbi = params[f"l{l}_d{d}_bih"]   # (3, 1, H)
        pbh = params[f"l{l}_d{d}_bhh"]   # (3, 1, H)
        for g in range(3):
            c0 = g * GT + d * H
            wih = wih.at[d * in_l:(d + 1) * in_l, c0:c0 + H].set(pw[g])
            whh = whh.at[d * H:(d + 1) * H, c0:c0 + H].set(ph[g])
            bg = pbi[g, 0] + (pbh[g, 0] if g < 2 else 0.0)   # fold b_hh for r,z
            bias = bias.at[d * B_PAD:(d + 1) * B_PAD, c0:c0 + H].set(
                jnp.broadcast_to(bg, (B_PAD, H)))
        bhhn = bhhn.at[d * B_PAD:(d + 1) * B_PAD, d * H:(d + 1) * H].set(
            jnp.broadcast_to(pbh[2, 0], (B_PAD, H)))
    return [wih, whh, bias, bhhn]


# ----------------------------------------------------------------------------
# Wrapper around pallas_call
# ----------------------------------------------------------------------------
def gru_base_forward(X, params, *, hidden_dim, n_layers, n_classes, use_biGRU):
    """X: (B, T, n_features) float32 -> (B, n_classes) float32."""
    B, T, F = X.shape
    H = hidden_dim
    C = n_classes
    # TODO(synk): unidirectional (use_biGRU=False) path not implemented.
    assert use_biGRU and B <= B_PAD and 2 * H <= GT

    # Block-diagonal, batch-padded, step-interleaved layer-0 input:
    # row block k: rows 0..7 -> x(t=k) in cols [0,F); rows 8..15 -> x(t=T-1-k) in [F,2F)
    xt = jnp.transpose(X.astype(jnp.float32), (1, 0, 2))             # (T, B, F)
    x_pad = jnp.zeros((T, B_PAD, F), jnp.float32).at[:, :B, :].set(xt)
    zeros = jnp.zeros_like(x_pad)
    fwd_blk = jnp.concatenate([x_pad, zeros], axis=-1)               # (T, 8, 2F)
    bwd_blk = jnp.concatenate([zeros, x_pad[::-1]], axis=-1)         # (T, 8, 2F)
    in0 = jnp.stack([fwd_blk, bwd_blk], axis=1).reshape(2 * T * B_PAD, 2 * F)

    args = [in0]
    for l in range(n_layers):
        in_l = F if l == 0 else 2 * H
        args += _pack_layer(params, l, in_l, H)
    args += [params["w_pred"], params["b_pred"]]

    kernel = make_fused_gru_kernel(T, F, H, n_layers, C)
    y_pad = pl.pallas_call(
        kernel,
        out_shape=jax.ShapeDtypeStruct((B_PAD, C), jnp.float32),
        scratch_shapes=[pltpu.VMEM((2 * T * B_PAD, 3 * GT), jnp.float32)]
                       + [pltpu.VMEM((2 * T * B_PAD, 4 * H), jnp.float32)
                          for _ in range(n_layers - 1)],
    )(*args)
    return y_pad[:B]


# ----------------------------------------------------------------------------
# Parameter init (PyTorch-style uniform(-1/sqrt(H), 1/sqrt(H)); string keys)
# ----------------------------------------------------------------------------
def init_params(key, n_features, hidden_dim, n_layers, n_classes, use_biGRU):
    D = 2 if use_biGRU else 1
    H = hidden_dim
    k = 1.0 / math.sqrt(H)
    params = {}
    keys = jax.random.split(key, n_layers * D * 4 + 2)
    i = 0
    for l in range(n_layers):
        in_sz = n_features if l == 0 else D * H
        for d in range(D):
            params[f"l{l}_d{d}_wih"] = jax.random.uniform(
                keys[i], (3, in_sz, H), minval=-k, maxval=k, dtype=jnp.float32); i += 1
            params[f"l{l}_d{d}_whh"] = jax.random.uniform(
                keys[i], (3, H, H), minval=-k, maxval=k, dtype=jnp.float32); i += 1
            params[f"l{l}_d{d}_bih"] = jax.random.uniform(
                keys[i], (3, 1, H), minval=-k, maxval=k, dtype=jnp.float32); i += 1
            params[f"l{l}_d{d}_bhh"] = jax.random.uniform(
                keys[i], (3, 1, H), minval=-k, maxval=k, dtype=jnp.float32); i += 1
    kp = 1.0 / math.sqrt(D * H)
    params["w_pred"] = jax.random.uniform(
        keys[i], (D * H, n_classes), minval=-kp, maxval=kp, dtype=jnp.float32); i += 1
    params["b_pred"] = jax.random.uniform(
        keys[i], (1, n_classes), minval=-kp, maxval=kp, dtype=jnp.float32)
    return params


# ----------------------------------------------------------------------------
# Pure-JAX reference (mirrors PyTorch GRU_base.forward) for validation
# ----------------------------------------------------------------------------
def gru_base_reference(X, params, *, hidden_dim, n_layers, n_classes, use_biGRU):
    B, T, F = X.shape
    D = 2 if use_biGRU else 1
    H = hidden_dim
    layer_in = jnp.transpose(X.astype(jnp.float32), (1, 0, 2))   # (T, B, F)
    for l in range(n_layers):
        dir_out = []
        for d in range(D):
            wih = params[f"l{l}_d{d}_wih"]; whh = params[f"l{l}_d{d}_whh"]
            bih = params[f"l{l}_d{d}_bih"]; bhh = params[f"l{l}_d{d}_bhh"]
            h = jnp.zeros((B, H), jnp.float32)
            outs = [None] * T
            order = range(T - 1, -1, -1) if d == 1 else range(T)
            for t in order:
                xt = layer_in[t]
                r = jax.nn.sigmoid(xt @ wih[0] + bih[0] + h @ whh[0] + bhh[0])
                z = jax.nn.sigmoid(xt @ wih[1] + bih[1] + h @ whh[1] + bhh[1])
                n = jnp.tanh(xt @ wih[2] + bih[2] + r * (h @ whh[2] + bhh[2]))
                h = (1.0 - z) * n + z * h
                outs[t] = h
            dir_out.append(jnp.stack(outs, axis=0))
        layer_in = jnp.concatenate(dir_out, axis=-1) if D == 2 else dir_out[0]
    return layer_in[T - 1] @ params["w_pred"] + params["b_pred"]


# ----------------------------------------------------------------------------
# Main
# ----------------------------------------------------------------------------
if __name__ == "__main__":
    n_features = 4
    hidden_dim = 32
    n_layers = 2
    dropout_prob = 0.0   # training-only inter-layer dropout -> eval no-op
    n_classes = 3
    use_biGRU = True
    B, T = 2, 8

    key = jax.random.PRNGKey(0)
    k_x, k_p = jax.random.split(key)
    X = jax.random.normal(k_x, (B, T, n_features), dtype=jnp.float32)
    params = init_params(k_p, n_features, hidden_dim, n_layers, n_classes, use_biGRU)

    fwd = jax.jit(functools.partial(
        gru_base_forward, hidden_dim=hidden_dim, n_layers=n_layers,
        n_classes=n_classes, use_biGRU=use_biGRU))
    y_hat = jax.block_until_ready(fwd(X, params))

    assert y_hat.shape == (B, n_classes)
    assert y_hat.dtype == jnp.float32

    y_ref = gru_base_reference(X, params, hidden_dim=hidden_dim, n_layers=n_layers,
                               n_classes=n_classes, use_biGRU=use_biGRU)
    assert np.allclose(np.asarray(y_hat), np.asarray(y_ref), atol=1e-4, rtol=1e-4), (
        float(np.max(np.abs(np.asarray(y_hat) - np.asarray(y_ref)))))

    print("KERNEL_OK")
</pallas_src>

<mosaic_0001>
module attributes {stable_mosaic.version = 11 : i64} {
  func.func @kernel(%arg0: memref<128x8xf32, #tpu.memory_space<vmem>>, %arg1: memref<8x384xf32, #tpu.memory_space<vmem>>, %arg2: memref<64x384xf32, #tpu.memory_space<vmem>>, %arg3: memref<16x384xf32, #tpu.memory_space<vmem>>, %arg4: memref<16x128xf32, #tpu.memory_space<vmem>>, %arg5: memref<128x384xf32, #tpu.memory_space<vmem>>, %arg6: memref<64x384xf32, #tpu.memory_space<vmem>>, %arg7: memref<16x384xf32, #tpu.memory_space<vmem>>, %arg8: memref<16x128xf32, #tpu.memory_space<vmem>>, %arg9: memref<64x3xf32, #tpu.memory_space<vmem>>, %arg10: memref<1x3xf32, #tpu.memory_space<vmem>>, %arg11: memref<8x3xf32, #tpu.memory_space<vmem>>, %arg12: memref<128x384xf32, #tpu.memory_space<vmem>>, %arg13: memref<128x128xf32, #tpu.memory_space<vmem>>) attributes {dimension_semantics = [], scalar_prefetch = 0 : i64, scratch_operands = 2 : i64, tpu.core_type = #tpu.core_type<tc>} {
    %cst = arith.constant 0.000000e+00 : f32
    %0 = vector.broadcast %cst : f32 to vector<128x128xf32>
    %c0 = arith.constant 0 : index
    %c0_0 = arith.constant 0 : index
    %1 = vector.load %arg13[%c0, %c0_0] : memref<128x128xf32, #tpu.memory_space<vmem>>, vector<128x128xf32>
    tpu.vector_store %arg13[%c0, %c0_0], %0 {strides = array<i32>} : memref<128x128xf32, #tpu.memory_space<vmem>>, vector<128x128xf32>,
    %c0_1 = arith.constant 0 : index
    %c0_2 = arith.constant 0 : index
    %2 = vector.load %arg0[%c0_1, %c0_2] : memref<128x8xf32, #tpu.memory_space<vmem>>, vector<128x8xf32>
    %c0_3 = arith.constant 0 : index
    %c0_4 = arith.constant 0 : index
    %3 = vector.load %arg1[%c0_3, %c0_4] : memref<8x384xf32, #tpu.memory_space<vmem>>, vector<8x384xf32>
    %cst_5 = arith.constant dense<0.000000e+00> : vector<128x384xf32>
    %4 = tpu.matmul %2, %3, %cst_5 {dimension_numbers = #tpu.dot_dimension_numbers<[1], [0], [0], [1], [0, 0, 1, 1], [], []>} : vector<128x8xf32>, vector<8x384xf32>, vector<128x384xf32> -> vector<128x384xf32>
    %c0_6 = arith.constant 0 : index
    %c0_7 = arith.constant 0 : index
    %5 = vector.load %arg3[%c0_6, %c0_7] : memref<16x384xf32, #tpu.memory_space<vmem>>, vector<16x384xf32>
    %6 = vector.extract_strided_slice %4 {offsets = [0, 0], sizes = [16, 384], strides = [1, 1]} : vector<128x384xf32> to vector<16x384xf32>
    %7 = arith.addf %6, %5 : vector<16x384xf32>
    %c0_8 = arith.constant 0 : index
    %c0_9 = arith.constant 0 : index
    %8 = vector.load %arg12[%c0_8, %c0_9] : memref<128x384xf32, #tpu.memory_space<vmem>>, vector<16x384xf32>
    tpu.vector_store %arg12[%c0_8, %c0_9], %7 {strides = array<i32>} : memref<128x384xf32, #tpu.memory_space<vmem>>, vector<16x384xf32>,
    %9 = vector.extract_strided_slice %4 {offsets = [16, 0], sizes = [16, 384], strides = [1, 1]} : vector<128x384xf32> to vector<16x384xf32>
    %10 = arith.addf %9, %5 : vector<16x384xf32>
    %c16 = arith.constant 16 : index
    %c0_10 = arith.constant 0 : index
    %11 = vector.load %arg12[%c16, %c0_10] : memref<128x384xf32, #tpu.memory_space<vmem>>, vector<16x384xf32>
    tpu.vector_store %arg12[%c16, %c0_10], %10 {strides = array<i32>} : memref<128x384xf32, #tpu.memory_space<vmem>>, vector<16x384xf32>,
    %12 = vector.extract_strided_slice %4 {offsets = [32, 0], sizes = [16, 384], strides = [1, 1]} : vector<128x384xf32> to vector<16x384xf32>
    %13 = arith.addf %12, %5 : vector<16x384xf32>
    %c32 = arith.constant 32 : index
    %c0_11 = arith.constant 0 : index
    %14 = vector.load %arg12[%c32, %c0_11] : memref<128x384xf32, #tpu.memory_space<vmem>>, vector<16x384xf32>
    tpu.vector_store %arg12[%c32, %c0_11], %13 {strides = array<i32>} : memref<128x384xf32, #tpu.memory_space<vmem>>, vector<16x384xf32>,
    %15 = vector.extract_strided_slice %4 {offsets = [48, 0], sizes = [16, 384], strides = [1, 1]} : vector<128x384xf32> to vector<16x384xf32>
    %16 = arith.addf %15, %5 : vector<16x384xf32>
    %c48 = arith.constant 48 : index
    %c0_12 = arith.constant 0 : index
    %17 = vector.load %arg12[%c48, %c0_12] : memref<128x384xf32, #tpu.memory_space<vmem>>, vector<16x384xf32>
    tpu.vector_store %arg12[%c48, %c0_12], %16 {strides = array<i32>} : memref<128x384xf32, #tpu.memory_space<vmem>>, vector<16x384xf32>,
    %18 = vector.extract_strided_slice %4 {offsets = [64, 0], sizes = [16, 384], strides = [1, 1]} : vector<128x384xf32> to vector<16x384xf32>
    %19 = arith.addf %18, %5 : vector<16x384xf32>
    %c64 = arith.constant 64 : index
    %c0_13 = arith.constant 0 : index
    %20 = vector.load %arg12[%c64, %c0_13] : memref<128x384xf32, #tpu.memory_space<vmem>>, vector<16x384xf32>
    tpu.vector_store %arg12[%c64, %c0_13], %19 {strides = array<i32>} : memref<128x384xf32, #tpu.memory_space<vmem>>, vector<16x384xf32>,
    %21 = vector.extract_strided_slice %4 {offsets = [80, 0], sizes = [16, 384], strides = [1, 1]} : vector<128x384xf32> to vector<16x384xf32>
    %22 = arith.addf %21, %5 : vector<16x384xf32>
    %c80 = arith.constant 80 : index
    %c0_14 = arith.constant 0 : index
    %23 = vector.load %arg12[%c80, %c0_14] : memref<128x384xf32, #tpu.memory_space<vmem>>, vector<16x384xf32>
    tpu.vector_store %arg12[%c80, %c0_14], %22 {strides = array<i32>} : memref<128x384xf32, #tpu.memory_space<vmem>>, vector<16x384xf32>,
    %24 = vector.extract_strided_slice %4 {offsets = [96, 0], sizes = [16, 384], strides = [1, 1]} : vector<128x384xf32> to vector<16x384xf32>
    %25 = arith.addf %24, %5 : vector<16x384xf32>
    %c96 = arith.constant 96 : index
    %c0_15 = arith.constant 0 : index
    %26 = vector.load %arg12[%c96, %c0_15] : memref<128x384xf32, #tpu.memory_space<vmem>>, vector<16x384xf32>
    tpu.vector_store %arg12[%c96, %c0_15], %25 {strides = array<i32>} : memref<128x384xf32, #tpu.memory_space<vmem>>, vector<16x384xf32>,
    %27 = vector.extract_strided_slice %4 {offsets = [112, 0], sizes = [16, 384], strides = [1, 1]} : vector<128x384xf32> to vector<16x384xf32>
    %28 = arith.addf %27, %5 : vector<16x384xf32>
    %c112 = arith.constant 112 : index
    %c0_16 = arith.constant 0 : index
    %29 = vector.load %arg12[%c112, %c0_16] : memref<128x384xf32, #tpu.memory_space<vmem>>, vector<16x384xf32>
    tpu.vector_store %arg12[%c112, %c0_16], %28 {strides = array<i32>} : memref<128x384xf32, #tpu.memory_space<vmem>>, vector<16x384xf32>,
    %c0_17 = arith.constant 0 : index
    %c0_18 = arith.constant 0 : index
    %30 = vector.load %arg2[%c0_17, %c0_18] : memref<64x384xf32, #tpu.memory_space<vmem>>, vector<64x384xf32>
    %c0_19 = arith.constant 0 : index
    %c0_20 = arith.constant 0 : index
    %31 = vector.load %arg4[%c0_19, %c0_20] : memref<16x128xf32, #tpu.memory_space<vmem>>, vector<16x128xf32>
    %cst_21 = arith.constant 0.000000e+00 : f32
    %32 = vector.broadcast %cst_21 : f32 to vector<16x64xf32>
    %c0_22 = arith.constant 0 : index
    %c0_23 = arith.constant 0 : index
    %33 = vector.load %arg12[%c0_22, %c0_23] : memref<128x384xf32, #tpu.memory_space<vmem>>, vector<16x384xf32>
    %cst_24 = arith.constant dense<0.000000e+00> : vector<16x384xf32>
    %34 = tpu.matmul %32, %30, %cst_24 {dimension_numbers = #tpu.dot_dimension_numbers<[1], [0], [0], [1], [0, 0, 1, 1], [], []>} : vector<16x64xf32>, vector<64x384xf32>, vector<16x384xf32> -> vector<16x384xf32>
    %35 = vector.extract_strided_slice %33 {offsets = [0, 0], sizes = [16, 128], strides = [1, 1]} : vector<16x384xf32> to vector<16x128xf32>
    %36 = vector.extract_strided_slice %34 {offsets = [0, 0], sizes = [16, 128], strides = [1, 1]} : vector<16x384xf32> to vector<16x128xf32>
    %37 = arith.addf %35, %36 : vector<16x128xf32>
    %38 = arith.negf %37 : vector<16x128xf32>
    %39 = math.exp %38 : vector<16x128xf32>
    %cst_25 = arith.constant 1.000000e+00 : f32
    %40 = vector.broadcast %cst_25 : f32 to vector<16x128xf32>
    %41 = arith.addf %40, %39 : vector<16x128xf32>
    %42 = arith.divf %40, %41 : vector<16x128xf32>
    %43 = vector.extract_strided_slice %33 {offsets = [0, 128], sizes = [16, 128], strides = [1, 1]} : vector<16x384xf32> to vector<16x128xf32>
    %44 = vector.extract_strided_slice %34 {offsets = [0, 128], sizes = [16, 128], strides = [1, 1]} : vector<16x384xf32> to vector<16x128xf32>
    %45 = arith.addf %43, %44 : vector<16x128xf32>
    %46 = arith.negf %45 : vector<16x128xf32>
    %47 = math.exp %46 : vector<16x128xf32>
    %cst_26 = arith.constant 1.000000e+00 : f32
    %48 = vector.broadcast %cst_26 : f32 to vector<16x128xf32>
    %49 = arith.addf %48, %47 : vector<16x128xf32>
    %50 = arith.divf %48, %49 : vector<16x128xf32>
    %51 = vector.extract_strided_slice %33 {offsets = [0, 256], sizes = [16, 128], strides = [1, 1]} : vector<16x384xf32> to vector<16x128xf32>
    %52 = vector.extract_strided_slice %34 {offsets = [0, 256], sizes = [16, 128], strides = [1, 1]} : vector<16x384xf32> to vector<16x128xf32>
    %53 = arith.addf %52, %31 : vector<16x128xf32>
    %54 = arith.mulf %42, %53 : vector<16x128xf32>
    %55 = arith.addf %51, %54 : vector<16x128xf32>
    %56 = math.tanh %55 : vector<16x128xf32>
    %57 = vector.extract_strided_slice %50 {offsets = [0, 0], sizes = [16, 64], strides = [1, 1]} : vector<16x128xf32> to vector<16x64xf32>
    %cst_27 = arith.constant 1.000000e+00 : f32
    %58 = vector.broadcast %cst_27 : f32 to vector<16x64xf32>
    %59 = arith.subf %58, %57 : vector<16x64xf32>
    %60 = vector.extract_strided_slice %56 {offsets = [0, 0], sizes = [16, 64], strides = [1, 1]} : vector<16x128xf32> to vector<16x64xf32>
    %61 = arith.mulf %59, %60 : vector<16x64xf32>
    %62 = vector.extract_strided_slice %50 {offsets = [0, 0], sizes = [16, 64], strides = [1, 1]} : vector<16x128xf32> to vector<16x64xf32>
    %63 = arith.mulf %62, %32 : vector<16x64xf32>
    %64 = arith.addf %61, %63 : vector<16x64xf32>
    %65 = vector.extract_strided_slice %64 {offsets = [0, 0], sizes = [8, 32], strides = [1, 1]} : vector<16x64xf32> to vector<8x32xf32>
    %66 = vector.extract_strided_slice %64 {offsets = [8, 32], sizes = [8, 32], strides = [1, 1]} : vector<16x64xf32> to vector<8x32xf32>
    %c0_28 = arith.constant 0 : index
    %c0_29 = arith.constant 0 : index
    %67 = vector.load %arg13[%c0_28, %c0_29] : memref<128x128xf32, #tpu.memory_space<vmem>>, vector<8x32xf32>
    tpu.vector_store %arg13[%c0_28, %c0_29], %65 {strides = array<i32>} : memref<128x128xf32, #tpu.memory_space<vmem>>, vector<8x32xf32>,
    %c120 = arith.constant 120 : index
    %c64_30 = arith.constant 64 : index
    %68 = vector.load %arg13[%c120, %c64_30] : memref<128x128xf32, #tpu.memory_space<vmem>>, vector<8x32xf32>
    tpu.vector_store %arg13[%c120, %c64_30], %65 {strides = array<i32>} : memref<128x128xf32, #tpu.memory_space<vmem>>, vector<8x32xf32>,
    %c112_31 = arith.constant 112 : index
    %c32_32 = arith.constant 32 : index
    %69 = vector.load %arg13[%c112_31, %c32_32] : memref<128x128xf32, #tpu.memory_space<vmem>>, vector<8x32xf32>
    tpu.vector_store %arg13[%c112_31, %c32_32], %66 {strides = array<i32>} : memref<128x128xf32, #tpu.memory_space<vmem>>, vector<8x32xf32>,
    %c8 = arith.constant 8 : index
    %c96_33 = arith.constant 96 : index
    %70 = vector.load %arg13[%c8, %c96_33] : memref<128x128xf32, #tpu.memory_space<vmem>>, vector<8x32xf32>
    tpu.vector_store %arg13[%c8, %c96_33], %66 {strides = array<i32>} : memref<128x128xf32, #tpu.memory_space<vmem>>, vector<8x32xf32>,
    %c16_34 = arith.constant 16 : index
    %c0_35 = arith.constant 0 : index
    %71 = vector.load %arg12[%c16_34, %c0_35] : memref<128x384xf32, #tpu.memory_space<vmem>>, vector<16x384xf32>
    %cst_36 = arith.constant dense<0.000000e+00> : vector<16x384xf32>
    %72 = tpu.matmul %64, %30, %cst_36 {dimension_numbers = #tpu.dot_dimension_numbers<[1], [0], [0], [1], [0, 0, 1, 1], [], []>} : vector<16x64xf32>, vector<64x384xf32>, vector<16x384xf32> -> vector<16x384xf32>
    %73 = vector.extract_strided_slice %71 {offsets = [0, 0], sizes = [16, 128], strides = [1, 1]} : vector<16x384xf32> to vector<16x128xf32>
    %74 = vector.extract_strided_slice %72 {offsets = [0, 0], sizes = [16, 128], strides = [1, 1]} : vector<16x384xf32> to vector<16x128xf32>
    %75 = arith.addf %73, %74 : vector<16x128xf32>
    %76 = arith.negf %75 : vector<16x128xf32>
    %77 = math.exp %76 : vector<16x128xf32>
    %cst_37 = arith.constant 1.000000e+00 : f32
    %78 = vector.broadcast %cst_37 : f32 to vector<16x128xf32>
    %79 = arith.addf %78, %77 : vector<16x128xf32>
    %80 = arith.divf %78, %79 : vector<16x128xf32>
    %81 = vector.extract_strided_slice %71 {offsets = [0, 128], sizes = [16, 128], strides = [1, 1]} : vector<16x384xf32> to vector<16x128xf32>
    %82 = vector.extract_strided_slice %72 {offsets = [0, 128], sizes = [16, 128], strides = [1, 1]} : vector<16x384xf32> to vector<16x128xf32>
    %83 = arith.addf %81, %82 : vector<16x128xf32>
    %84 = arith.negf %83 : vector<16x128xf32>
    %85 = math.exp %84 : vector<16x128xf32>
    %cst_38 = arith.constant 1.000000e+00 : f32
    %86 = vector.broadcast %cst_38 : f32 to vector<16x128xf32>
    %87 = arith.addf %86, %85 : vector<16x128xf32>
    %88 = arith.divf %86, %87 : vector<16x128xf32>
    %89 = vector.extract_strided_slice %71 {offsets = [0, 256], sizes = [16, 128], strides = [1, 1]} : vector<16x384xf32> to vector<16x128xf32>
    %90 = vector.extract_strided_slice %72 {offsets = [0, 256], sizes = [16, 128], strides = [1, 1]} : vector<16x384xf32> to vector<16x128xf32>
    %91 = arith.addf %90, %31 : vector<16x128xf32>
    %92 = arith.mulf %80, %91 : vector<16x128xf32>
    %93 = arith.addf %89, %92 : vector<16x128xf32>
    %94 = math.tanh %93 : vector<16x128xf32>
    %95 = vector.extract_strided_slice %88 {offsets = [0, 0], sizes = [16, 64], strides = [1, 1]} : vector<16x128xf32> to vector<16x64xf32>
    %cst_39 = arith.constant 1.000000e+00 : f32
    %96 = vector.broadcast %cst_39 : f32 to vector<16x64xf32>
    %97 = arith.subf %96, %95 : vector<16x64xf32>
    %98 = vector.extract_strided_slice %94 {offsets = [0, 0], sizes = [16, 64], strides = [1, 1]} : vector<16x128xf32> to vector<16x64xf32>
    %99 = arith.mulf %97, %98 : vector<16x64xf32>
    %100 = vector.extract_strided_slice %88 {offsets = [0, 0], sizes = [16, 64], strides = [1, 1]} : vector<16x128xf32> to vector<16x64xf32>
    %101 = arith.mulf %100, %64 : vector<16x64xf32>
    %102 = arith.addf %99, %101 : vector<16x64xf32>
    %103 = vector.extract_strided_slice %102 {offsets = [0, 0], sizes = [8, 32], strides = [1, 1]} : vector<16x64xf32> to vector<8x32xf32>
    %104 = vector.extract_strided_slice %102 {offsets = [8, 32], sizes = [8, 32], strides = [1, 1]} : vector<16x64xf32> to vector<8x32xf32>
    %c16_40 = arith.constant 16 : index
    %c0_41 = arith.constant 0 : index
    %105 = vector.load %arg13[%c16_40, %c0_41] : memref<128x128xf32, #tpu.memory_space<vmem>>, vector<8x32xf32>
    tpu.vector_store %arg13[%c16_40, %c0_41], %103 {strides = array<i32>} : memref<128x128xf32, #tpu.memory_space<vmem>>, vector<8x32xf32>,
    %c104 = arith.constant 104 : index
    %c64_42 = arith.constant 64 : index
    %106 = vector.load %arg13[%c104, %c64_42] : memref<128x128xf32, #tpu.memory_space<vmem>>, vector<8x32xf32>
    tpu.vector_store %arg13[%c104, %c64_42], %103 {strides = array<i32>} : memref<128x128xf32, #tpu.memory_space<vmem>>, vector<8x32xf32>,
    %c96_43 = arith.constant 96 : index
    %c32_44 = arith.constant 32 : index
    %107 = vector.load %arg13[%c96_43, %c32_44] : memref<128x128xf32, #tpu.memory_space<vmem>>, vector<8x32xf32>
    tpu.vector_store %arg13[%c96_43, %c32_44], %104 {strides = array<i32>} : memref<128x128xf32, #tpu.memory_space<vmem>>, vector<8x32xf32>,
    %c24 = arith.constant 24 : index
    %c96_45 = arith.constant 96 : index
    %108 = vector.load %arg13[%c24, %c96_45] : memref<128x128xf32, #tpu.memory_space<vmem>>, vector<8x32xf32>
    tpu.vector_store %arg13[%c24, %c96_45], %104 {strides = array<i32>} : memref<128x128xf32, #tpu.memory_space<vmem>>, vector<8x32xf32>,
    %c32_46 = arith.constant 32 : index
    %c0_47 = arith.constant 0 : index
    %109 = vector.load %arg12[%c32_46, %c0_47] : memref<128x384xf32, #tpu.memory_space<vmem>>, vector<16x384xf32>
    %cst_48 = arith.constant dense<0.000000e+00> : vector<16x384xf32>
    %110 = tpu.matmul %102, %30, %cst_48 {dimension_numbers = #tpu.dot_dimension_numbers<[1], [0], [0], [1], [0, 0, 1, 1], [], []>} : vector<16x64xf32>, vector<64x384xf32>, vector<16x384xf32> -> vector<16x384xf32>
    %111 = vector.extract_strided_slice %109 {offsets = [0, 0], sizes = [16, 128], strides = [1, 1]} : vector<16x384xf32> to vector<16x128xf32>
    %112 = vector.extract_strided_slice %110 {offsets = [0, 0], sizes = [16, 128], strides = [1, 1]} : vector<16x384xf32> to vector<16x128xf32>
    %113 = arith.addf %111, %112 : vector<16x128xf32>
    %114 = arith.negf %113 : vector<16x128xf32>
    %115 = math.exp %114 : vector<16x128xf32>
    %cst_49 = arith.constant 1.000000e+00 : f32
    %116 = vector.broadcast %cst_49 : f32 to vector<16x128xf32>
    %117 = arith.addf %116, %115 : vector<16x128xf32>
    %118 = arith.divf %116, %117 : vector<16x128xf32>
    %119 = vector.extract_strided_slice %109 {offsets = [0, 128], sizes = [16, 128], strides = [1, 1]} : vector<16x384xf32> to vector<16x128xf32>
    %120 = vector.extract_strided_slice %110 {offsets = [0, 128], sizes = [16, 128], strides = [1, 1]} : vector<16x384xf32> to vector<16x128xf32>
    %121 = arith.addf %119, %120 : vector<16x128xf32>
    %122 = arith.negf %121 : vector<16x128xf32>
    %123 = math.exp %122 : vector<16x128xf32>
    %cst_50 = arith.constant 1.000000e+00 : f32
    %124 = vector.broadcast %cst_50 : f32 to vector<16x128xf32>
    %125 = arith.addf %124, %123 : vector<16x128xf32>
    %126 = arith.divf %124, %125 : vector<16x128xf32>
    %127 = vector.extract_strided_slice %109 {offsets = [0, 256], sizes = [16, 128], strides = [1, 1]} : vector<16x384xf32> to vector<16x128xf32>
    %128 = vector.extract_strided_slice %110 {offsets = [0, 256], sizes = [16, 128], strides = [1, 1]} : vector<16x384xf32> to vector<16x128xf32>
    %129 = arith.addf %128, %31 : vector<16x128xf32>
    %130 = arith.mulf %118, %129 : vector<16x128xf32>
    %131 = arith.addf %127, %130 : vector<16x128xf32>
    %132 = math.tanh %131 : vector<16x128xf32>
    %133 = vector.extract_strided_slice %126 {offsets = [0, 0], sizes = [16, 64], strides = [1, 1]} : vector<16x128xf32> to vector<16x64xf32>
    %cst_51 = arith.constant 1.000000e+00 : f32
    %134 = vector.broadcast %cst_51 : f32 to vector<16x64xf32>
    %135 = arith.subf %134, %133 : vector<16x64xf32>
    %136 = vector.extract_strided_slice %132 {offsets = [0, 0], sizes = [16, 64], strides = [1, 1]} : vector<16x128xf32> to vector<16x64xf32>
    %137 = arith.mulf %135, %136 : vector<16x64xf32>
    %138 = vector.extract_strided_slice %126 {offsets = [0, 0], sizes = [16, 64], strides = [1, 1]} : vector<16x128xf32> to vector<16x64xf32>
    %139 = arith.mulf %138, %102 : vector<16x64xf32>
    %140 = arith.addf %137, %139 : vector<16x64xf32>
    %141 = vector.extract_strided_slice %140 {offsets = [0, 0], sizes = [8, 32], strides = [1, 1]} : vector<16x64xf32> to vector<8x32xf32>
    %142 = vector.extract_strided_slice %140 {offsets = [8, 32], sizes = [8, 32], strides = [1, 1]} : vector<16x64xf32> to vector<8x32xf32>
    %c32_52 = arith.constant 32 : index
    %c0_53 = arith.constant 0 : index
    %143 = vector.load %arg13[%c32_52, %c0_53] : memref<128x128xf32, #tpu.memory_space<vmem>>, vector<8x32xf32>
    tpu.vector_store %arg13[%c32_52, %c0_53], %141 {strides = array<i32>} : memref<128x128xf32, #tpu.memory_space<vmem>>, vector<8x32xf32>,
    %c88 = arith.constant 88 : index
    %c64_54 = arith.constant 64 : index
    %144 = vector.load %arg13[%c88, %c64_54] : memref<128x128xf32, #tpu.memory_space<vmem>>, vector<8x32xf32>
    tpu.vector_store %arg13[%c88, %c64_54], %141 {strides = array<i32>} : memref<128x128xf32, #tpu.memory_space<vmem>>, vector<8x32xf32>,
    %c80_55 = arith.constant 80 : index
    %c32_56 = arith.constant 32 : index
    %145 = vector.load %arg13[%c80_55, %c32_56] : memref<128x128xf32, #tpu.memory_space<vmem>>, vector<8x32xf32>
    tpu.vector_store %arg13[%c80_55, %c32_56], %142 {strides = array<i32>} : memref<128x128xf32, #tpu.memory_space<vmem>>, vector<8x32xf32>,
    %c40 = arith.constant 40 : index
    %c96_57 = arith.constant 96 : index
    %146 = vector.load %arg13[%c40, %c96_57] : memref<128x128xf32, #tpu.memory_space<vmem>>, vector<8x32xf32>
    tpu.vector_store %arg13[%c40, %c96_57], %142 {strides = array<i32>} : memref<128x128xf32, #tpu.memory_space<vmem>>, vector<8x32xf32>,
    %c48_58 = arith.constant 48 : index
    %c0_59 = arith.constant 0 : index
    %147 = vector.load %arg12[%c48_58, %c0_59] : memref<128x384xf32, #tpu.memory_space<vmem>>, vector<16x384xf32>
    %cst_60 = arith.constant dense<0.000000e+00> : vector<16x384xf32>
    %148 = tpu.matmul %140, %30, %cst_60 {dimension_numbers = #tpu.dot_dimension_numbers<[1], [0], [0], [1], [0, 0, 1, 1], [], []>} : vector<16x64xf32>, vector<64x384xf32>, vector<16x384xf32> -> vector<16x384xf32>
    %149 = vector.extract_strided_slice %147 {offsets = [0, 0], sizes = [16, 128], strides = [1, 1]} : vector<16x384xf32> to vector<16x128xf32>
    %150 = vector.extract_strided_slice %148 {offsets = [0, 0], sizes = [16, 128], strides = [1, 1]} : vector<16x384xf32> to vector<16x128xf32>
    %151 = arith.addf %149, %150 : vector<16x128xf32>
    %152 = arith.negf %151 : vector<16x128xf32>
    %153 = math.exp %152 : vector<16x128xf32>
    %cst_61 = arith.constant 1.000000e+00 : f32
    %154 = vector.broadcast %cst_61 : f32 to vector<16x128xf32>
    %155 = arith.addf %154, %153 : vector<16x128xf32>
    %156 = arith.divf %154, %155 : vector<16x128xf32>
    %157 = vector.extract_strided_slice %147 {offsets = [0, 128], sizes = [16, 128], strides = [1, 1]} : vector<16x384xf32> to vector<16x128xf32>
    %158 = vector.extract_strided_slice %148 {offsets = [0, 128], sizes = [16, 128], strides = [1, 1]} : vector<16x384xf32> to vector<16x128xf32>
    %159 = arith.addf %157, %158 : vector<16x128xf32>
    %160 = arith.negf %159 : vector<16x128xf32>
    %161 = math.exp %160 : vector<16x128xf32>
    %cst_62 = arith.constant 1.000000e+00 : f32
    %162 = vector.broadcast %cst_62 : f32 to vector<16x128xf32>
    %163 = arith.addf %162, %161 : vector<16x128xf32>
    %164 = arith.divf %162, %163 : vector<16x128xf32>
    %165 = vector.extract_strided_slice %147 {offsets = [0, 256], sizes = [16, 128], strides = [1, 1]} : vector<16x384xf32> to vector<16x128xf32>
    %166 = vector.extract_strided_slice %148 {offsets = [0, 256], sizes = [16, 128], strides = [1, 1]} : vector<16x384xf32> to vector<16x128xf32>
    %167 = arith.addf %166, %31 : vector<16x128xf32>
    %168 = arith.mulf %156, %167 : vector<16x128xf32>
    %169 = arith.addf %165, %168 : vector<16x128xf32>
    %170 = math.tanh %169 : vector<16x128xf32>
    %171 = vector.extract_strided_slice %164 {offsets = [0, 0], sizes = [16, 64], strides = [1, 1]} : vector<16x128xf32> to vector<16x64xf32>
    %cst_63 = arith.constant 1.000000e+00 : f32
    %172 = vector.broadcast %cst_63 : f32 to vector<16x64xf32>
    %173 = arith.subf %172, %171 : vector<16x64xf32>
    %174 = vector.extract_strided_slice %170 {offsets = [0, 0], sizes = [16, 64], strides = [1, 1]} : vector<16x128xf32> to vector<16x64xf32>
    %175 = arith.mulf %173, %174 : vector<16x64xf32>
    %176 = vector.extract_strided_slice %164 {offsets = [0, 0], sizes = [16, 64], strides = [1, 1]} : vector<16x128xf32> to vector<16x64xf32>
    %177 = arith.mulf %176, %140 : vector<16x64xf32>
    %178 = arith.addf %175, %177 : vector<16x64xf32>
    %179 = vector.extract_strided_slice %178 {offsets = [0, 0], sizes = [8, 32], strides = [1, 1]} : vector<16x64xf32> to vector<8x32xf32>
    %180 = vector.extract_strided_slice %178 {offsets = [8, 32], sizes = [8, 32], strides = [1, 1]} : vector<16x64xf32> to vector<8x32xf32>
    %c48_64 = arith.constant 48 : index
    %c0_65 = arith.constant 0 : index
    %181 = vector.load %arg13[%c48_64, %c0_65] : memref<128x128xf32, #tpu.memory_space<vmem>>, vector<8x32xf32>
    tpu.vector_store %arg13[%c48_64, %c0_65], %179 {strides = array<i32>} : memref<128x128xf32, #tpu.memory_space<vmem>>, vector<8x32xf32>,
    %c72 = arith.constant 72 : index
    %c64_66 = arith.constant 64 : index
    %182 = vector.load %arg13[%c72, %c64_66] : memref<128x128xf32, #tpu.memory_space<vmem>>, vector<8x32xf32>
    tpu.vector_store %arg13[%c72, %c64_66], %179 {strides = array<i32>} : memref<128x128xf32, #tpu.memory_space<vmem>>, vector<8x32xf32>,
    %c64_67 = arith.constant 64 : index
    %c32_68 = arith.constant 32 : index
    %183 = vector.load %arg13[%c64_67, %c32_68] : memref<128x128xf32, #tpu.memory_space<vmem>>, vector<8x32xf32>
    tpu.vector_store %arg13[%c64_67, %c32_68], %180 {strides = array<i32>} : memref<128x128xf32, #tpu.memory_space<vmem>>, vector<8x32xf32>,
    %c56 = arith.constant 56 : index
    %c96_69 = arith.constant 96 : index
    %184 = vector.load %arg13[%c56, %c96_69] : memref<128x128xf32, #tpu.memory_space<vmem>>, vector<8x32xf32>
    tpu.vector_store %arg13[%c56, %c96_69], %180 {strides = array<i32>} : memref<128x128xf32, #tpu.memory_space<vmem>>, vector<8x32xf32>,
    %c64_70 = arith.constant 64 : index
    %c0_71 = arith.constant 0 : index
    %185 = vector.load %arg12[%c64_70, %c0_71] : memref<128x384xf32, #tpu.memory_space<vmem>>, vector<16x384xf32>
    %cst_72 = arith.constant dense<0.000000e+00> : vector<16x384xf32>
    %186 = tpu.matmul %178, %30, %cst_72 {dimension_numbers = #tpu.dot_dimension_numbers<[1], [0], [0], [1], [0, 0, 1, 1], [], []>} : vector<16x64xf32>, vector<64x384xf32>, vector<16x384xf32> -> vector<16x384xf32>
    %187 = vector.extract_strided_slice %185 {offsets = [0, 0], sizes = [16, 128], strides = [1, 1]} : vector<16x384xf32> to vector<16x128xf32>
    %188 = vector.extract_strided_slice %186 {offsets = [0, 0], sizes = [16, 128], strides = [1, 1]} : vector<16x384xf32> to vector<16x128xf32>
    %189 = arith.addf %187, %188 : vector<16x128xf32>
    %190 = arith.negf %189 : vector<16x128xf32>
    %191 = math.exp %190 : vector<16x128xf32>
    %cst_73 = arith.constant 1.000000e+00 : f32
    %192 = vector.broadcast %cst_73 : f32 to vector<16x128xf32>
    %193 = arith.addf %192, %191 : vector<16x128xf32>
    %194 = arith.divf %192, %193 : vector<16x128xf32>
    %195 = vector.extract_strided_slice %185 {offsets = [0, 128], sizes = [16, 128], strides = [1, 1]} : vector<16x384xf32> to vector<16x128xf32>
    %196 = vector.extract_strided_slice %186 {offsets = [0, 128], sizes = [16, 128], strides = [1, 1]} : vector<16x384xf32> to vector<16x128xf32>
    %197 = arith.addf %195, %196 : vector<16x128xf32>
    %198 = arith.negf %197 : vector<16x128xf32>
    %199 = math.exp %198 : vector<16x128xf32>
    %cst_74 = arith.constant 1.000000e+00 : f32
    %200 = vector.broadcast %cst_74 : f32 to vector<16x128xf32>
    %201 = arith.addf %200, %199 : vector<16x128xf32>
    %202 = arith.divf %200, %201 : vector<16x128xf32>
    %203 = vector.extract_strided_slice %185 {offsets = [0, 256], sizes = [16, 128], strides = [1, 1]} : vector<16x384xf32> to vector<16x128xf32>
    %204 = vector.extract_strided_slice %186 {offsets = [0, 256], sizes = [16, 128], strides = [1, 1]} : vector<16x384xf32> to vector<16x128xf32>
    %205 = arith.addf %204, %31 : vector<16x128xf32>
    %206 = arith.mulf %194, %205 : vector<16x128xf32>
    %207 = arith.addf %203, %206 : vector<16x128xf32>
    %208 = math.tanh %207 : vector<16x128xf32>
    %209 = vector.extract_strided_slice %202 {offsets = [0, 0], sizes = [16, 64], strides = [1, 1]} : vector<16x128xf32> to vector<16x64xf32>
    %cst_75 = arith.constant 1.000000e+00 : f32
    %210 = vector.broadcast %cst_75 : f32 to vector<16x64xf32>
    %211 = arith.subf %210, %209 : vector<16x64xf32>
    %212 = vector.extract_strided_slice %208 {offsets = [0, 0], sizes = [16, 64], strides = [1, 1]} : vector<16x128xf32> to vector<16x64xf32>
    %213 = arith.mulf %211, %212 : vector<16x64xf32>
    %214 = vector.extract_strided_slice %202 {offsets = [0, 0], sizes = [16, 64], strides = [1, 1]} : vector<16x128xf32> to vector<16x64xf32>
    %215 = arith.mulf %214, %178 : vector<16x64xf32>
    %216 = arith.addf %213, %215 : vector<16x64xf32>
    %217 = vector.extract_strided_slice %216 {offsets = [0, 0], sizes = [8, 32], strides = [1, 1]} : vector<16x64xf32> to vector<8x32xf32>
    %218 = vector.extract_strided_slice %216 {offsets = [8, 32], sizes = [8, 32], strides = [1, 1]} : vector<16x64xf32> to vector<8x32xf32>
    %c64_76 = arith.constant 64 : index
    %c0_77 = arith.constant 0 : index
    %219 = vector.load %arg13[%c64_76, %c0_77] : memref<128x128xf32, #tpu.memory_space<vmem>>, vector<8x32xf32>
    tpu.vector_store %arg13[%c64_76, %c0_77], %217 {strides = array<i32>} : memref<128x128xf32, #tpu.memory_space<vmem>>, vector<8x32xf32>,
    %c56_78 = arith.constant 56 : index
    %c64_79 = arith.constant 64 : index
    %220 = vector.load %arg13[%c56_78, %c64_79] : memref<128x128xf32, #tpu.memory_space<vmem>>, vector<8x32xf32>
    tpu.vector_store %arg13[%c56_78, %c64_79], %217 {strides = array<i32>} : memref<128x128xf32, #tpu.memory_space<vmem>>, vector<8x32xf32>,
    %c48_80 = arith.constant 48 : index
    %c32_81 = arith.constant 32 : index
    %221 = vector.load %arg13[%c48_80, %c32_81] : memref<128x128xf32, #tpu.memory_space<vmem>>, vector<8x32xf32>
    tpu.vector_store %arg13[%c48_80, %c32_81], %218 {strides = array<i32>} : memref<128x128xf32, #tpu.memory_space<vmem>>, vector<8x32xf32>,
    %c72_82 = arith.constant 72 : index
    %c96_83 = arith.constant 96 : index
    %222 = vector.load %arg13[%c72_82, %c96_83] : memref<128x128xf32, #tpu.memory_space<vmem>>, vector<8x32xf32>
    tpu.vector_store %arg13[%c72_82, %c96_83], %218 {strides = array<i32>} : memref<128x128xf32, #tpu.memory_space<vmem>>, vector<8x32xf32>,
    %c80_84 = arith.constant 80 : index
    %c0_85 = arith.constant 0 : index
    %223 = vector.load %arg12[%c80_84, %c0_85] : memref<128x384xf32, #tpu.memory_space<vmem>>, vector<16x384xf32>
    %cst_86 = arith.constant dense<0.000000e+00> : vector<16x384xf32>
    %224 = tpu.matmul %216, %30, %cst_86 {dimension_numbers = #tpu.dot_dimension_numbers<[1], [0], [0], [1], [0, 0, 1, 1], [], []>} : vector<16x64xf32>, vector<64x384xf32>, vector<16x384xf32> -> vector<16x384xf32>
    %225 = vector.extract_strided_slice %223 {offsets = [0, 0], sizes = [16, 128], strides = [1, 1]} : vector<16x384xf32> to vector<16x128xf32>
    %226 = vector.extract_strided_slice %224 {offsets = [0, 0], sizes = [16, 128], strides = [1, 1]} : vector<16x384xf32> to vector<16x128xf32>
    %227 = arith.addf %225, %226 : vector<16x128xf32>
    %228 = arith.negf %227 : vector<16x128xf32>
    %229 = math.exp %228 : vector<16x128xf32>
    %cst_87 = arith.constant 1.000000e+00 : f32
    %230 = vector.broadcast %cst_87 : f32 to vector<16x128xf32>
    %231 = arith.addf %230, %229 : vector<16x128xf32>
    %232 = arith.divf %230, %231 : vector<16x128xf32>
    %233 = vector.extract_strided_slice %223 {offsets = [0, 128], sizes = [16, 128], strides = [1, 1]} : vector<16x384xf32> to vector<16x128xf32>
    %234 = vector.extract_strided_slice %224 {offsets = [0, 128], sizes = [16, 128], strides = [1, 1]} : vector<16x384xf32> to vector<16x128xf32>
    %235 = arith.addf %233, %234 : vector<16x128xf32>
    %236 = arith.negf %235 : vector<16x128xf32>
    %237 = math.exp %236 : vector<16x128xf32>
    %cst_88 = arith.constant 1.000000e+00 : f32
    %238 = vector.broadcast %cst_88 : f32 to vector<16x128xf32>
    %239 = arith.addf %238, %237 : vector<16x128xf32>
    %240 = arith.divf %238, %239 : vector<16x128xf32>
    %241 = vector.extract_strided_slice %223 {offsets = [0, 256], sizes = [16, 128], strides = [1, 1]} : vector<16x384xf32> to vector<16x128xf32>
    %242 = vector.extract_strided_slice %224 {offsets = [0, 256], sizes = [16, 128], strides = [1, 1]} : vector<16x384xf32> to vector<16x128xf32>
    %243 = arith.addf %242, %31 : vector<16x128xf32>
    %244 = arith.mulf %232, %243 : vector<16x128xf32>
    %245 = arith.addf %241, %244 : vector<16x128xf32>
    %246 = math.tanh %245 : vector<16x128xf32>
    %247 = vector.extract_strided_slice %240 {offsets = [0, 0], sizes = [16, 64], strides = [1, 1]} : vector<16x128xf32> to vector<16x64xf32>
    %cst_89 = arith.constant 1.000000e+00 : f32
    %248 = vector.broadcast %cst_89 : f32 to vector<16x64xf32>
    %249 = arith.subf %248, %247 : vector<16x64xf32>
    %250 = vector.extract_strided_slice %246 {offsets = [0, 0], sizes = [16, 64], strides = [1, 1]} : vector<16x128xf32> to vector<16x64xf32>
    %251 = arith.mulf %249, %250 : vector<16x64xf32>
    %252 = vector.extract_strided_slice %240 {offsets = [0, 0], sizes = [16, 64], strides = [1, 1]} : vector<16x128xf32> to vector<16x64xf32>
    %253 = arith.mulf %252, %216 : vector<16x64xf32>
    %254 = arith.addf %251, %253 : vector<16x64xf32>
    %255 = vector.extract_strided_slice %254 {offsets = [0, 0], sizes = [8, 32], strides = [1, 1]} : vector<16x64xf32> to vector<8x32xf32>
    %256 = vector.extract_strided_slice %254 {offsets = [8, 32], sizes = [8, 32], strides = [1, 1]} : vector<16x64xf32> to vector<8x32xf32>
    %c80_90 = arith.constant 80 : index
    %c0_91 = arith.constant 0 : index
    %257 = vector.load %arg13[%c80_90, %c0_91] : memref<128x128xf32, #tpu.memory_space<vmem>>, vector<8x32xf32>
    tpu.vector_store %arg13[%c80_90, %c0_91], %255 {strides = array<i32>} : memref<128x128xf32, #tpu.memory_space<vmem>>, vector<8x32xf32>,
    %c40_92 = arith.constant 40 : index
    %c64_93 = arith.constant 64 : index
    %258 = vector.load %arg13[%c40_92, %c64_93] : memref<128x128xf32, #tpu.memory_space<vmem>>, vector<8x32xf32>
    tpu.vector_store %arg13[%c40_92, %c64_93], %255 {strides = array<i32>} : memref<128x128xf32, #tpu.memory_space<vmem>>, vector<8x32xf32>,
    %c32_94 = arith.constant 32 : index
    %c32_95 = arith.constant 32 : index
    %259 = vector.load %arg13[%c32_94, %c32_95] : memref<128x128xf32, #tpu.memory_space<vmem>>, vector<8x32xf32>
    tpu.vector_store %arg13[%c32_94, %c32_95], %256 {strides = array<i32>} : memref<128x128xf32, #tpu.memory_space<vmem>>, vector<8x32xf32>,
    %c88_96 = arith.constant 88 : index
    %c96_97 = arith.constant 96 : index
    %260 = vector.load %arg13[%c88_96, %c96_97] : memref<128x128xf32, #tpu.memory_space<vmem>>, vector<8x32xf32>
    tpu.vector_store %arg13[%c88_96, %c96_97], %256 {strides = array<i32>} : memref<128x128xf32, #tpu.memory_space<vmem>>, vector<8x32xf32>,
    %c96_98 = arith.constant 96 : index
    %c0_99 = arith.constant 0 : index
    %261 = vector.load %arg12[%c96_98, %c0_99] : memref<128x384xf32, #tpu.memory_space<vmem>>, vector<16x384xf32>
    %cst_100 = arith.constant dense<0.000000e+00> : vector<16x384xf32>
    %262 = tpu.matmul %254, %30, %cst_100 {dimension_numbers = #tpu.dot_dimension_numbers<[1], [0], [0], [1], [0, 0, 1, 1], [], []>} : vector<16x64xf32>, vector<64x384xf32>, vector<16x384xf32> -> vector<16x384xf32>
    %263 = vector.extract_strided_slice %261 {offsets = [0, 0], sizes = [16, 128], strides = [1, 1]} : vector<16x384xf32> to vector<16x128xf32>
    %264 = vector.extract_strided_slice %262 {offsets = [0, 0], sizes = [16, 128], strides = [1, 1]} : vector<16x384xf32> to vector<16x128xf32>
    %265 = arith.addf %263, %264 : vector<16x128xf32>
    %266 = arith.negf %265 : vector<16x128xf32>
    %267 = math.exp %266 : vector<16x128xf32>
    %cst_101 = arith.constant 1.000000e+00 : f32
    %268 = vector.broadcast %cst_101 : f32 to vector<16x128xf32>
    %269 = arith.addf %268, %267 : vector<16x128xf32>
    %270 = arith.divf %268, %269 : vector<16x128xf32>
    %271 = vector.extract_strided_slice %261 {offsets = [0, 128], sizes = [16, 128], strides = [1, 1]} : vector<16x384xf32> to vector<16x128xf32>
    %272 = vector.extract_strided_slice %262 {offsets = [0, 128], sizes = [16, 128], strides = [1, 1]} : vector<16x384xf32> to vector<16x128xf32>
    %273 = arith.addf %271, %272 : vector<16x128xf32>
    %274 = arith.negf %273 : vector<16x128xf32>
    %275 = math.exp %274 : vector<16x128xf32>
    %cst_102 = arith.constant 1.000000e+00 : f32
    %276 = vector.broadcast %cst_102 : f32 to vector<16x128xf32>
    %277 = arith.addf %276, %275 : vector<16x128xf32>
    %278 = arith.divf %276, %277 : vector<16x128xf32>
    %279 = vector.extract_strided_slice %261 {offsets = [0, 256], sizes = [16, 128], strides = [1, 1]} : vector<16x384xf32> to vector<16x128xf32>
    %280 = vector.extract_strided_slice %262 {offsets = [0, 256], sizes = [16, 128], strides = [1, 1]} : vector<16x384xf32> to vector<16x128xf32>
    %281 = arith.addf %280, %31 : vector<16x128xf32>
    %282 = arith.mulf %270, %281 : vector<16x128xf32>
    %283 = arith.addf %279, %282 : vector<16x128xf32>
    %284 = math.tanh %283 : vector<16x128xf32>
    %285 = vector.extract_strided_slice %278 {offsets = [0, 0], sizes = [16, 64], strides = [1, 1]} : vector<16x128xf32> to vector<16x64xf32>
    %cst_103 = arith.constant 1.000000e+00 : f32
    %286 = vector.broadcast %cst_103 : f32 to vector<16x64xf32>
    %287 = arith.subf %286, %285 : vector<16x64xf32>
    %288 = vector.extract_strided_slice %284 {offsets = [0, 0], sizes = [16, 64], strides = [1, 1]} : vector<16x128xf32> to vector<16x64xf32>
    %289 = arith.mulf %287, %288 : vector<16x64xf32>
    %290 = vector.extract_strided_slice %278 {offsets = [0, 0], sizes = [16, 64], strides = [1, 1]} : vector<16x128xf32> to vector<16x64xf32>
    %291 = arith.mulf %290, %254 : vector<16x64xf32>
    %292 = arith.addf %289, %291 : vector<16x64xf32>
    %293 = vector.extract_strided_slice %292 {offsets = [0, 0], sizes = [8, 32], strides = [1, 1]} : vector<16x64xf32> to vector<8x32xf32>
    %294 = vector.extract_strided_slice %292 {offsets = [8, 32], sizes = [8, 32], strides = [1, 1]} : vector<16x64xf32> to vector<8x32xf32>
    %c96_104 = arith.constant 96 : index
    %c0_105 = arith.constant 0 : index
    %295 = vector.load %arg13[%c96_104, %c0_105] : memref<128x128xf32, #tpu.memory_space<vmem>>, vector<8x32xf32>
    tpu.vector_store %arg13[%c96_104, %c0_105], %293 {strides = array<i32>} : memref<128x128xf32, #tpu.memory_space<vmem>>, vector<8x32xf32>,
    %c24_106 = arith.constant 24 : index
    %c64_107 = arith.constant 64 : index
    %296 = vector.load %arg13[%c24_106, %c64_107] : memref<128x128xf32, #tpu.memory_space<vmem>>, vector<8x32xf32>
    tpu.vector_store %arg13[%c24_106, %c64_107], %293 {strides = array<i32>} : memref<128x128xf32, #tpu.memory_space<vmem>>, vector<8x32xf32>,
    %c16_108 = arith.constant 16 : index
    %c32_109 = arith.constant 32 : index
    %297 = vector.load %arg13[%c16_108, %c32_109] : memref<128x128xf32, #tpu.memory_space<vmem>>, vector<8x32xf32>
    tpu.vector_store %arg13[%c16_108, %c32_109], %294 {strides = array<i32>} : memref<128x128xf32, #tpu.memory_space<vmem>>, vector<8x32xf32>,
    %c104_110 = arith.constant 104 : index
    %c96_111 = arith.constant 96 : index
    %298 = vector.load %arg13[%c104_110, %c96_111] : memref<128x128xf32, #tpu.memory_space<vmem>>, vector<8x32xf32>
    tpu.vector_store %arg13[%c104_110, %c96_111], %294 {strides = array<i32>} : memref<128x128xf32, #tpu.memory_space<vmem>>, vector<8x32xf32>,
    %c112_112 = arith.constant 112 : index
    %c0_113 = arith.constant 0 : index
    %299 = vector.load %arg12[%c112_112, %c0_113] : memref<128x384xf32, #tpu.memory_space<vmem>>, vector<16x384xf32>
    %cst_114 = arith.constant dense<0.000000e+00> : vector<16x384xf32>
    %300 = tpu.matmul %292, %30, %cst_114 {dimension_numbers = #tpu.dot_dimension_numbers<[1], [0], [0], [1], [0, 0, 1, 1], [], []>} : vector<16x64xf32>, vector<64x384xf32>, vector<16x384xf32> -> vector<16x384xf32>
    %301 = vector.extract_strided_slice %299 {offsets = [0, 0], sizes = [16, 128], strides = [1, 1]} : vector<16x384xf32> to vector<16x128xf32>
    %302 = vector.extract_strided_slice %300 {offsets = [0, 0], sizes = [16, 128], strides = [1, 1]} : vector<16x384xf32> to vector<16x128xf32>
    %303 = arith.addf %301, %302 : vector<16x128xf32>
    %304 = arith.negf %303 : vector<16x128xf32>
    %305 = math.exp %304 : vector<16x128xf32>
    %cst_115 = arith.constant 1.000000e+00 : f32
    %306 = vector.broadcast %cst_115 : f32 to vector<16x128xf32>
    %307 = arith.addf %306, %305 : vector<16x128xf32>
    %308 = arith.divf %306, %307 : vector<16x128xf32>
    %309 = vector.extract_strided_slice %299 {offsets = [0, 128], sizes = [16, 128], strides = [1, 1]} : vector<16x384xf32> to vector<16x128xf32>
    %310 = vector.extract_strided_slice %300 {offsets = [0, 128], sizes = [16, 128], strides = [1, 1]} : vector<16x384xf32> to vector<16x128xf32>
    %311 = arith.addf %309, %310 : vector<16x128xf32>
    %312 = arith.negf %311 : vector<16x128xf32>
    %313 = math.exp %312 : vector<16x128xf32>
    %cst_116 = arith.constant 1.000000e+00 : f32
    %314 = vector.broadcast %cst_116 : f32 to vector<16x128xf32>
    %315 = arith.addf %314, %313 : vector<16x128xf32>
    %316 = arith.divf %314, %315 : vector<16x128xf32>
    %317 = vector.extract_strided_slice %299 {offsets = [0, 256], sizes = [16, 128], strides = [1, 1]} : vector<16x384xf32> to vector<16x128xf32>
    %318 = vector.extract_strided_slice %300 {offsets = [0, 256], sizes = [16, 128], strides = [1, 1]} : vector<16x384xf32> to vector<16x128xf32>
    %319 = arith.addf %318, %31 : vector<16x128xf32>
    %320 = arith.mulf %308, %319 : vector<16x128xf32>
    %321 = arith.addf %317, %320 : vector<16x128xf32>
    %322 = math.tanh %321 : vector<16x128xf32>
    %323 = vector.extract_strided_slice %316 {offsets = [0, 0], sizes = [16, 64], strides = [1, 1]} : vector<16x128xf32> to vector<16x64xf32>
    %cst_117 = arith.constant 1.000000e+00 : f32
    %324 = vector.broadcast %cst_117 : f32 to vector<16x64xf32>
    %325 = arith.subf %324, %323 : vector<16x64xf32>
    %326 = vector.extract_strided_slice %322 {offsets = [0, 0], sizes = [16, 64], strides = [1, 1]} : vector<16x128xf32> to vector<16x64xf32>
    %327 = arith.mulf %325, %326 : vector<16x64xf32>
    %328 = vector.extract_strided_slice %316 {offsets = [0, 0], sizes = [16, 64], strides = [1, 1]} : vector<16x128xf32> to vector<16x64xf32>
    %329 = arith.mulf %328, %292 : vector<16x64xf32>
    %330 = arith.addf %327, %329 : vector<16x64xf32>
    %331 = vector.extract_strided_slice %330 {offsets = [0, 0], sizes = [8, 32], strides = [1, 1]} : vector<16x64xf32> to vector<8x32xf32>
    %332 = vector.extract_strided_slice %330 {offsets = [8, 32], sizes = [8, 32], strides = [1, 1]} : vector<16x64xf32> to vector<8x32xf32>
    %c112_118 = arith.constant 112 : index
    %c0_119 = arith.constant 0 : index
    %333 = vector.load %arg13[%c112_118, %c0_119] : memref<128x128xf32, #tpu.memory_space<vmem>>, vector<8x32xf32>
    tpu.vector_store %arg13[%c112_118, %c0_119], %331 {strides = array<i32>} : memref<128x128xf32, #tpu.memory_space<vmem>>, vector<8x32xf32>,
    %c8_120 = arith.constant 8 : index
    %c64_121 = arith.constant 64 : index
    %334 = vector.load %arg13[%c8_120, %c64_121] : memref<128x128xf32, #tpu.memory_space<vmem>>, vector<8x32xf32>
    tpu.vector_store %arg13[%c8_120, %c64_121], %331 {strides = array<i32>} : memref<128x128xf32, #tpu.memory_space<vmem>>, vector<8x32xf32>,
    %c0_122 = arith.constant 0 : index
    %c32_123 = arith.constant 32 : index
    %335 = vector.load %arg13[%c0_122, %c32_123] : memref<128x128xf32, #tpu.memory_space<vmem>>, vector<8x32xf32>
    tpu.vector_store %arg13[%c0_122, %c32_123], %332 {strides = array<i32>} : memref<128x128xf32, #tpu.memory_space<vmem>>, vector<8x32xf32>,
    %c120_124 = arith.constant 120 : index
    %c96_125 = arith.constant 96 : index
    %336 = vector.load %arg13[%c120_124, %c96_125] : memref<128x128xf32, #tpu.memory_space<vmem>>, vector<8x32xf32>
    tpu.vector_store %arg13[%c120_124, %c96_125], %332 {strides = array<i32>} : memref<128x128xf32, #tpu.memory_space<vmem>>, vector<8x32xf32>,
    %c0_126 = arith.constant 0 : index
    %c0_127 = arith.constant 0 : index
    %337 = vector.load %arg13[%c0_126, %c0_127] : memref<128x128xf32, #tpu.memory_space<vmem>>, vector<128x128xf32>
    %c0_128 = arith.constant 0 : index
    %c0_129 = arith.constant 0 : index
    %338 = vector.load %arg5[%c0_128, %c0_129] : memref<128x384xf32, #tpu.memory_space<vmem>>, vector<128x384xf32>
    %cst_130 = arith.constant dense<0.000000e+00> : vector<128x384xf32>
    %339 = tpu.matmul %337, %338, %cst_130 {dimension_numbers = #tpu.dot_dimension_numbers<[1], [0], [0], [1], [0, 0, 1, 1], [], []>} : vector<128x128xf32>, vector<128x384xf32>, vector<128x384xf32> -> vector<128x384xf32>
    %c0_131 = arith.constant 0 : index
    %c0_132 = arith.constant 0 : index
    %340 = vector.load %arg7[%c0_131, %c0_132] : memref<16x384xf32, #tpu.memory_space<vmem>>, vector<16x384xf32>
    %341 = vector.extract_strided_slice %339 {offsets = [0, 0], sizes = [16, 384], strides = [1, 1]} : vector<128x384xf32> to vector<16x384xf32>
    %342 = arith.addf %341, %340 : vector<16x384xf32>
    %c0_133 = arith.constant 0 : index
    %c0_134 = arith.constant 0 : index
    %343 = vector.load %arg12[%c0_133, %c0_134] : memref<128x384xf32, #tpu.memory_space<vmem>>, vector<16x384xf32>
    tpu.vector_store %arg12[%c0_133, %c0_134], %342 {strides = array<i32>} : memref<128x384xf32, #tpu.memory_space<vmem>>, vector<16x384xf32>,
    %344 = vector.extract_strided_slice %339 {offsets = [16, 0], sizes = [16, 384], strides = [1, 1]} : vector<128x384xf32> to vector<16x384xf32>
    %345 = arith.addf %344, %340 : vector<16x384xf32>
    %c16_135 = arith.constant 16 : index
    %c0_136 = arith.constant 0 : index
    %346 = vector.load %arg12[%c16_135, %c0_136] : memref<128x384xf32, #tpu.memory_space<vmem>>, vector<16x384xf32>
    tpu.vector_store %arg12[%c16_135, %c0_136], %345 {strides = array<i32>} : memref<128x384xf32, #tpu.memory_space<vmem>>, vector<16x384xf32>,
    %347 = vector.extract_strided_slice %339 {offsets = [32, 0], sizes = [16, 384], strides = [1, 1]} : vector<128x384xf32> to vector<16x384xf32>
    %348 = arith.addf %347, %340 : vector<16x384xf32>
    %c32_137 = arith.constant 32 : index
    %c0_138 = arith.constant 0 : index
    %349 = vector.load %arg12[%c32_137, %c0_138] : memref<128x384xf32, #tpu.memory_space<vmem>>, vector<16x384xf32>
    tpu.vector_store %arg12[%c32_137, %c0_138], %348 {strides = array<i32>} : memref<128x384xf32, #tpu.memory_space<vmem>>, vector<16x384xf32>,
    %350 = vector.extract_strided_slice %339 {offsets = [48, 0], sizes = [16, 384], strides = [1, 1]} : vector<128x384xf32> to vector<16x384xf32>
    %351 = arith.addf %350, %340 : vector<16x384xf32>
    %c48_139 = arith.constant 48 : index
    %c0_140 = arith.constant 0 : index
    %352 = vector.load %arg12[%c48_139, %c0_140] : memref<128x384xf32, #tpu.memory_space<vmem>>, vector<16x384xf32>
    tpu.vector_store %arg12[%c48_139, %c0_140], %351 {strides = array<i32>} : memref<128x384xf32, #tpu.memory_space<vmem>>, vector<16x384xf32>,
    %353 = vector.extract_strided_slice %339 {offsets = [64, 0], sizes = [16, 384], strides = [1, 1]} : vector<128x384xf32> to vector<16x384xf32>
    %354 = arith.addf %353, %340 : vector<16x384xf32>
    %c64_141 = arith.constant 64 : index
    %c0_142 = arith.constant 0 : index
    %355 = vector.load %arg12[%c64_141, %c0_142] : memref<128x384xf32, #tpu.memory_space<vmem>>, vector<16x384xf32>
    tpu.vector_store %arg12[%c64_141, %c0_142], %354 {strides = array<i32>} : memref<128x384xf32, #tpu.memory_space<vmem>>, vector<16x384xf32>,
    %356 = vector.extract_strided_slice %339 {offsets = [80, 0], sizes = [16, 384], strides = [1, 1]} : vector<128x384xf32> to vector<16x384xf32>
    %357 = arith.addf %356, %340 : vector<16x384xf32>
    %c80_143 = arith.constant 80 : index
    %c0_144 = arith.constant 0 : index
    %358 = vector.load %arg12[%c80_143, %c0_144] : memref<128x384xf32, #tpu.memory_space<vmem>>, vector<16x384xf32>
    tpu.vector_store %arg12[%c80_143, %c0_144], %357 {strides = array<i32>} : memref<128x384xf32, #tpu.memory_space<vmem>>, vector<16x384xf32>,
    %359 = vector.extract_strided_slice %339 {offsets = [96, 0], sizes = [16, 384], strides = [1, 1]} : vector<128x384xf32> to vector<16x384xf32>
    %360 = arith.addf %359, %340 : vector<16x384xf32>
    %c96_145 = arith.constant 96 : index
    %c0_146 = arith.constant 0 : index
    %361 = vector.load %arg12[%c96_145, %c0_146] : memref<128x384xf32, #tpu.memory_space<vmem>>, vector<16x384xf32>
    tpu.vector_store %arg12[%c96_145, %c0_146], %360 {strides = array<i32>} : memref<128x384xf32, #tpu.memory_space<vmem>>, vector<16x384xf32>,
    %362 = vector.extract_strided_slice %339 {offsets = [112, 0], sizes = [16, 384], strides = [1, 1]} : vector<128x384xf32> to vector<16x384xf32>
    %363 = arith.addf %362, %340 : vector<16x384xf32>
    %c112_147 = arith.constant 112 : index
    %c0_148 = arith.constant 0 : index
    %364 = vector.load %arg12[%c112_147, %c0_148] : memref<128x384xf32, #tpu.memory_space<vmem>>, vector<16x384xf32>
    tpu.vector_store %arg12[%c112_147, %c0_148], %363 {strides = array<i32>} : memref<128x384xf32, #tpu.memory_space<vmem>>, vector<16x384xf32>,
    %c0_149 = arith.constant 0 : index
    %c0_150 = arith.constant 0 : index
    %365 = vector.load %arg6[%c0_149, %c0_150] : memref<64x384xf32, #tpu.memory_space<vmem>>, vector<64x384xf32>
    %c0_151 = arith.constant 0 : index
    %c0_152 = arith.constant 0 : index
    %366 = vector.load %arg8[%c0_151, %c0_152] : memref<16x128xf32, #tpu.memory_space<vmem>>, vector<16x128xf32>
    %cst_153 = arith.constant 0.000000e+00 : f32
    %367 = vector.broadcast %cst_153 : f32 to vector<16x64xf32>
    %c0_154 = arith.constant 0 : index
    %c0_155 = arith.constant 0 : index
    %368 = vector.load %arg12[%c0_154, %c0_155] : memref<128x384xf32, #tpu.memory_space<vmem>>, vector<16x384xf32>
    %cst_156 = arith.constant dense<0.000000e+00> : vector<16x384xf32>
    %369 = tpu.matmul %367, %365, %cst_156 {dimension_numbers = #tpu.dot_dimension_numbers<[1], [0], [0], [1], [0, 0, 1, 1], [], []>} : vector<16x64xf32>, vector<64x384xf32>, vector<16x384xf32> -> vector<16x384xf32>
    %370 = vector.extract_strided_slice %368 {offsets = [0, 0], sizes = [16, 128], strides = [1, 1]} : vector<16x384xf32> to vector<16x128xf32>
    %371 = vector.extract_strided_slice %369 {offsets = [0, 0], sizes = [16, 128], strides = [1, 1]} : vector<16x384xf32> to vector<16x128xf32>
    %372 = arith.addf %370, %371 : vector<16x128xf32>
    %373 = arith.negf %372 : vector<16x128xf32>
    %374 = math.exp %373 : vector<16x128xf32>
    %cst_157 = arith.constant 1.000000e+00 : f32
    %375 = vector.broadcast %cst_157 : f32 to vector<16x128xf32>
    %376 = arith.addf %375, %374 : vector<16x128xf32>
    %377 = arith.divf %375, %376 : vector<16x128xf32>
    %378 = vector.extract_strided_slice %368 {offsets = [0, 128], sizes = [16, 128], strides = [1, 1]} : vector<16x384xf32> to vector<16x128xf32>
    %379 = vector.extract_strided_slice %369 {offsets = [0, 128], sizes = [16, 128], strides = [1, 1]} : vector<16x384xf32> to vector<16x128xf32>
    %380 = arith.addf %378, %379 : vector<16x128xf32>
    %381 = arith.negf %380 : vector<16x128xf32>
    %382 = math.exp %381 : vector<16x128xf32>
    %cst_158 = arith.constant 1.000000e+00 : f32
    %383 = vector.broadcast %cst_158 : f32 to vector<16x128xf32>
    %384 = arith.addf %383, %382 : vector<16x128xf32>
    %385 = arith.divf %383, %384 : vector<16x128xf32>
    %386 = vector.extract_strided_slice %368 {offsets = [0, 256], sizes = [16, 128], strides = [1, 1]} : vector<16x384xf32> to vector<16x128xf32>
    %387 = vector.extract_strided_slice %369 {offsets = [0, 256], sizes = [16, 128], strides = [1, 1]} : vector<16x384xf32> to vector<16x128xf32>
    %388 = arith.addf %387, %366 : vector<16x128xf32>
    %389 = arith.mulf %377, %388 : vector<16x128xf32>
    %390 = arith.addf %386, %389 : vector<16x128xf32>
    %391 = math.tanh %390 : vector<16x128xf32>
    %392 = vector.extract_strided_slice %385 {offsets = [0, 0], sizes = [16, 64], strides = [1, 1]} : vector<16x128xf32> to vector<16x64xf32>
    %cst_159 = arith.constant 1.000000e+00 : f32
    %393 = vector.broadcast %cst_159 : f32 to vector<16x64xf32>
    %394 = arith.subf %393, %392 : vector<16x64xf32>
    %395 = vector.extract_strided_slice %391 {offsets = [0, 0], sizes = [16, 64], strides = [1, 1]} : vector<16x128xf32> to vector<16x64xf32>
    %396 = arith.mulf %394, %395 : vector<16x64xf32>
    %397 = vector.extract_strided_slice %385 {offsets = [0, 0], sizes = [16, 64], strides = [1, 1]} : vector<16x128xf32> to vector<16x64xf32>
    %398 = arith.mulf %397, %367 : vector<16x64xf32>
    %399 = arith.addf %396, %398 : vector<16x64xf32>
    %400 = vector.extract_strided_slice %399 {offsets = [8, 32], sizes = [8, 32], strides = [1, 1]} : vector<16x64xf32> to vector<8x32xf32>
    %c16_160 = arith.constant 16 : index
    %c0_161 = arith.constant 0 : index
    %401 = vector.load %arg12[%c16_160, %c0_161] : memref<128x384xf32, #tpu.memory_space<vmem>>, vector<16x384xf32>
    %cst_162 = arith.constant dense<0.000000e+00> : vector<16x384xf32>
    %402 = tpu.matmul %399, %365, %cst_162 {dimension_numbers = #tpu.dot_dimension_numbers<[1], [0], [0], [1], [0, 0, 1, 1], [], []>} : vector<16x64xf32>, vector<64x384xf32>, vector<16x384xf32> -> vector<16x384xf32>
    %403 = vector.extract_strided_slice %401 {offsets = [0, 0], sizes = [16, 128], strides = [1, 1]} : vector<16x384xf32> to vector<16x128xf32>
    %404 = vector.extract_strided_slice %402 {offsets = [0, 0], sizes = [16, 128], strides = [1, 1]} : vector<16x384xf32> to vector<16x128xf32>
    %405 = arith.addf %403, %404 : vector<16x128xf32>
    %406 = arith.negf %405 : vector<16x128xf32>
    %407 = math.exp %406 : vector<16x128xf32>
    %cst_163 = arith.constant 1.000000e+00 : f32
    %408 = vector.broadcast %cst_163 : f32 to vector<16x128xf32>
    %409 = arith.addf %408, %407 : vector<16x128xf32>
    %410 = arith.divf %408, %409 : vector<16x128xf32>
    %411 = vector.extract_strided_slice %401 {offsets = [0, 128], sizes = [16, 128], strides = [1, 1]} : vector<16x384xf32> to vector<16x128xf32>
    %412 = vector.extract_strided_slice %402 {offsets = [0, 128], sizes = [16, 128], strides = [1, 1]} : vector<16x384xf32> to vector<16x128xf32>
    %413 = arith.addf %411, %412 : vector<16x128xf32>
    %414 = arith.negf %413 : vector<16x128xf32>
    %415 = math.exp %414 : vector<16x128xf32>
    %cst_164 = arith.constant 1.000000e+00 : f32
    %416 = vector.broadcast %cst_164 : f32 to vector<16x128xf32>
    %417 = arith.addf %416, %415 : vector<16x128xf32>
    %418 = arith.divf %416, %417 : vector<16x128xf32>
    %419 = vector.extract_strided_slice %401 {offsets = [0, 256], sizes = [16, 128], strides = [1, 1]} : vector<16x384xf32> to vector<16x128xf32>
    %420 = vector.extract_strided_slice %402 {offsets = [0, 256], sizes = [16, 128], strides = [1, 1]} : vector<16x384xf32> to vector<16x128xf32>
    %421 = arith.addf %420, %366 : vector<16x128xf32>
    %422 = arith.mulf %410, %421 : vector<16x128xf32>
    %423 = arith.addf %419, %422 : vector<16x128xf32>
    %424 = math.tanh %423 : vector<16x128xf32>
    %425 = vector.extract_strided_slice %418 {offsets = [0, 0], sizes = [16, 64], strides = [1, 1]} : vector<16x128xf32> to vector<16x64xf32>
    %cst_165 = arith.constant 1.000000e+00 : f32
    %426 = vector.broadcast %cst_165 : f32 to vector<16x64xf32>
    %427 = arith.subf %426, %425 : vector<16x64xf32>
    %428 = vector.extract_strided_slice %424 {offsets = [0, 0], sizes = [16, 64], strides = [1, 1]} : vector<16x128xf32> to vector<16x64xf32>
    %429 = arith.mulf %427, %428 : vector<16x64xf32>
    %430 = vector.extract_strided_slice %418 {offsets = [0, 0], sizes = [16, 64], strides = [1, 1]} : vector<16x128xf32> to vector<16x64xf32>
    %431 = arith.mulf %430, %399 : vector<16x64xf32>
    %432 = arith.addf %429, %431 : vector<16x64xf32>
    %c32_166 = arith.constant 32 : index
    %c0_167 = arith.constant 0 : index
    %433 = vector.load %arg12[%c32_166, %c0_167] : memref<128x384xf32, #tpu.memory_space<vmem>>, vector<16x384xf32>
    %cst_168 = arith.constant dense<0.000000e+00> : vector<16x384xf32>
    %434 = tpu.matmul %432, %365, %cst_168 {dimension_numbers = #tpu.dot_dimension_numbers<[1], [0], [0], [1], [0, 0, 1, 1], [], []>} : vector<16x64xf32>, vector<64x384xf32>, vector<16x384xf32> -> vector<16x384xf32>
    %435 = vector.extract_strided_slice %433 {offsets = [0, 0], sizes = [16, 128], strides = [1, 1]} : vector<16x384xf32> to vector<16x128xf32>
    %436 = vector.extract_strided_slice %434 {offsets = [0, 0], sizes = [16, 128], strides = [1, 1]} : vector<16x384xf32> to vector<16x128xf32>
    %437 = arith.addf %435, %436 : vector<16x128xf32>
    %438 = arith.negf %437 : vector<16x128xf32>
    %439 = math.exp %438 : vector<16x128xf32>
    %cst_169 = arith.constant 1.000000e+00 : f32
    %440 = vector.broadcast %cst_169 : f32 to vector<16x128xf32>
    %441 = arith.addf %440, %439 : vector<16x128xf32>
    %442 = arith.divf %440, %441 : vector<16x128xf32>
    %443 = vector.extract_strided_slice %433 {offsets = [0, 128], sizes = [16, 128], strides = [1, 1]} : vector<16x384xf32> to vector<16x128xf32>
    %444 = vector.extract_strided_slice %434 {offsets = [0, 128], sizes = [16, 128], strides = [1, 1]} : vector<16x384xf32> to vector<16x128xf32>
    %445 = arith.addf %443, %444 : vector<16x128xf32>
    %446 = arith.negf %445 : vector<16x128xf32>
    %447 = math.exp %446 : vector<16x128xf32>
    %cst_170 = arith.constant 1.000000e+00 : f32
    %448 = vector.broadcast %cst_170 : f32 to vector<16x128xf32>
    %449 = arith.addf %448, %447 : vector<16x128xf32>
    %450 = arith.divf %448, %449 : vector<16x128xf32>
    %451 = vector.extract_strided_slice %433 {offsets = [0, 256], sizes = [16, 128], strides = [1, 1]} : vector<16x384xf32> to vector<16x128xf32>
    %452 = vector.extract_strided_slice %434 {offsets = [0, 256], sizes = [16, 128], strides = [1, 1]} : vector<16x384xf32> to vector<16x128xf32>
    %453 = arith.addf %452, %366 : vector<16x128xf32>
    %454 = arith.mulf %442, %453 : vector<16x128xf32>
    %455 = arith.addf %451, %454 : vector<16x128xf32>
    %456 = math.tanh %455 : vector<16x128xf32>
    %457 = vector.extract_strided_slice %450 {offsets = [0, 0], sizes = [16, 64], strides = [1, 1]} : vector<16x128xf32> to vector<16x64xf32>
    %cst_171 = arith.constant 1.000000e+00 : f32
    %458 = vector.broadcast %cst_171 : f32 to vector<16x64xf32>
    %459 = arith.subf %458, %457 : vector<16x64xf32>
    %460 = vector.extract_strided_slice %456 {offsets = [0, 0], sizes = [16, 64], strides = [1, 1]} : vector<16x128xf32> to vector<16x64xf32>
    %461 = arith.mulf %459, %460 : vector<16x64xf32>
    %462 = vector.extract_strided_slice %450 {offsets = [0, 0], sizes = [16, 64], strides = [1, 1]} : vector<16x128xf32> to vector<16x64xf32>
    %463 = arith.mulf %462, %432 : vector<16x64xf32>
    %464 = arith.addf %461, %463 : vector<16x64xf32>
    %c48_172 = arith.constant 48 : index
    %c0_173 = arith.constant 0 : index
    %465 = vector.load %arg12[%c48_172, %c0_173] : memref<128x384xf32, #tpu.memory_space<vmem>>, vector<16x384xf32>
    %cst_174 = arith.constant dense<0.000000e+00> : vector<16x384xf32>
    %466 = tpu.matmul %464, %365, %cst_174 {dimension_numbers = #tpu.dot_dimension_numbers<[1], [0], [0], [1], [0, 0, 1, 1], [], []>} : vector<16x64xf32>, vector<64x384xf32>, vector<16x384xf32> -> vector<16x384xf32>
    %467 = vector.extract_strided_slice %465 {offsets = [0, 0], sizes = [16, 128], strides = [1, 1]} : vector<16x384xf32> to vector<16x128xf32>
    %468 = vector.extract_strided_slice %466 {offsets = [0, 0], sizes = [16, 128], strides = [1, 1]} : vector<16x384xf32> to vector<16x128xf32>
    %469 = arith.addf %467, %468 : vector<16x128xf32>
    %470 = arith.negf %469 : vector<16x128xf32>
    %471 = math.exp %470 : vector<16x128xf32>
    %cst_175 = arith.constant 1.000000e+00 : f32
    %472 = vector.broadcast %cst_175 : f32 to vector<16x128xf32>
    %473 = arith.addf %472, %471 : vector<16x128xf32>
    %474 = arith.divf %472, %473 : vector<16x128xf32>
    %475 = vector.extract_strided_slice %465 {offsets = [0, 128], sizes = [16, 128], strides = [1, 1]} : vector<16x384xf32> to vector<16x128xf32>
    %476 = vector.extract_strided_slice %466 {offsets = [0, 128], sizes = [16, 128], strides = [1, 1]} : vector<16x384xf32> to vector<16x128xf32>
    %477 = arith.addf %475, %476 : vector<16x128xf32>
    %478 = arith.negf %477 : vector<16x128xf32>
    %479 = math.exp %478 : vector<16x128xf32>
    %cst_176 = arith.constant 1.000000e+00 : f32
    %480 = vector.broadcast %cst_176 : f32 to vector<16x128xf32>
    %481 = arith.addf %480, %479 : vector<16x128xf32>
    %482 = arith.divf %480, %481 : vector<16x128xf32>
    %483 = vector.extract_strided_slice %465 {offsets = [0, 256], sizes = [16, 128], strides = [1, 1]} : vector<16x384xf32> to vector<16x128xf32>
    %484 = vector.extract_strided_slice %466 {offsets = [0, 256], sizes = [16, 128], strides = [1, 1]} : vector<16x384xf32> to vector<16x128xf32>
    %485 = arith.addf %484, %366 : vector<16x128xf32>
    %486 = arith.mulf %474, %485 : vector<16x128xf32>
    %487 = arith.addf %483, %486 : vector<16x128xf32>
    %488 = math.tanh %487 : vector<16x128xf32>
    %489 = vector.extract_strided_slice %482 {offsets = [0, 0], sizes = [16, 64], strides = [1, 1]} : vector<16x128xf32> to vector<16x64xf32>
    %cst_177 = arith.constant 1.000000e+00 : f32
    %490 = vector.broadcast %cst_177 : f32 to vector<16x64xf32>
    %491 = arith.subf %490, %489 : vector<16x64xf32>
    %492 = vector.extract_strided_slice %488 {offsets = [0, 0], sizes = [16, 64], strides = [1, 1]} : vector<16x128xf32> to vector<16x64xf32>
    %493 = arith.mulf %491, %492 : vector<16x64xf32>
    %494 = vector.extract_strided_slice %482 {offsets = [0, 0], sizes = [16, 64], strides = [1, 1]} : vector<16x128xf32> to vector<16x64xf32>
    %495 = arith.mulf %494, %464 : vector<16x64xf32>
    %496 = arith.addf %493, %495 : vector<16x64xf32>
    %c64_178 = arith.constant 64 : index
    %c0_179 = arith.constant 0 : index
    %497 = vector.load %arg12[%c64_178, %c0_179] : memref<128x384xf32, #tpu.memory_space<vmem>>, vector<16x384xf32>
    %cst_180 = arith.constant dense<0.000000e+00> : vector<16x384xf32>
    %498 = tpu.matmul %496, %365, %cst_180 {dimension_numbers = #tpu.dot_dimension_numbers<[1], [0], [0], [1], [0, 0, 1, 1], [], []>} : vector<16x64xf32>, vector<64x384xf32>, vector<16x384xf32> -> vector<16x384xf32>
    %499 = vector.extract_strided_slice %497 {offsets = [0, 0], sizes = [16, 128], strides = [1, 1]} : vector<16x384xf32> to vector<16x128xf32>
    %500 = vector.extract_strided_slice %498 {offsets = [0, 0], sizes = [16, 128], strides = [1, 1]} : vector<16x384xf32> to vector<16x128xf32>
    %501 = arith.addf %499, %500 : vector<16x128xf32>
    %502 = arith.negf %501 : vector<16x128xf32>
    %503 = math.exp %502 : vector<16x128xf32>
    %cst_181 = arith.constant 1.000000e+00 : f32
    %504 = vector.broadcast %cst_181 : f32 to vector<16x128xf32>
    %505 = arith.addf %504, %503 : vector<16x128xf32>
    %506 = arith.divf %504, %505 : vector<16x128xf32>
    %507 = vector.extract_strided_slice %497 {offsets = [0, 128], sizes = [16, 128], strides = [1, 1]} : vector<16x384xf32> to vector<16x128xf32>
    %508 = vector.extract_strided_slice %498 {offsets = [0, 128], sizes = [16, 128], strides = [1, 1]} : vector<16x384xf32> to vector<16x128xf32>
    %509 = arith.addf %507, %508 : vector<16x128xf32>
    %510 = arith.negf %509 : vector<16x128xf32>
    %511 = math.exp %510 : vector<16x128xf32>
    %cst_182 = arith.constant 1.000000e+00 : f32
    %512 = vector.broadcast %cst_182 : f32 to vector<16x128xf32>
    %513 = arith.addf %512, %511 : vector<16x128xf32>
    %514 = arith.divf %512, %513 : vector<16x128xf32>
    %515 = vector.extract_strided_slice %497 {offsets = [0, 256], sizes = [16, 128], strides = [1, 1]} : vector<16x384xf32> to vector<16x128xf32>
    %516 = vector.extract_strided_slice %498 {offsets = [0, 256], sizes = [16, 128], strides = [1, 1]} : vector<16x384xf32> to vector<16x128xf32>
    %517 = arith.addf %516, %366 : vector<16x128xf32>
    %518 = arith.mulf %506, %517 : vector<16x128xf32>
    %519 = arith.addf %515, %518 : vector<16x128xf32>
    %520 = math.tanh %519 : vector<16x128xf32>
    %521 = vector.extract_strided_slice %514 {offsets = [0, 0], sizes = [16, 64], strides = [1, 1]} : vector<16x128xf32> to vector<16x64xf32>
    %cst_183 = arith.constant 1.000000e+00 : f32
    %522 = vector.broadcast %cst_183 : f32 to vector<16x64xf32>
    %523 = arith.subf %522, %521 : vector<16x64xf32>
    %524 = vector.extract_strided_slice %520 {offsets = [0, 0], sizes = [16, 64], strides = [1, 1]} : vector<16x128xf32> to vector<16x64xf32>
    %525 = arith.mulf %523, %524 : vector<16x64xf32>
    %526 = vector.extract_strided_slice %514 {offsets = [0, 0], sizes = [16, 64], strides = [1, 1]} : vector<16x128xf32> to vector<16x64xf32>
    %527 = arith.mulf %526, %496 : vector<16x64xf32>
    %528 = arith.addf %525, %527 : vector<16x64xf32>
    %c80_184 = arith.constant 80 : index
    %c0_185 = arith.constant 0 : index
    %529 = vector.load %arg12[%c80_184, %c0_185] : memref<128x384xf32, #tpu.memory_space<vmem>>, vector<16x384xf32>
    %cst_186 = arith.constant dense<0.000000e+00> : vector<16x384xf32>
    %530 = tpu.matmul %528, %365, %cst_186 {dimension_numbers = #tpu.dot_dimension_numbers<[1], [0], [0], [1], [0, 0, 1, 1], [], []>} : vector<16x64xf32>, vector<64x384xf32>, vector<16x384xf32> -> vector<16x384xf32>
    %531 = vector.extract_strided_slice %529 {offsets = [0, 0], sizes = [16, 128], strides = [1, 1]} : vector<16x384xf32> to vector<16x128xf32>
    %532 = vector.extract_strided_slice %530 {offsets = [0, 0], sizes = [16, 128], strides = [1, 1]} : vector<16x384xf32> to vector<16x128xf32>
    %533 = arith.addf %531, %532 : vector<16x128xf32>
    %534 = arith.negf %533 : vector<16x128xf32>
    %535 = math.exp %534 : vector<16x128xf32>
    %cst_187 = arith.constant 1.000000e+00 : f32
    %536 = vector.broadcast %cst_187 : f32 to vector<16x128xf32>
    %537 = arith.addf %536, %535 : vector<16x128xf32>
    %538 = arith.divf %536, %537 : vector<16x128xf32>
    %539 = vector.extract_strided_slice %529 {offsets = [0, 128], sizes = [16, 128], strides = [1, 1]} : vector<16x384xf32> to vector<16x128xf32>
    %540 = vector.extract_strided_slice %530 {offsets = [0, 128], sizes = [16, 128], strides = [1, 1]} : vector<16x384xf32> to vector<16x128xf32>
    %541 = arith.addf %539, %540 : vector<16x128xf32>
    %542 = arith.negf %541 : vector<16x128xf32>
    %543 = math.exp %542 : vector<16x128xf32>
    %cst_188 = arith.constant 1.000000e+00 : f32
    %544 = vector.broadcast %cst_188 : f32 to vector<16x128xf32>
    %545 = arith.addf %544, %543 : vector<16x128xf32>
    %546 = arith.divf %544, %545 : vector<16x128xf32>
    %547 = vector.extract_strided_slice %529 {offsets = [0, 256], sizes = [16, 128], strides = [1, 1]} : vector<16x384xf32> to vector<16x128xf32>
    %548 = vector.extract_strided_slice %530 {offsets = [0, 256], sizes = [16, 128], strides = [1, 1]} : vector<16x384xf32> to vector<16x128xf32>
    %549 = arith.addf %548, %366 : vector<16x128xf32>
    %550 = arith.mulf %538, %549 : vector<16x128xf32>
    %551 = arith.addf %547, %550 : vector<16x128xf32>
    %552 = math.tanh %551 : vector<16x128xf32>
    %553 = vector.extract_strided_slice %546 {offsets = [0, 0], sizes = [16, 64], strides = [1, 1]} : vector<16x128xf32> to vector<16x64xf32>
    %cst_189 = arith.constant 1.000000e+00 : f32
    %554 = vector.broadcast %cst_189 : f32 to vector<16x64xf32>
    %555 = arith.subf %554, %553 : vector<16x64xf32>
    %556 = vector.extract_strided_slice %552 {offsets = [0, 0], sizes = [16, 64], strides = [1, 1]} : vector<16x128xf32> to vector<16x64xf32>
    %557 = arith.mulf %555, %556 : vector<16x64xf32>
    %558 = vector.extract_strided_slice %546 {offsets = [0, 0], sizes = [16, 64], strides = [1, 1]} : vector<16x128xf32> to vector<16x64xf32>
    %559 = arith.mulf %558, %528 : vector<16x64xf32>
    %560 = arith.addf %557, %559 : vector<16x64xf32>
    %c96_190 = arith.constant 96 : index
    %c0_191 = arith.constant 0 : index
    %561 = vector.load %arg12[%c96_190, %c0_191] : memref<128x384xf32, #tpu.memory_space<vmem>>, vector<16x384xf32>
    %cst_192 = arith.constant dense<0.000000e+00> : vector<16x384xf32>
    %562 = tpu.matmul %560, %365, %cst_192 {dimension_numbers = #tpu.dot_dimension_numbers<[1], [0], [0], [1], [0, 0, 1, 1], [], []>} : vector<16x64xf32>, vector<64x384xf32>, vector<16x384xf32> -> vector<16x384xf32>
    %563 = vector.extract_strided_slice %561 {offsets = [0, 0], sizes = [16, 128], strides = [1, 1]} : vector<16x384xf32> to vector<16x128xf32>
    %564 = vector.extract_strided_slice %562 {offsets = [0, 0], sizes = [16, 128], strides = [1, 1]} : vector<16x384xf32> to vector<16x128xf32>
    %565 = arith.addf %563, %564 : vector<16x128xf32>
    %566 = arith.negf %565 : vector<16x128xf32>
    %567 = math.exp %566 : vector<16x128xf32>
    %cst_193 = arith.constant 1.000000e+00 : f32
    %568 = vector.broadcast %cst_193 : f32 to vector<16x128xf32>
    %569 = arith.addf %568, %567 : vector<16x128xf32>
    %570 = arith.divf %568, %569 : vector<16x128xf32>
    %571 = vector.extract_strided_slice %561 {offsets = [0, 128], sizes = [16, 128], strides = [1, 1]} : vector<16x384xf32> to vector<16x128xf32>
    %572 = vector.extract_strided_slice %562 {offsets = [0, 128], sizes = [16, 128], strides = [1, 1]} : vector<16x384xf32> to vector<16x128xf32>
    %573 = arith.addf %571, %572 : vector<16x128xf32>
    %574 = arith.negf %573 : vector<16x128xf32>
    %575 = math.exp %574 : vector<16x128xf32>
    %cst_194 = arith.constant 1.000000e+00 : f32
    %576 = vector.broadcast %cst_194 : f32 to vector<16x128xf32>
    %577 = arith.addf %576, %575 : vector<16x128xf32>
    %578 = arith.divf %576, %577 : vector<16x128xf32>
    %579 = vector.extract_strided_slice %561 {offsets = [0, 256], sizes = [16, 128], strides = [1, 1]} : vector<16x384xf32> to vector<16x128xf32>
    %580 = vector.extract_strided_slice %562 {offsets = [0, 256], sizes = [16, 128], strides = [1, 1]} : vector<16x384xf32> to vector<16x128xf32>
    %581 = arith.addf %580, %366 : vector<16x128xf32>
    %582 = arith.mulf %570, %581 : vector<16x128xf32>
    %583 = arith.addf %579, %582 : vector<16x128xf32>
    %584 = math.tanh %583 : vector<16x128xf32>
    %585 = vector.extract_strided_slice %578 {offsets = [0, 0], sizes = [16, 64], strides = [1, 1]} : vector<16x128xf32> to vector<16x64xf32>
    %cst_195 = arith.constant 1.000000e+00 : f32
    %586 = vector.broadcast %cst_195 : f32 to vector<16x64xf32>
    %587 = arith.subf %586, %585 : vector<16x64xf32>
    %588 = vector.extract_strided_slice %584 {offsets = [0, 0], sizes = [16, 64], strides = [1, 1]} : vector<16x128xf32> to vector<16x64xf32>
    %589 = arith.mulf %587, %588 : vector<16x64xf32>
    %590 = vector.extract_strided_slice %578 {offsets = [0, 0], sizes = [16, 64], strides = [1, 1]} : vector<16x128xf32> to vector<16x64xf32>
    %591 = arith.mulf %590, %560 : vector<16x64xf32>
    %592 = arith.addf %589, %591 : vector<16x64xf32>
    %c112_196 = arith.constant 112 : index
    %c0_197 = arith.constant 0 : index
    %593 = vector.load %arg12[%c112_196, %c0_197] : memref<128x384xf32, #tpu.memory_space<vmem>>, vector<16x384xf32>
    %cst_198 = arith.constant dense<0.000000e+00> : vector<16x384xf32>
    %594 = tpu.matmul %592, %365, %cst_198 {dimension_numbers = #tpu.dot_dimension_numbers<[1], [0], [0], [1], [0, 0, 1, 1], [], []>} : vector<16x64xf32>, vector<64x384xf32>, vector<16x384xf32> -> vector<16x384xf32>
    %595 = vector.extract_strided_slice %593 {offsets = [0, 0], sizes = [16, 128], strides = [1, 1]} : vector<16x384xf32> to vector<16x128xf32>
    %596 = vector.extract_strided_slice %594 {offsets = [0, 0], sizes = [16, 128], strides = [1, 1]} : vector<16x384xf32> to vector<16x128xf32>
    %597 = arith.addf %595, %596 : vector<16x128xf32>
    %598 = arith.negf %597 : vector<16x128xf32>
    %599 = math.exp %598 : vector<16x128xf32>
    %cst_199 = arith.constant 1.000000e+00 : f32
    %600 = vector.broadcast %cst_199 : f32 to vector<16x128xf32>
    %601 = arith.addf %600, %599 : vector<16x128xf32>
    %602 = arith.divf %600, %601 : vector<16x128xf32>
    %603 = vector.extract_strided_slice %593 {offsets = [0, 128], sizes = [16, 128], strides = [1, 1]} : vector<16x384xf32> to vector<16x128xf32>
    %604 = vector.extract_strided_slice %594 {offsets = [0, 128], sizes = [16, 128], strides = [1, 1]} : vector<16x384xf32> to vector<16x128xf32>
    %605 = arith.addf %603, %604 : vector<16x128xf32>
    %606 = arith.negf %605 : vector<16x128xf32>
    %607 = math.exp %606 : vector<16x128xf32>
    %cst_200 = arith.constant 1.000000e+00 : f32
    %608 = vector.broadcast %cst_200 : f32 to vector<16x128xf32>
    %609 = arith.addf %608, %607 : vector<16x128xf32>
    %610 = arith.divf %608, %609 : vector<16x128xf32>
    %611 = vector.extract_strided_slice %593 {offsets = [0, 256], sizes = [16, 128], strides = [1, 1]} : vector<16x384xf32> to vector<16x128xf32>
    %612 = vector.extract_strided_slice %594 {offsets = [0, 256], sizes = [16, 128], strides = [1, 1]} : vector<16x384xf32> to vector<16x128xf32>
    %613 = arith.addf %612, %366 : vector<16x128xf32>
    %614 = arith.mulf %602, %613 : vector<16x128xf32>
    %615 = arith.addf %611, %614 : vector<16x128xf32>
    %616 = math.tanh %615 : vector<16x128xf32>
    %617 = vector.extract_strided_slice %610 {offsets = [0, 0], sizes = [16, 64], strides = [1, 1]} : vector<16x128xf32> to vector<16x64xf32>
    %cst_201 = arith.constant 1.000000e+00 : f32
    %618 = vector.broadcast %cst_201 : f32 to vector<16x64xf32>
    %619 = arith.subf %618, %617 : vector<16x64xf32>
    %620 = vector.extract_strided_slice %616 {offsets = [0, 0], sizes = [16, 64], strides = [1, 1]} : vector<16x128xf32> to vector<16x64xf32>
    %621 = arith.mulf %619, %620 : vector<16x64xf32>
    %622 = vector.extract_strided_slice %610 {offsets = [0, 0], sizes = [16, 64], strides = [1, 1]} : vector<16x128xf32> to vector<16x64xf32>
    %623 = arith.mulf %622, %592 : vector<16x64xf32>
    %624 = arith.addf %621, %623 : vector<16x64xf32>
    %625 = vector.extract_strided_slice %624 {offsets = [0, 0], sizes = [8, 32], strides = [1, 1]} : vector<16x64xf32> to vector<8x32xf32>
    %c0_202 = arith.constant 0 : index
    %c0_203 = arith.constant 0 : index
    %626 = vector.load %arg9[%c0_202, %c0_203] : memref<64x3xf32, #tpu.memory_space<vmem>>, vector<64x3xf32>
    %627 = vector.extract_strided_slice %626 {offsets = [0, 0], sizes = [32, 3], strides = [1, 1]} : vector<64x3xf32> to vector<32x3xf32>
    %cst_204 = arith.constant dense<0.000000e+00> : vector<8x3xf32>
    %628 = tpu.matmul %625, %627, %cst_204 {dimension_numbers = #tpu.dot_dimension_numbers<[1], [0], [0], [1], [0, 0, 1, 1], [], []>} : vector<8x32xf32>, vector<32x3xf32>, vector<8x3xf32> -> vector<8x3xf32>
    %629 = vector.extract_strided_slice %626 {offsets = [32, 0], sizes = [32, 3], strides = [1, 1]} : vector<64x3xf32> to vector<32x3xf32>
    %cst_205 = arith.constant dense<0.000000e+00> : vector<8x3xf32>
    %630 = tpu.matmul %400, %629, %cst_205 {dimension_numbers = #tpu.dot_dimension_numbers<[1], [0], [0], [1], [0, 0, 1, 1], [], []>} : vector<8x32xf32>, vector<32x3xf32>, vector<8x3xf32> -> vector<8x3xf32>
    %631 = arith.addf %628, %630 : vector<8x3xf32>
    %c0_206 = arith.constant 0 : index
    %c0_207 = arith.constant 0 : index
    %632 = vector.load %arg10[%c0_206, %c0_207] : memref<1x3xf32, #tpu.memory_space<vmem>>, vector<1x3xf32>
    %633 = vector.broadcast %632 : vector<1x3xf32> to vector<8x3xf32>
    %634 = arith.addf %631, %633 : vector<8x3xf32>
    %c0_208 = arith.constant 0 : index
    %c0_209 = arith.constant 0 : index
    %635 = vector.load %arg11[%c0_208, %c0_209] : memref<8x3xf32, #tpu.memory_space<vmem>>, vector<8x3xf32>
    tpu.vector_store %arg11[%c0_208, %c0_209], %634 {strides = array<i32>} : memref<8x3xf32, #tpu.memory_space<vmem>>, vector<8x3xf32>,
    return
  }
}

</mosaic_0001>

<bundles_post_ra>
// kernel: gru_base_forward.1
= control target key start
LH: loop header
LB: loop body
LE: loop exit
PB: predicated region body
PF: predicated region fallthrough
CT: control target
= control target key end

     0   :  { %v6418_v2 = vmov 0.0   ;;  %vm73_vm0 = vcmask 64512   ;;  %vm562_vm1 = vcmask 523264   ;;  %vm762_vm2 = vcmask 261120   ;;  %s6419_s18 = smov 64   ;;  %s6420_s29 = smov 96   ;;  %s7875_s1 = inlined_call_operand.vmem [shape: f32[8,384], index: 1, kind: input, shape index: {}]   ;;  %s7876_s0 = inlined_call_operand.vmem [shape: f32[128,8], index: 0, kind: input, shape index: {}]   ;;  %s7877_s2 = inlined_call_operand.vmem [shape: f32[64,384], index: 2, kind: input, shape index: {}]   ;;  %s7878_s3 = inlined_call_operand.vmem [shape: f32[16,384], index: 3, kind: input, shape index: {}]   ;;  %s7879_s4 = inlined_call_operand.vmem [shape: f32[16,128], index: 4, kind: input, shape index: {}]   ;;  %s7880_s5 = inlined_call_operand.vmem [shape: f32[128,384], index: 5, kind: input, shape index: {}]   ;;  %s7881_s6 = inlined_call_operand.vmem [shape: f32[64,384], index: 6, kind: input, shape index: {}]   ;;  %s7882_s7 = inlined_call_operand.vmem [shape: f32[16,384], index: 7, kind: input, shape index: {}]   ;;  %s7883_s8 = inlined_call_operand.vmem [shape: f32[16,128], index: 8, kind: input, shape index: {}]   ;;  %s7884_s9 = inlined_call_operand.vmem [shape: f32[64,3], index: 9, kind: input, shape index: {}]   ;;  %s7885_s10 = inlined_call_operand.vmem [shape: f32[1,3], index: 10, kind: input, shape index: {}]   ;;  %s7886_s11 = inlined_call_operand.vmem [shape: f32[8,3], index: 11, kind: output, shape index: {}]  }
   0x1   :  { %v71_v0 = vld [vmem:[%s7875_s1 + $0x8] sm:$0xff]  ;;  %v70_v1 = vld [vmem:[%s7875_s1] sm:$0xff]  ;;  %186 = vmatprep.mubr.f32.mxu0 %v6418_v2  ;;  %38 = vst [vmem:[#allocation3] sm:$0xff] %v6418_v2  ;;  %39 = vst [vmem:[#allocation3 + $0x8] sm:$0xff] %v6418_v2  ;;  %vm770_vm3 = vcmask 523520   ;;  %vm776_vm4 = vcmask 1048320  }
   0x2   :  { %40 = vst [vmem:[#allocation3 + $0x10] sm:$0xff] %v6418_v2  ;;  %41 = vst [vmem:[#allocation3 + $0x18] sm:$0xff] %v6418_v2  ;;  %v54_v3 = vld [vmem:[%s7876_s0] sm:$0xff]  ;;  %122 = vmatprep.subr.mxu0 %v71_v0  ;;  %v531_v4 = vld [vmem:[%s7877_s2 + $0x8] sm:$0xff]  ;;  %vm768_vm5 = vcmask 785920   ;;  %vm6422_vm6 = vmmov 0  }
   0x3   :  { %42 = vst [vmem:[#allocation3 + $0x20] sm:$0xff] %v6418_v2  ;;  %43 = vst [vmem:[#allocation3 + $0x28] sm:$0xff] %v6418_v2  ;;  %v534_v5 = vld [vmem:[%s7877_s2 + $0x20] sm:$0xff]  ;;  %4975 = vmatprep.mubr.msk.f32.mxu1 %vm73_vm0, %v54_v3  ;;  %123 = vmatpush1.msra.mxu0 %v70_v1  ;;  %v533_v8 = vld [vmem:[%s7877_s2 + $0x18] sm:$0xff]  ;;  %vm4595_vm7 = vcmask 23552  }
   0x4   :  { %44 = vst [vmem:[#allocation3 + $0x30] sm:$0xff] %v6418_v2  ;;  %45 = vst [vmem:[#allocation3 + $0x38] sm:$0xff] %v6418_v2  ;;  %v530_v6 = vld [vmem:[%s7877_s2] sm:$0xff]  ;;  %v6519_v7 = vpack.c.bf16 %v534_v5, %v531_v4  ;;  %4601 = vmatmul.mubr.msk.f32.vlgmr.msra.gmra.mrb[0].mxu0 %vm73_vm0, %v54_v3  ;;  %v55_v10 = vld [vmem:[%s7876_s0 + $0x8] sm:$0xff] }
   0x5   :  { %46 = vst [vmem:[#allocation3 + $0x40] sm:$0xff] %v6418_v2  ;;  %47 = vst [vmem:[#allocation3 + $0x48] sm:$0xff] %v6418_v2  ;;  %v6525_v9 = vpack.c.bf16 %v533_v8, %v530_v6  ;;  %v537_v11 = vld [vmem:[%s7877_s2 + $0x38] sm:$0xff]  ;;  %192 = vmatprep.mubr.f32.mxu0 %v6418_v2  ;;  %v540_v12 = vld [vmem:[%s7877_s2 + $0x50] sm:$0xff] }
   0x6   :  { %48 = vst [vmem:[#allocation3 + $0x50] sm:$0xff] %v6418_v2  ;;  %49 = vst [vmem:[#allocation3 + $0x58] sm:$0xff] %v6418_v2  ;;  %5382 = vmatprep.subr.bf16.mxu0 %v6519_v7  ;;  %v536_v13 = vld [vmem:[%s7877_s2 + $0x30] sm:$0xff]  ;;  %v539_v14 = vld [vmem:[%s7877_s2 + $0x48] sm:$0xff]  ;;  %v6545_v15 = vpack.c.bf16 %v540_v12, %v537_v11 }
   0x7   :  { %50 = vst [vmem:[#allocation3 + $0x60] sm:$0xff] %v6418_v2  ;;  %51 = vst [vmem:[#allocation3 + $0x68] sm:$0xff] %v6418_v2  ;;  %5384 = vmatpush1.bf16.msra.mxu0 %v6525_v9  ;;  %v6547_v16 = vpack.c.bf16 %v539_v14, %v536_v13  ;;  %v543_v17 = vld [vmem:[%s7877_s2 + $0x68] sm:$0xff]  ;;  %v546_v18 = vld [vmem:[%s7877_s2 + $0x80] sm:$0xff] }
   0x8   :  { %52 = vst [vmem:[#allocation3 + $0x70] sm:$0xff] %v6418_v2  ;;  %53 = vst [vmem:[#allocation3 + $0x78] sm:$0xff] %v6418_v2  ;;  %4602 = vmatmul.mubr.msk.f32.gmra.mrb[2].mxu0 %vm73_vm0, %v55_v10  ;;  %5386 = vmatprep.subr.bf16.mxu0 %v6545_v15  ;;  %v6557_v19 = vpack.c.bf16 %v546_v18, %v543_v17  ;;  %v542_v20 = vld [vmem:[%s7877_s2 + $0x60] sm:$0xff]  ;;  %v545_v21 = vld [vmem:[%s7877_s2 + $0x78] sm:$0xff] }
   0x9   :  { %198 = vmatprep.mubr.f32.mxu0 %v6418_v2  ;;  %v56_v22 = vld [vmem:[%s7876_s0 + $0x10] sm:$0xff]  ;;  %v6570_v23 = vpack.c.bf16 %v545_v21, %v542_v20  ;;  %v549_v24 = vld [vmem:[%s7877_s2 + $0x98] sm:$0xff]  ;;  %v551_v28 = vld [vmem:[%s7877_s2 + $0xa8] sm:$0xff] }
   0xa   :  { %v552_v25 = vld [vmem:[%s7877_s2 + $0xb0] sm:$0xff]  ;;  %v535_v31 = vld [vmem:[%s7877_s2 + $0x28] sm:$0xff]  ;;  %v57_v32 = vld [vmem:[%s7876_s0 + $0x18] sm:$0xff] }
   0xb   :  { %5388 = vmatpush1.bf16.msra.mxu0 %v6547_v16  ;;  %v6579_v26 = vpack.c.bf16 %v552_v25, %v549_v24  ;;  %v548_v27 = vld [vmem:[%s7877_s2 + $0x90] sm:$0xff]  ;;  %v538_v34 = vld [vmem:[%s7877_s2 + $0x40] sm:$0xff]  ;;  %v541_v35 = vld [vmem:[%s7877_s2 + $0x58] sm:$0xff] }
   0xc   :  { %5390 = vmatprep.subr.bf16.mxu0 %v6557_v19  ;;  %v72_v29 = vld [vmem:[%s7875_s1 + $0x10] sm:$0xff]  ;;  %4603 = vmatmul.mubr.msk.f32.gmra.mrb[4].mxu0 %vm73_vm0, %v56_v22  ;;  %v6610_v36 = vpack.c.bf16 %v551_v28, %v548_v27  ;;  %v547_v38 = vld [vmem:[%s7877_s2 + $0x88] sm:$0xff]  ;;  %v6621_v39 = vpack.c.bf16 %v541_v35, %v538_v34  ;;  %v58_v40 = vld [vmem:[%s7876_s0 + $0x20] sm:$0xff] }
   0xd   :  { %4973 = vmatprep.subr.mxu1 %v72_v29  ;;  %v532_v30 = vld [vmem:[%s7877_s2 + $0x10] sm:$0xff]  ;;  %204 = vmatprep.mubr.f32.mxu0 %v6418_v2  ;;  %v550_v42 = vld [vmem:[%s7877_s2 + $0xa0] sm:$0xff]  ;;  %v553_v43 = vld [vmem:[%s7877_s2 + $0xb8] sm:$0xff] }
   0xe   :  { %4974 = vmatpush3.msra.mxu1 %v72_v29  ;;  %v6601_v33 = vpack.c.bf16 %v535_v31, %v532_v30  ;;  %v544_v37 = vld [vmem:[%s7877_s2 + $0x70] sm:$0xff]  ;;  %v59_v44 = vld [vmem:[%s7876_s0 + $0x28] sm:$0xff]  ;;  %v6649_v45 = vpack.c.bf16 %v553_v43, %v550_v42  ;;  %v61_v47 = vld [vmem:[%s7876_s0 + $0x38] sm:$0xff] }
   0xf   :  { %5392 = vmatpush1.bf16.msra.mxu0 %v6570_v23  ;;  %4976 = vmatmul.mubr.msk.f32.vlgmr.msra.gmra.mrb[0].mxu1 %vm73_vm0, %v55_v10  ;;  %v6630_v41 = vpack.c.bf16 %v547_v38, %v544_v37  ;;  %v60_v46 = vld [vmem:[%s7876_s0 + $0x30] sm:$0xff]  ;;  %v62_v48 = vld [vmem:[%s7876_s0 + $0x40] sm:$0xff]  ;;  %v63_v49 = vld [vmem:[%s7876_s0 + $0x48] sm:$0xff] }
  0x10   :  { %5394 = vmatprep.subr.bf16.mxu0 %v6579_v26  ;;  %5398 = vmatprep.subr.bf16.mxu1 %v6601_v33  ;;  %v64_v50 = vld [vmem:[%s7876_s0 + $0x50] sm:$0xff]  ;;  %v65_v51 = vld [vmem:[%s7876_s0 + $0x58] sm:$0xff]  ;;  %v66_v52 = vld [vmem:[%s7876_s0 + $0x60] sm:$0xff] }
  0x11   :  { %4604 = vmatmul.mubr.msk.f32.gmra.mrb[6].mxu0 %vm73_vm0, %v57_v32  ;;  %5400 = vmatpush3.bf16.msra.mxu1 %v6601_v33  ;;  %v67_v53 = vld [vmem:[%s7876_s0 + $0x68] sm:$0xff]  ;;  %v68_v54 = vld [vmem:[%s7876_s0 + $0x70] sm:$0xff]  ;;  %v69_v55 = vld [vmem:[%s7876_s0 + $0x78] sm:$0xff] }
  0x12   :  { %210 = vmatprep.mubr.f32.mxu0 %v6418_v2  ;;  %4978 = vmatprep.mubr.msk.f32.mxu1 %vm73_vm0, %v56_v22  ;;  %v6748_v58 = vld [vmem:[%s7878_s3 + $0x28] sm:$0xff]  ;;  %v6753_v60 = vld [vmem:[%s7878_s3 + $0x10] sm:$0xff]  ;;  %v6800_v35 = vld [vmem:[%s7878_s3] sm:$0xff] }
  0x13   :  { %5396 = vmatpush1.bf16.msra.mxu0 %v6610_v36  ;;  %4979 = vmatmul.mubr.msk.f32.gmra.mrb[2].mxu1 %vm73_vm0, %v57_v32  ;;  %v6811_v43 = vld [vmem:[%s7878_s3 + $0x18] sm:$0xff] }
  0x14   :  { %4981 = vmatprep.mubr.msk.f32.mxu1 %vm73_vm0, %v58_v40  ;;  %5402 = vmatprep.subr.bf16.mxu1 %v6621_v39 }
  0x15   :  { %4605 = vmatmul.mubr.msk.f32.gmra.mrb[8].mxu0 %vm73_vm0, %v58_v40  ;;  %5404 = vmatpush3.bf16.msra.mxu1 %v6621_v39  ;;  %v6806_v40 = vld [vmem:[%s7878_s3 + $0x8] sm:$0xff] }
  0x16   :  { %216 = vmatprep.mubr.f32.mxu0 %v6418_v2  ;;  %5406 = vmatprep.subr.bf16.mxu1 %v6630_v41 }
  0x17   :  { %4982 = vmatmul.mubr.msk.f32.gmra.mrb[4].mxu1 %vm73_vm0, %v59_v44  ;;  %5414 = vmatprep.subr.bf16.mxu0 %v6519_v7 }
  0x18   :  { %4984 = vmatprep.mubr.msk.f32.mxu1 %vm73_vm0, %v60_v46 }
  0x19   :  { %4606 = vmatmul.mubr.msk.f32.gmra.mrb[10].mxu0 %vm73_vm0, %v59_v44  ;;  %5408 = vmatpush3.bf16.msra.mxu1 %v6630_v41 }
  0x1a   :  { %222 = vmatprep.mubr.f32.mxu0 %v6418_v2  ;;  %5410 = vmatprep.subr.bf16.mxu1 %v6649_v45 }
  0x1b   :  { %4985 = vmatmul.mubr.msk.f32.gmra.mrb[6].mxu1 %vm73_vm0, %v61_v47 }
  0x1c   :  { %4987 = vmatprep.mubr.msk.f32.mxu1 %vm73_vm0, %v62_v48 }
  0x1d   :  { %4607 = vmatmul.mubr.msk.f32.gmra.mrb[12].mxu0 %vm73_vm0, %v60_v46  ;;  %5412 = vmatpush3.bf16.msra.mxu1 %v6649_v45 }
  0x1e   :  { %228 = vmatprep.mubr.f32.mxu0 %v6418_v2  ;;  %5430 = vmatprep.subr.bf16.mxu1 %v6601_v33 }
  0x1f   :  { %4988 = vmatmul.mubr.msk.f32.gmra.mrb[8].mxu1 %vm73_vm0, %v63_v49 }
  0x20   :  { %4990 = vmatprep.mubr.msk.f32.mxu1 %vm73_vm0, %v64_v50 }
  0x21   :  { %4608 = vmatmul.mubr.msk.f32.gmra.mrb[14].mxu0 %vm73_vm0, %v61_v47 }
  0x22   :  { %234 = vmatprep.mubr.f32.mxu0 %v6418_v2 }
  0x23   :  { %4991 = vmatmul.mubr.msk.f32.gmra.mrb[10].mxu1 %vm73_vm0, %v65_v51 }
  0x24   :  { %4993 = vmatprep.mubr.msk.f32.mxu1 %vm73_vm0, %v66_v52 }
  0x25   :  { %4609 = vmatmul.mubr.msk.f32.gmra.mrb[16].mxu0 %vm73_vm0, %v62_v48  ;;  %v6817_v48 = vld [vmem:[%s7878_s3 + $0x20] sm:$0xff] }
  0x26   :  { %240 = vmatprep.mubr.f32.mxu0 %v6418_v2 }
  0x27   :  { %4994 = vmatmul.mubr.msk.f32.gmra.mrb[12].mxu1 %vm73_vm0, %v67_v53 }
  0x28   :  { %4996 = vmatprep.mubr.msk.f32.mxu1 %vm73_vm0, %v68_v54 }
  0x29   :  { %4610 = vmatmul.mubr.msk.f32.gmra.mrb[18].mxu0 %vm73_vm0, %v63_v49 }
  0x2a   :  { %246 = vmatprep.mubr.f32.mxu0 %v6418_v2 }
  0x2b   :  { %4997 = vmatmul.mubr.msk.f32.gmra.mrb[14].mxu1 %vm73_vm0, %v69_v55 }
  0x2c   :  { %5015 = vmatprep.mubr.f32.mxu1 %v6418_v2 }
  0x2d   :  { %4611 = vmatmul.mubr.msk.f32.gmra.mrb[20].mxu0 %vm73_vm0, %v64_v50 }
  0x2e   :  { %252 = vmatprep.mubr.f32.mxu0 %v6418_v2 }
  0x2f   :  { %5016 = vmatmul.mubr.f32.vlgmr.msra.gmra.mrb[16].mxu1 %v6418_v2 }
  0x30   :  { %5432 = vmatpush3.bf16.msra.mxu1 %v6601_v33 }
  0x31   :  { %4612 = vmatmul.mubr.msk.f32.gmra.mrb[22].mxu0 %vm73_vm0, %v65_v51  ;;  %5434 = vmatprep.subr.bf16.mxu1 %v6621_v39 }
  0x32   :  { %258 = vmatprep.mubr.f32.mxu0 %v6418_v2 }
  0x34   :  { %5436 = vmatpush3.bf16.msra.mxu1 %v6621_v39 }
  0x35   :  { %4613 = vmatmul.mubr.msk.f32.gmra.mrb[24].mxu0 %vm73_vm0, %v66_v52  ;;  %5438 = vmatprep.subr.bf16.mxu1 %v6630_v41 }
  0x36   :  { %264 = vmatprep.mubr.f32.mxu0 %v6418_v2 }
  0x38   :  { %5440 = vmatpush3.bf16.msra.mxu1 %v6630_v41 }
  0x39   :  { %4614 = vmatmul.mubr.msk.f32.gmra.mrb[26].mxu0 %vm73_vm0, %v67_v53  ;;  %5442 = vmatprep.subr.bf16.mxu1 %v6649_v45 }
  0x3a   :  { %270 = vmatprep.mubr.f32.mxu0 %v6418_v2 }
  0x3c   :  { %5444 = vmatpush3.bf16.msra.mxu1 %v6649_v45 }
  0x3d   :  { %4615 = vmatmul.mubr.msk.f32.gmra.mrb[28].mxu0 %vm73_vm0, %v68_v54  ;;  %5462 = vmatprep.subr.bf16.mxu1 %v6601_v33 }
  0x3e   :  { %276 = vmatprep.mubr.f32.mxu0 %v6418_v2 }
  0x41   :  { %4616 = vmatmul.mubr.msk.f32.gmra.mrb[30].mxu0 %vm73_vm0, %v69_v55 }
  0x42   :  { %630 = vmatprep.mubr.f32.mxu0 %v6418_v2 }
  0x45   :  { %631 = vmatmul.mubr.f32.vlgmr.msra.gmra.mrb[0].mxu0 %v6418_v2 }
  0x46   :  { %636 = vmatprep.mubr.f32.mxu0 %v6418_v2  ;;  %5416 = vmatpush1.bf16.msra.mxu0 %v6525_v9 }
  0x47   :  { %5418 = vmatprep.subr.bf16.mxu0 %v6545_v15 }
  0x49   :  { %637 = vmatmul.mubr.f32.gmra.mrb[2].mxu0 %v6418_v2 }
  0x4a   :  { %5420 = vmatpush1.bf16.msra.mxu0 %v6547_v16  ;;  %852 = vmatprep.mubr.f32.mxu0 %v6418_v2 }
  0x4b   :  { %5422 = vmatprep.subr.bf16.mxu0 %v6557_v19 }
  0x4e   :  { %5424 = vmatpush1.bf16.msra.mxu0 %v6570_v23 }
  0x4f   :  { %5426 = vmatprep.subr.bf16.mxu0 %v6579_v26 }
  0x52   :  { %5428 = vmatpush1.bf16.msra.mxu0 %v6610_v36 }
  0x53   :  { %5446 = vmatprep.subr.bf16.mxu0 %v6519_v7 }
  0xe2   :  { %v6741_v56 = vpop.f32.mrb[0].mxu1 }
  0xe3   :  { %v6743_v57 = vpop.f32.mrb[1].mxu1 }
  0xe6   :  { %v4980_v59 = vpop.f32.mrb[2].mxu1 }
  0xe7   :  { %v6756_v61 = vadd.f32 %v4980_v59, %v6748_v58  ;;  %v359_v62 = vpop.f32.mrb[3].mxu1 }
  0xe8   :  { %v6759_v63 = vadd.f32 %v6753_v60, %v359_v62 }
  0xea   :  { %v4983_v0 = vpop.f32.mrb[4].mxu1 }
  0xeb   :  { %v6762_v1 = vadd.f32 %v4983_v0, %v6748_v58  ;;  %v369_v3 = vpop.f32.mrb[5].mxu1 }
  0xec   :  { %v6765_v4 = vadd.f32 %v6753_v60, %v369_v3 }
  0xee   :  { %v4986_v5 = vpop.f32.mrb[6].mxu1 }
  0xef   :  { %v6768_v6 = vadd.f32 %v4986_v5, %v6748_v58  ;;  %v379_v8 = vpop.f32.mrb[7].mxu1  ;;  %v6824_v5 = vld [vmem:[%s7879_s4] sm:$0xff] }
  0xf0   :  { %v6771_v10 = vadd.f32 %v6753_v60, %v379_v8 }
  0xf2   :  { %v4989_v11 = vpop.f32.mrb[8].mxu1 }
  0xf3   :  { %v6774_v12 = vadd.f32 %v4989_v11, %v6748_v58  ;;  %v389_v13 = vpop.f32.mrb[9].mxu1 }
  0xf4   :  { %v6777_v14 = vadd.f32 %v6753_v60, %v389_v13 }
  0xf6   :  { %v4992_v17 = vpop.f32.mrb[10].mxu1 }
  0xf7   :  { %v6780_v18 = vadd.f32 %v4992_v17, %v6748_v58  ;;  %v399_v20 = vpop.f32.mrb[11].mxu1 }
  0xf8   :  { %v6783_v21 = vadd.f32 %v6753_v60, %v399_v20 }
  0xfa   :  { %v4995_v22 = vpop.f32.mrb[12].mxu1 }
  0xfb   :  { %v6786_v24 = vadd.f32 %v4995_v22, %v6748_v58  ;;  %v409_v25 = vpop.f32.mrb[13].mxu1  ;;  %v6830_v22 = vld [vmem:[%s7879_s4 + $0x8] sm:$0xff] }
  0xfc   :  { %v6789_v27 = vadd.f32 %v6753_v60, %v409_v25  ;;  %v436_v25 = vadd.f32 %v6753_v60, %v6743_v57 }
  0xfe   :  { %v4998_v28 = vpop.f32.mrb[14].mxu1 }
  0xff   :  { %v6792_v29 = vadd.f32 %v4998_v28, %v6748_v58  ;;  %v419_v30 = vpop.f32.mrb[15].mxu1 }
 0x100   :  { %v6795_v31 = vadd.f32 %v6753_v60, %v419_v30 }
 0x102   :  { %v5017_v32 = vpop.f32.mrb[16].mxu1 }
 0x103   :  { %v709_v34 = vpop.f32.mrb[17].mxu1  ;;  %v747_v30 = vadd.f32 %v5017_v32, %v6830_v22 }
 0x104   :  { %v746_v13 = vadd.f32 %v709_v34, %v6824_v5  ;;  %v439_v34 = vadd.f32 %v6741_v56, %v6748_v58 }
 0x118   :  { %v632_v37 = vpop.f32.mrb[0].mxu0 }
 0x119   :  { %v5969_v38 = vadd.f32 %v632_v37, %v6800_v35  ;;  %v634_v42 = vpop.f32.mrb[1].mxu0 }
 0x11a   :  { %v5970_v46 = vadd.f32 %v634_v42, %v6806_v40 }
 0x11b   :  { %v4633_v44 = vmul.f32 -1.442695, %v5969_v38 }
 0x11c   :  { %v638_v47 = vpop.f32.mrb[2].mxu0  ;;  %v4635_v53 = vmul.f32 -1.442695, %v5970_v46 }
 0x11d   :  { %6098 = vpow2.f32 %v4633_v44  ;;  %v5971_v49 = vadd.f32 %v638_v47, %v6811_v43  ;;  %v640_v50 = vpop.f32.mrb[3].mxu0 }
 0x11e   :  { %v5972_v52 = vadd.f32 %v640_v50, %v6817_v48 }
 0x11f   :  { %v4634_v51 = vmul.f32 -1.442695, %v5971_v49 }
 0x120   :  { %v4636_v54 = vmul.f32 -1.442695, %v5972_v52 }
 0x121   :  { %6100 = vpow2.f32 %v4634_v51 }
 0x122   :  { %6102 = vpow2.f32 %v4635_v53 }
 0x123   :  { %6104 = vpow2.f32 %v4636_v54 }
 0x127   :  { %v6099_v55 = vpop.eup %6098 }
 0x128   :  { %v726_v59 = vadd.f32 1.0, %v6099_v55 }
 0x12a   :  { %6106 = vrcp.f32 %v726_v59 }
 0x12b   :  { %v6101_v62 = vpop.eup %6100 }
 0x12c   :  { %v727_v0 = vadd.f32 1.0, %v6101_v62  ;;  %v6103_v3 = vpop.eup %6102 }
 0x12d   :  { %v6105_v8 = vpop.eup %6104  ;;  %v740_v11 = vadd.f32 1.0, %v6103_v3 }
 0x12e   :  { %6108 = vrcp.f32 %v727_v0  ;;  %v741_v20 = vadd.f32 1.0, %v6105_v8 }
 0x12f   :  { %6110 = vrcp.f32 %v740_v11 }
 0x130   :  { %6112 = vrcp.f32 %v741_v20 }
 0x134   :  { %v6107_v17 = vpop.eup %6106 }
 0x135   :  { %v748_v28 = vmul.f32 %v6107_v17, %v746_v13 }
 0x137   :  { %v750_v37 = vadd.f32 %v748_v28, %v436_v25 }
 0x138   :  { %v6109_v38 = vpop.eup %6108 }
 0x139   :  { %v749_v42 = vmul.f32 %v6109_v38, %v747_v30  ;;  %6114 = vtanh.f32 %v750_v37  ;;  %v6111_v46 = vpop.eup %6110 }
 0x13a   :  { %v6113_v47 = vpop.eup %6112  ;;  %v754_v49 = vsub.f32 1.0, %v6111_v46  ;;  %v758_v51 = vmul.f32 0.0, %v6111_v46 }
 0x13b   :  { %v751_v44 = vadd.f32 %v749_v42, %v439_v34  ;;  %v755_v60 = vsub.f32 1.0, %v6113_v47  ;;  %v759_v58 = vmul.f32 0.0, %v6113_v47 }
 0x13d   :  { %6116 = vtanh.f32 %v751_v44 }
 0x143   :  { %v6115_v50 = vpop.eup %6114 }
 0x144   :  { %v756_v57 = vmul.f32 %v6115_v50, %v754_v49 }
 0x146   :  { %v6837_v32 = vadd.f32 %v758_v51, %v756_v57 }
 0x147   :  { %v6117_v52 = vpop.eup %6116 }
 0x148   :  { %4637 = vmatmul.mubr.msk.f32.vlgmr.msra.gmra.mrb[4].mxu0 %vm562_vm1, %v6837_v32  ;;  %5034 = vmatprep.mubr.msk.f32.mxu1 %vm562_vm1, %v6837_v32  ;;  %v757_v56 = vmul.f32 %v6117_v52, %v755_v60  ;;  %763 = vst.msk [vmem:[#allocation3] sm:$0xff] %vm762_vm2, %v6837_v32 }
 0x149   :  { %858 = vmatprep.mubr.f32.mxu0 %v6418_v2  ;;  %5448 = vmatpush1.bf16.msra.mxu0 %v6525_v9 }
 0x14a   :  { %v6847_v53 = vadd.f32 %v759_v58, %v757_v56  ;;  %5450 = vmatprep.subr.bf16.mxu0 %v6545_v15 }
 0x14c   :  { %773 = vrot.lane.b32.xlu0 %v6847_v53, %s6419_s18  ;;  %4638 = vmatmul.mubr.msk.f32.gmra.mrb[6].mxu0 %vm562_vm1, %v6847_v53  ;;  %771 = vst.msk [vmem:[#allocation3 + $0x70] sm:$0xff] %vm770_vm3, %v6847_v53 }
 0x14d   :  { %5035 = vmatmul.mubr.msk.f32.vlgmr.msra.gmra.mrb[18].mxu1 %vm562_vm1, %v6847_v53  ;;  %5452 = vmatpush1.bf16.msra.mxu0 %v6547_v16 }
 0x14e   :  { %5464 = vmatpush3.bf16.msra.mxu1 %v6601_v33  ;;  %5454 = vmatprep.subr.bf16.mxu0 %v6557_v19 }
 0x14f   :  { %5466 = vmatprep.subr.bf16.mxu1 %v6621_v39  ;;  %1070 = vmatprep.mubr.f32.mxu0 %v6418_v2 }
 0x151   :  { %5456 = vmatpush1.bf16.msra.mxu0 %v6570_v23 }
 0x152   :  { %5468 = vmatpush3.bf16.msra.mxu1 %v6621_v39  ;;  %5458 = vmatprep.subr.bf16.mxu0 %v6579_v26 }
 0x153   :  { %5470 = vmatprep.subr.bf16.mxu1 %v6630_v41 }
 0x155   :  { %5460 = vmatpush1.bf16.msra.mxu0 %v6610_v36 }
 0x156   :  { %5472 = vmatpush3.bf16.msra.mxu1 %v6630_v41  ;;  %5478 = vmatprep.subr.bf16.mxu0 %v6519_v7 }
 0x157   :  { %5474 = vmatprep.subr.bf16.mxu1 %v6649_v45 }
 0x15a   :  { %5476 = vmatpush3.bf16.msra.mxu1 %v6649_v45 }
 0x15b   :  { %5494 = vmatprep.subr.bf16.mxu1 %v6601_v33 }
 0x1be   :  { %v774_v54 = vpop.permute.xlu0 %773 }
 0x1bf   :  { %777 = vst.msk [vmem:[#allocation3 + $0x8] sm:$0xff] %vm776_vm4, %v774_v54 }
 0x21b   :  { %v854_v55 = vpop.f32.mrb[4].mxu0 }
 0x21c   :  { %v5973_v59 = vadd.f32 %v854_v55, %v6800_v35  ;;  %v856_v62 = vpop.f32.mrb[5].mxu0 }
 0x21d   :  { %v5974_v3 = vadd.f32 %v856_v62, %v6806_v40 }
 0x21e   :  { %v4641_v0 = vmul.f32 -1.442695, %v5973_v59 }
 0x21f   :  { %v860_v8 = vpop.f32.mrb[6].mxu0  ;;  %v4643_v30 = vmul.f32 -1.442695, %v5974_v3 }
 0x220   :  { %6118 = vpow2.f32 %v4641_v0  ;;  %v5975_v11 = vadd.f32 %v860_v8, %v6811_v43  ;;  %v5036_v13 = vpop.f32.mrb[18].mxu1  ;;  %v862_v17 = vpop.f32.mrb[7].mxu0 }
 0x221   :  { %v931_v20 = vpop.f32.mrb[19].mxu1  ;;  %v5976_v28 = vadd.f32 %v862_v17, %v6817_v48  ;;  %v969_v52 = vadd.f32 %v5036_v13, %v6830_v22 }
 0x222   :  { %v4642_v25 = vmul.f32 -1.442695, %v5975_v11  ;;  %v968_v50 = vadd.f32 %v931_v20, %v6824_v5 }
 0x223   :  { %v4644_v37 = vmul.f32 -1.442695, %v5976_v28 }
 0x224   :  { %6120 = vpow2.f32 %v4642_v25 }
 0x225   :  { %6122 = vpow2.f32 %v4643_v30 }
 0x226   :  { %6124 = vpow2.f32 %v4644_v37 }
 0x22a   :  { %v6119_v38 = vpop.eup %6118 }
 0x22b   :  { %v948_v34 = vadd.f32 1.0, %v6119_v38 }
 0x22d   :  { %6126 = vrcp.f32 %v948_v34 }
 0x22e   :  { %v6121_v42 = vpop.eup %6120 }
 0x22f   :  { %v949_v44 = vadd.f32 1.0, %v6121_v42  ;;  %v6123_v46 = vpop.eup %6122 }
 0x230   :  { %v6125_v47 = vpop.eup %6124  ;;  %v962_v49 = vadd.f32 1.0, %v6123_v46 }
 0x231   :  { %6128 = vrcp.f32 %v949_v44  ;;  %v963_v57 = vadd.f32 1.0, %v6125_v47 }
 0x232   :  { %6130 = vrcp.f32 %v962_v49 }
 0x233   :  { %6132 = vrcp.f32 %v963_v57 }
 0x237   :  { %v6127_v51 = vpop.eup %6126 }
 0x238   :  { %v970_v60 = vmul.f32 %v6127_v51, %v968_v50 }
 0x23a   :  { %v972_v56 = vadd.f32 %v970_v60, %v6759_v63 }
 0x23b   :  { %v6129_v58 = vpop.eup %6128 }
 0x23c   :  { %v971_v54 = vmul.f32 %v6129_v58, %v969_v52  ;;  %6134 = vtanh.f32 %v972_v56  ;;  %v6131_v59 = vpop.eup %6130 }
 0x23d   :  { %v6133_v62 = vpop.eup %6132  ;;  %v976_v0 = vsub.f32 1.0, %v6131_v59  ;;  %v980_v8 = vmul.f32 %v6131_v59, %v6837_v32 }
 0x23e   :  { %v973_v55 = vadd.f32 %v971_v54, %v6756_v61  ;;  %v977_v17 = vsub.f32 1.0, %v6133_v62  ;;  %v981_v61 = vmul.f32 %v6133_v62, %v6847_v53 }
 0x240   :  { %6136 = vtanh.f32 %v973_v55 }
 0x246   :  { %v6135_v3 = vpop.eup %6134 }
 0x247   :  { %v978_v11 = vmul.f32 %v6135_v3, %v976_v0 }
 0x249   :  { %v6883_v20 = vadd.f32 %v980_v8, %v978_v11 }
 0x24a   :  { %v6137_v13 = vpop.eup %6136 }
 0x24b   :  { %4645 = vmatmul.mubr.msk.f32.vlgmr.msra.gmra.mrb[8].mxu0 %vm562_vm1, %v6883_v20  ;;  %5053 = vmatprep.mubr.msk.f32.mxu1 %vm562_vm1, %v6883_v20  ;;  %v979_v63 = vmul.f32 %v6137_v13, %v977_v17  ;;  %984 = vst.msk [vmem:[#allocation3 + $0x10] sm:$0xff] %vm762_vm2, %v6883_v20 }
 0x24c   :  { %1076 = vmatprep.mubr.f32.mxu0 %v6418_v2  ;;  %5480 = vmatpush1.bf16.msra.mxu0 %v6525_v9 }
 0x24d   :  { %v6894_v25 = vadd.f32 %v981_v61, %v979_v63  ;;  %5482 = vmatprep.subr.bf16.mxu0 %v6545_v15 }
 0x24f   :  { %992 = vrot.lane.b32.xlu1 %v6894_v25, %s6419_s18  ;;  %990 = vst.msk [vmem:[#allocation3 + $0x60] sm:$0xff] %vm770_vm3, %v6894_v25  ;;  %4646 = vmatmul.mubr.msk.f32.gmra.mrb[10].mxu0 %vm562_vm1, %v6894_v25 }
 0x250   :  { %5054 = vmatmul.mubr.msk.f32.vlgmr.msra.gmra.mrb[20].mxu1 %vm562_vm1, %v6894_v25  ;;  %5484 = vmatpush1.bf16.msra.mxu0 %v6547_v16 }
 0x251   :  { %5496 = vmatpush3.bf16.msra.mxu1 %v6601_v33  ;;  %5486 = vmatprep.subr.bf16.mxu0 %v6557_v19 }
 0x252   :  { %5498 = vmatprep.subr.bf16.mxu1 %v6621_v39  ;;  %1288 = vmatprep.mubr.f32.mxu0 %v6418_v2 }
 0x254   :  { %5488 = vmatpush1.bf16.msra.mxu0 %v6570_v23 }
 0x255   :  { %5500 = vmatpush3.bf16.msra.mxu1 %v6621_v39  ;;  %5490 = vmatprep.subr.bf16.mxu0 %v6579_v26 }
 0x256   :  { %5502 = vmatprep.subr.bf16.mxu1 %v6630_v41 }
 0x258   :  { %5492 = vmatpush1.bf16.msra.mxu0 %v6610_v36 }
 0x259   :  { %5504 = vmatpush3.bf16.msra.mxu1 %v6630_v41  ;;  %5510 = vmatprep.subr.bf16.mxu0 %v6519_v7 }
 0x25a   :  { %5506 = vmatprep.subr.bf16.mxu1 %v6649_v45 }
 0x25d   :  { %5508 = vmatpush3.bf16.msra.mxu1 %v6649_v45 }
 0x25e   :  { %5526 = vmatprep.subr.bf16.mxu1 %v6601_v33 }
 0x2c1   :  { %v993_v53 = vpop.permute.xlu1 %992 }
 0x2c2   :  { %995 = vst.msk [vmem:[#allocation3 + $0x18] sm:$0xff] %vm776_vm4, %v993_v53 }
 0x31e   :  { %v1072_v28 = vpop.f32.mrb[8].mxu0 }
 0x31f   :  { %v5977_v30 = vadd.f32 %v1072_v28, %v6800_v35  ;;  %v1074_v37 = vpop.f32.mrb[9].mxu0 }
 0x320   :  { %v5978_v34 = vadd.f32 %v1074_v37, %v6806_v40 }
 0x321   :  { %v4649_v38 = vmul.f32 -1.442695, %v5977_v30 }
 0x322   :  { %v1078_v42 = vpop.f32.mrb[10].mxu0  ;;  %v4651_v57 = vmul.f32 -1.442695, %v5978_v34 }
 0x323   :  { %6138 = vpow2.f32 %v4649_v38  ;;  %v5979_v44 = vadd.f32 %v1078_v42, %v6811_v43  ;;  %v5055_v46 = vpop.f32.mrb[20].mxu1  ;;  %v1080_v47 = vpop.f32.mrb[11].mxu0 }
 0x324   :  { %v1149_v49 = vpop.f32.mrb[21].mxu1  ;;  %v5980_v51 = vadd.f32 %v1080_v47, %v6817_v48  ;;  %v1187_v17 = vadd.f32 %v5055_v46, %v6830_v22 }
 0x325   :  { %v4650_v50 = vmul.f32 -1.442695, %v5979_v44  ;;  %v1186_v0 = vadd.f32 %v1149_v49, %v6824_v5 }
 0x326   :  { %v4652_v60 = vmul.f32 -1.442695, %v5980_v51 }
 0x327   :  { %6140 = vpow2.f32 %v4650_v50 }
 0x328   :  { %6142 = vpow2.f32 %v4651_v57 }
 0x329   :  { %6144 = vpow2.f32 %v4652_v60 }
 0x32d   :  { %v6139_v52 = vpop.eup %6138 }
 0x32e   :  { %v1166_v56 = vadd.f32 1.0, %v6139_v52 }
 0x330   :  { %6146 = vrcp.f32 %v1166_v56 }
 0x331   :  { %v6141_v58 = vpop.eup %6140 }
 0x332   :  { %v1167_v54 = vadd.f32 1.0, %v6141_v58  ;;  %v6143_v55 = vpop.eup %6142 }
 0x333   :  { %v6145_v59 = vpop.eup %6144  ;;  %v1180_v62 = vadd.f32 1.0, %v6143_v55 }
 0x334   :  { %6148 = vrcp.f32 %v1167_v54  ;;  %v1181_v8 = vadd.f32 1.0, %v6145_v59 }
 0x335   :  { %6150 = vrcp.f32 %v1180_v62 }
 0x336   :  { %6152 = vrcp.f32 %v1181_v8 }
 0x33a   :  { %v6147_v3 = vpop.eup %6146 }
 0x33b   :  { %v1188_v11 = vmul.f32 %v6147_v3, %v1186_v0 }
 0x33d   :  { %v1190_v13 = vadd.f32 %v1188_v11, %v6765_v4 }
 0x33e   :  { %v6149_v63 = vpop.eup %6148 }
 0x33f   :  { %v1189_v61 = vmul.f32 %v6149_v63, %v1187_v17  ;;  %6154 = vtanh.f32 %v1190_v13  ;;  %v6151_v28 = vpop.eup %6150 }
 0x340   :  { %v6153_v30 = vpop.eup %6152  ;;  %v1194_v37 = vsub.f32 1.0, %v6151_v28  ;;  %v1198_v34 = vmul.f32 %v6151_v28, %v6883_v20 }
 0x341   :  { %v1191_v53 = vadd.f32 %v1189_v61, %v6762_v1  ;;  %v1195_v44 = vsub.f32 1.0, %v6153_v30  ;;  %v1199_v1 = vmul.f32 %v6153_v30, %v6894_v25 }
 0x343   :  { %6156 = vtanh.f32 %v1191_v53 }
 0x349   :  { %v6155_v38 = vpop.eup %6154 }
 0x34a   :  { %v1196_v42 = vmul.f32 %v6155_v38, %v1194_v37 }
 0x34c   :  { %v6930_v47 = vadd.f32 %v1198_v34, %v1196_v42 }
 0x34d   :  { %v6157_v46 = vpop.eup %6156 }
 0x34e   :  { %4653 = vmatmul.mubr.msk.f32.vlgmr.msra.gmra.mrb[12].mxu0 %vm562_vm1, %v6930_v47  ;;  %5072 = vmatprep.mubr.msk.f32.mxu1 %vm562_vm1, %v6930_v47  ;;  %v1197_v4 = vmul.f32 %v6157_v46, %v1195_v44  ;;  %1202 = vst.msk [vmem:[#allocation3 + $0x20] sm:$0xff] %vm762_vm2, %v6930_v47 }
 0x34f   :  { %1294 = vmatprep.mubr.f32.mxu0 %v6418_v2  ;;  %5512 = vmatpush1.bf16.msra.mxu0 %v6525_v9 }
 0x350   :  { %v6941_v49 = vadd.f32 %v1199_v1, %v1197_v4  ;;  %5514 = vmatprep.subr.bf16.mxu0 %v6545_v15 }
 0x352   :  { %1208 = vst.msk [vmem:[#allocation3 + $0x50] sm:$0xff] %vm770_vm3, %v6941_v49  ;;  %4654 = vmatmul.mubr.msk.f32.gmra.mrb[14].mxu0 %vm562_vm1, %v6941_v49  ;;  %5073 = vmatmul.mubr.msk.f32.vlgmr.msra.gmra.mrb[22].mxu1 %vm562_vm1, %v6941_v49 }
 0x353   :  { %5516 = vmatpush1.bf16.msra.mxu0 %v6547_v16  ;;  %5528 = vmatpush3.bf16.msra.mxu1 %v6601_v33 }
 0x354   :  { %5518 = vmatprep.subr.bf16.mxu0 %v6557_v19  ;;  %5530 = vmatprep.subr.bf16.mxu1 %v6621_v39 }
 0x355   :  { %1506 = vmatprep.mubr.f32.mxu0 %v6418_v2 }
 0x357   :  { %5520 = vmatpush1.bf16.msra.mxu0 %v6570_v23  ;;  %5532 = vmatpush3.bf16.msra.mxu1 %v6621_v39 }
 0x358   :  { %5522 = vmatprep.subr.bf16.mxu0 %v6579_v26  ;;  %5534 = vmatprep.subr.bf16.mxu1 %v6630_v41 }
 0x35b   :  { %5524 = vmatpush1.bf16.msra.mxu0 %v6610_v36  ;;  %5536 = vmatpush3.bf16.msra.mxu1 %v6630_v41 }
 0x35c   :  { %5538 = vmatprep.subr.bf16.mxu1 %v6649_v45  ;;  %5542 = vmatprep.subr.bf16.mxu0 %v6519_v7 }
 0x35f   :  { %5540 = vmatpush3.bf16.msra.mxu1 %v6649_v45 }
 0x360   :  { %5558 = vmatprep.subr.bf16.mxu1 %v6601_v33 }
 0x421   :  { %v1290_v25 = vpop.f32.mrb[12].mxu0 }
 0x422   :  { %v5981_v50 = vadd.f32 %v1290_v25, %v6800_v35  ;;  %v1292_v51 = vpop.f32.mrb[13].mxu0 }
 0x423   :  { %v5982_v60 = vadd.f32 %v1292_v51, %v6806_v40 }
 0x424   :  { %v4657_v57 = vmul.f32 -1.442695, %v5981_v50 }
 0x425   :  { %v1296_v52 = vpop.f32.mrb[14].mxu0  ;;  %v5074_v56 = vpop.f32.mrb[22].mxu1  ;;  %v4659_v0 = vmul.f32 -1.442695, %v5982_v60 }
 0x426   :  { %6158 = vpow2.f32 %v4657_v57  ;;  %v5983_v58 = vadd.f32 %v1296_v52, %v6811_v43  ;;  %v1298_v54 = vpop.f32.mrb[15].mxu0  ;;  %v1367_v55 = vpop.f32.mrb[23].mxu1  ;;  %v1405_v34 = vadd.f32 %v5074_v56, %v6830_v22 }
 0x427   :  { %v5984_v62 = vadd.f32 %v1298_v54, %v6817_v48  ;;  %v1404_v28 = vadd.f32 %v1367_v55, %v6824_v5 }
 0x428   :  { %v4658_v59 = vmul.f32 -1.442695, %v5983_v58 }
 0x429   :  { %v4660_v3 = vmul.f32 -1.442695, %v5984_v62 }
 0x42a   :  { %6160 = vpow2.f32 %v4658_v59 }
 0x42b   :  { %6162 = vpow2.f32 %v4659_v0 }
 0x42c   :  { %6164 = vpow2.f32 %v4660_v3 }
 0x430   :  { %v6159_v8 = vpop.eup %6158 }
 0x431   :  { %v1384_v11 = vadd.f32 1.0, %v6159_v8 }
 0x433   :  { %6166 = vrcp.f32 %v1384_v11 }
 0x434   :  { %v6161_v17 = vpop.eup %6160 }
 0x435   :  { %v1385_v13 = vadd.f32 1.0, %v6161_v17  ;;  %v6163_v63 = vpop.eup %6162 }
 0x436   :  { %v6165_v61 = vpop.eup %6164  ;;  %v1398_v53 = vadd.f32 1.0, %v6163_v63 }
 0x437   :  { %6168 = vrcp.f32 %v1385_v13  ;;  %v1399_v37 = vadd.f32 1.0, %v6165_v61 }
 0x438   :  { %6170 = vrcp.f32 %v1398_v53 }
 0x439   :  { %6172 = vrcp.f32 %v1399_v37 }
 0x43d   :  { %v6167_v30 = vpop.eup %6166 }
 0x43e   :  { %v1406_v38 = vmul.f32 %v6167_v30, %v1404_v28 }
 0x440   :  { %v1408_v42 = vadd.f32 %v1406_v38, %v6771_v10 }
 0x441   :  { %v6169_v44 = vpop.eup %6168 }
 0x442   :  { %v1407_v46 = vmul.f32 %v6169_v44, %v1405_v34  ;;  %6174 = vtanh.f32 %v1408_v42  ;;  %v6171_v1 = vpop.eup %6170 }
 0x443   :  { %v6173_v25 = vpop.eup %6172  ;;  %v1412_v50 = vsub.f32 1.0, %v6171_v1  ;;  %v1416_v57 = vmul.f32 %v6171_v1, %v6930_v47 }
 0x444   :  { %v1409_v4 = vadd.f32 %v1407_v46, %v6768_v6  ;;  %v1413_v52 = vsub.f32 1.0, %v6173_v25  ;;  %v1417_v6 = vmul.f32 %v6173_v25, %v6941_v49 }
 0x446   :  { %6176 = vtanh.f32 %v1409_v4 }
 0x44c   :  { %v6175_v51 = vpop.eup %6174 }
 0x44d   :  { %v1414_v60 = vmul.f32 %v6175_v51, %v1412_v50 }
 0x44f   :  { %v6974_v58 = vadd.f32 %v1416_v57, %v1414_v60 }
 0x450   :  { %v6177_v56 = vpop.eup %6176 }
 0x451   :  { %4661 = vmatmul.mubr.msk.f32.vlgmr.msra.gmra.mrb[16].mxu0 %vm562_vm1, %v6974_v58  ;;  %5091 = vmatprep.mubr.msk.f32.mxu1 %vm562_vm1, %v6974_v58  ;;  %v1415_v10 = vmul.f32 %v6177_v56, %v1413_v52  ;;  %1420 = vst.msk [vmem:[#allocation3 + $0x30] sm:$0xff] %vm762_vm2, %v6974_v58 }
 0x452   :  { %1512 = vmatprep.mubr.f32.mxu0 %v6418_v2  ;;  %5544 = vmatpush1.bf16.msra.mxu0 %v6525_v9 }
 0x453   :  { %v6985_v54 = vadd.f32 %v1417_v6, %v1415_v10  ;;  %5546 = vmatprep.subr.bf16.mxu0 %v6545_v15 }
 0x455   :  { %1426 = vst.msk [vmem:[#allocation3 + $0x40] sm:$0xff] %vm770_vm3, %v6985_v54  ;;  %4662 = vmatmul.mubr.msk.f32.gmra.mrb[18].mxu0 %vm562_vm1, %v6985_v54  ;;  %5092 = vmatmul.mubr.msk.f32.vlgmr.msra.gmra.mrb[24].mxu1 %vm562_vm1, %v6985_v54 }
 0x456   :  { %5548 = vmatpush1.bf16.msra.mxu0 %v6547_v16  ;;  %5560 = vmatpush3.bf16.msra.mxu1 %v6601_v33 }
 0x457   :  { %5550 = vmatprep.subr.bf16.mxu0 %v6557_v19  ;;  %5562 = vmatprep.subr.bf16.mxu1 %v6621_v39 }
 0x458   :  { %1724 = vmatprep.mubr.f32.mxu0 %v6418_v2 }
 0x45a   :  { %5552 = vmatpush1.bf16.msra.mxu0 %v6570_v23  ;;  %5564 = vmatpush3.bf16.msra.mxu1 %v6621_v39 }
 0x45b   :  { %5554 = vmatprep.subr.bf16.mxu0 %v6579_v26  ;;  %5566 = vmatprep.subr.bf16.mxu1 %v6630_v41 }
 0x45e   :  { %5556 = vmatpush1.bf16.msra.mxu0 %v6610_v36  ;;  %5568 = vmatpush3.bf16.msra.mxu1 %v6630_v41 }
 0x45f   :  { %5570 = vmatprep.subr.bf16.mxu1 %v6649_v45  ;;  %5574 = vmatprep.subr.bf16.mxu0 %v6519_v7 }
 0x462   :  { %5572 = vmatpush3.bf16.msra.mxu1 %v6649_v45 }
 0x463   :  { %5590 = vmatprep.subr.bf16.mxu1 %v6601_v33 }
 0x524   :  { %v1508_v2 = vpop.f32.mrb[16].mxu0 }
 0x525   :  { %v5985_v55 = vadd.f32 %v1508_v2, %v6800_v35  ;;  %v1510_v59 = vpop.f32.mrb[17].mxu0 }
 0x526   :  { %v5986_v0 = vadd.f32 %v1510_v59, %v6806_v40 }
 0x527   :  { %v4665_v62 = vmul.f32 -1.442695, %v5985_v55 }
 0x528   :  { %v1514_v3 = vpop.f32.mrb[18].mxu0  ;;  %v5093_v8 = vpop.f32.mrb[24].mxu1  ;;  %v4667_v53 = vmul.f32 -1.442695, %v5986_v0 }
 0x529   :  { %6178 = vpow2.f32 %v4665_v62  ;;  %v5987_v11 = vadd.f32 %v1514_v3, %v6811_v43  ;;  %v1516_v17 = vpop.f32.mrb[19].mxu0  ;;  %v1585_v13 = vpop.f32.mrb[25].mxu1  ;;  %v1623_v51 = vadd.f32 %v5093_v8, %v6830_v22 }
 0x52a   :  { %v5988_v61 = vadd.f32 %v1516_v17, %v6817_v48  ;;  %v1622_v4 = vadd.f32 %v1585_v13, %v6824_v5 }
 0x52b   :  { %v4666_v63 = vmul.f32 -1.442695, %v5987_v11  ;;  %v7027_v11 = vld [vmem:[#allocation3 + $0x28] sm:$0xff] }
 0x52c   :  { %v4668_v28 = vmul.f32 -1.442695, %v5988_v61 }
 0x52d   :  { %6180 = vpow2.f32 %v4666_v63 }
 0x52e   :  { %6182 = vpow2.f32 %v4667_v53 }
 0x52f   :  { %6184 = vpow2.f32 %v4668_v28 }
 0x533   :  { %v6179_v30 = vpop.eup %6178 }
 0x534   :  { %v1602_v37 = vadd.f32 1.0, %v6179_v30 }
 0x536   :  { %6186 = vrcp.f32 %v1602_v37 }
 0x537   :  { %v6181_v38 = vpop.eup %6180 }
 0x538   :  { %v1603_v34 = vadd.f32 1.0, %v6181_v38  ;;  %v6183_v42 = vpop.eup %6182 }
 0x539   :  { %v6185_v44 = vpop.eup %6184  ;;  %v1616_v46 = vadd.f32 1.0, %v6183_v42 }
 0x53a   :  { %6188 = vrcp.f32 %v1603_v34  ;;  %v1617_v25 = vadd.f32 1.0, %v6185_v44 }
 0x53b   :  { %6190 = vrcp.f32 %v1616_v46 }
 0x53c   :  { %6192 = vrcp.f32 %v1617_v25 }
 0x540   :  { %v6187_v1 = vpop.eup %6186 }
 0x541   :  { %v1624_v50 = vmul.f32 %v6187_v1, %v1622_v4 }
 0x543   :  { %v1626_v57 = vadd.f32 %v1624_v50, %v6777_v14 }
 0x544   :  { %v6189_v60 = vpop.eup %6188 }
 0x545   :  { %v1625_v52 = vmul.f32 %v6189_v60, %v1623_v51  ;;  %6194 = vtanh.f32 %v1626_v57  ;;  %v6191_v10 = vpop.eup %6190 }
 0x546   :  { %v6193_v6 = vpop.eup %6192  ;;  %v1630_v2 = vsub.f32 1.0, %v6191_v10  ;;  %v1634_v59 = vmul.f32 %v6191_v10, %v6974_v58 }
 0x547   :  { %v1627_v56 = vadd.f32 %v1625_v52, %v6774_v12  ;;  %v1631_v0 = vsub.f32 1.0, %v6193_v6  ;;  %v1635_v14 = vmul.f32 %v6193_v6, %v6985_v54 }
 0x549   :  { %6196 = vtanh.f32 %v1627_v56 }
 0x54f   :  { %v6195_v55 = vpop.eup %6194 }
 0x550   :  { %v1632_v62 = vmul.f32 %v6195_v55, %v1630_v2 }
 0x552   :  { %v7018_v3 = vadd.f32 %v1634_v59, %v1632_v62 }
 0x553   :  { %v6197_v8 = vpop.eup %6196 }
 0x554   :  { %1638 = vst.msk [vmem:[#allocation3 + $0x40] sm:$0xff] %vm762_vm2, %v7018_v3  ;;  %4669 = vmatmul.mubr.msk.f32.vlgmr.msra.gmra.mrb[20].mxu0 %vm562_vm1, %v7018_v3  ;;  %5110 = vmatprep.mubr.msk.f32.mxu1 %vm562_vm1, %v7018_v3  ;;  %v1633_v12 = vmul.f32 %v6197_v8, %v1631_v0 }
 0x555   :  { %1730 = vmatprep.mubr.f32.mxu0 %v7027_v11  ;;  %5576 = vmatpush1.bf16.msra.mxu0 %v6525_v9 }
 0x556   :  { %v7031_v17 = vadd.f32 %v1635_v14, %v1633_v12  ;;  %5578 = vmatprep.subr.bf16.mxu0 %v6545_v15 }
 0x558   :  { %1644 = vst.msk [vmem:[#allocation3 + $0x30] sm:$0xff] %vm770_vm3, %v7031_v17  ;;  %4670 = vmatmul.mubr.msk.f32.gmra.mrb[22].mxu0 %vm562_vm1, %v7031_v17  ;;  %5111 = vmatmul.mubr.msk.f32.vlgmr.msra.gmra.mrb[26].mxu1 %vm562_vm1, %v7031_v17 }
 0x559   :  { %5580 = vmatpush1.bf16.msra.mxu0 %v6547_v16  ;;  %5592 = vmatpush3.bf16.msra.mxu1 %v6601_v33 }
 0x55a   :  { %5582 = vmatprep.subr.bf16.mxu0 %v6557_v19  ;;  %5594 = vmatprep.subr.bf16.mxu1 %v6621_v39 }
 0x55b   :  { %1942 = vmatprep.mubr.f32.mxu0 %v7027_v11 }
 0x55d   :  { %5584 = vmatpush1.bf16.msra.mxu0 %v6570_v23  ;;  %5596 = vmatpush3.bf16.msra.mxu1 %v6621_v39 }
 0x55e   :  { %5586 = vmatprep.subr.bf16.mxu0 %v6579_v26  ;;  %5598 = vmatprep.subr.bf16.mxu1 %v6630_v41 }
 0x561   :  { %5588 = vmatpush1.bf16.msra.mxu0 %v6610_v36  ;;  %5600 = vmatpush3.bf16.msra.mxu1 %v6630_v41 }
 0x562   :  { %5602 = vmatprep.subr.bf16.mxu1 %v6649_v45  ;;  %5606 = vmatprep.subr.bf16.mxu0 %v6519_v7 }
 0x565   :  { %5604 = vmatpush3.bf16.msra.mxu1 %v6649_v45 }
 0x566   :  { %5622 = vmatprep.subr.bf16.mxu1 %v6601_v33 }
 0x627   :  { %v1726_v13 = vpop.f32.mrb[20].mxu0 }
 0x628   :  { %v5989_v63 = vadd.f32 %v1726_v13, %v6800_v35  ;;  %v1728_v61 = vpop.f32.mrb[21].mxu0 }
 0x629   :  { %v5990_v28 = vadd.f32 %v1728_v61, %v6806_v40 }
 0x62a   :  { %v4673_v53 = vmul.f32 -1.442695, %v5989_v63 }
 0x62b   :  { %v1732_v30 = vpop.f32.mrb[22].mxu0  ;;  %v5112_v37 = vpop.f32.mrb[26].mxu1  ;;  %v4675_v46 = vmul.f32 -1.442695, %v5990_v28 }
 0x62c   :  { %6198 = vpow2.f32 %v4673_v53  ;;  %v5991_v38 = vadd.f32 %v1732_v30, %v6811_v43  ;;  %v1734_v34 = vpop.f32.mrb[23].mxu0  ;;  %v1803_v42 = vpop.f32.mrb[27].mxu1  ;;  %v1841_v55 = vadd.f32 %v5112_v37, %v6830_v22 }
 0x62d   :  { %v5992_v7 = vadd.f32 %v1734_v34, %v6817_v48  ;;  %v1840_v56 = vadd.f32 %v1803_v42, %v6824_v5 }
 0x62e   :  { %v4674_v44 = vmul.f32 -1.442695, %v5991_v38 }
 0x62f   :  { %v4676_v4 = vmul.f32 -1.442695, %v5992_v7 }
 0x630   :  { %6200 = vpow2.f32 %v4674_v44 }
 0x631   :  { %6202 = vpow2.f32 %v4675_v46 }
 0x632   :  { %6204 = vpow2.f32 %v4676_v4 }
 0x636   :  { %v6199_v1 = vpop.eup %6198 }
 0x637   :  { %v1820_v25 = vadd.f32 1.0, %v6199_v1 }
 0x639   :  { %6206 = vrcp.f32 %v1820_v25 }
 0x63a   :  { %v6201_v50 = vpop.eup %6200 }
 0x63b   :  { %v1821_v51 = vadd.f32 1.0, %v6201_v50  ;;  %v6203_v57 = vpop.eup %6202 }
 0x63c   :  { %v6205_v60 = vpop.eup %6204  ;;  %v1834_v52 = vadd.f32 1.0, %v6203_v57 }
 0x63d   :  { %6208 = vrcp.f32 %v1821_v51  ;;  %v1835_v6 = vadd.f32 1.0, %v6205_v60 }
 0x63e   :  { %6210 = vrcp.f32 %v1834_v52 }
 0x63f   :  { %6212 = vrcp.f32 %v1835_v6 }
 0x643   :  { %v6207_v10 = vpop.eup %6206 }
 0x644   :  { %v1842_v2 = vmul.f32 %v6207_v10, %v1840_v56 }
 0x646   :  { %v1844_v59 = vadd.f32 %v1842_v2, %v6783_v21 }
 0x647   :  { %v6209_v62 = vpop.eup %6208 }
 0x648   :  { %v1843_v0 = vmul.f32 %v6209_v62, %v1841_v55  ;;  %6214 = vtanh.f32 %v1844_v59  ;;  %v6211_v12 = vpop.eup %6210 }
 0x649   :  { %v6213_v14 = vpop.eup %6212  ;;  %v1848_v13 = vsub.f32 1.0, %v6211_v12  ;;  %v1852_v61 = vmul.f32 %v6211_v12, %v7018_v3 }
 0x64a   :  { %v1845_v8 = vadd.f32 %v1843_v0, %v6780_v18  ;;  %v1849_v28 = vsub.f32 1.0, %v6213_v14  ;;  %v1853_v21 = vmul.f32 %v6213_v14, %v7031_v17  ;;  %v2321_v14 = vld [vmem:[%s7880_s5 + $0x8] sm:$0xff] }
 0x64c   :  { %6216 = vtanh.f32 %v1845_v8 }
 0x652   :  { %v6215_v63 = vpop.eup %6214 }
 0x653   :  { %v1850_v53 = vmul.f32 %v6215_v63, %v1848_v13  ;;  %v2324_v13 = vld [vmem:[%s7880_s5 + $0x20] sm:$0xff] }
 0x654   :  { %v5637_v63 = vpack.c.bf16 %v2324_v13, %v2321_v14  ;;  %v2331_v14 = vld [vmem:[%s7880_s5 + $0x58] sm:$0xff] }
 0x655   :  { %v7064_v30 = vadd.f32 %v1852_v61, %v1850_v53  ;;  %v2327_v53 = vld [vmem:[%s7880_s5 + $0x38] sm:$0xff] }
 0x656   :  { %v6217_v37 = vpop.eup %6216 }
 0x657   :  { %1856 = vst.msk [vmem:[#allocation3 + $0x50] sm:$0xff] %vm762_vm2, %v7064_v30  ;;  %4677 = vmatmul.mubr.msk.f32.vlgmr.msra.gmra.mrb[24].mxu0 %vm562_vm1, %v7064_v30  ;;  %5129 = vmatprep.mubr.msk.f32.mxu1 %vm562_vm1, %v7064_v30  ;;  %v1851_v18 = vmul.f32 %v6217_v37, %v1849_v28  ;;  %v2330_v28 = vld [vmem:[%s7880_s5 + $0x50] sm:$0xff] }
 0x658   :  { %1948 = vmatprep.mubr.f32.mxu0 %v7027_v11  ;;  %5608 = vmatpush1.bf16.msra.mxu0 %v6525_v9  ;;  %v5641_v37 = vpack.c.bf16 %v2330_v28, %v2327_v53  ;;  %v2343_v53 = vld [vmem:[%s7880_s5 + $0xb8] sm:$0xff] }
 0x659   :  { %v7075_v38 = vadd.f32 %v1853_v21, %v1851_v18  ;;  %5610 = vmatprep.subr.bf16.mxu0 %v6545_v15  ;;  %v2326_v18 = vld [vmem:[%s7880_s5 + $0x30] sm:$0xff]  ;;  %v2329_v21 = vld [vmem:[%s7880_s5 + $0x48] sm:$0xff] }
 0x65b   :  { %1862 = vst.msk [vmem:[#allocation3 + $0x20] sm:$0xff] %vm770_vm3, %v7075_v38  ;;  %4678 = vmatmul.mubr.msk.f32.gmra.mrb[26].mxu0 %vm562_vm1, %v7075_v38  ;;  %5130 = vmatmul.mubr.msk.f32.vlgmr.msra.gmra.mrb[28].mxu1 %vm562_vm1, %v7075_v38 }
 0x65c   :  { %5612 = vmatpush1.bf16.msra.mxu0 %v6547_v16  ;;  %5624 = vmatpush3.bf16.msra.mxu1 %v6601_v33 }
 0x65d   :  { %5614 = vmatprep.subr.bf16.mxu0 %v6557_v19  ;;  %5626 = vmatprep.subr.bf16.mxu1 %v6621_v39 }
 0x65e   :  { %2160 = vmatprep.mubr.f32.mxu0 %v7027_v11 }
 0x660   :  { %5616 = vmatpush1.bf16.msra.mxu0 %v6570_v23  ;;  %5628 = vmatpush3.bf16.msra.mxu1 %v6621_v39 }
 0x661   :  { %5618 = vmatprep.subr.bf16.mxu0 %v6579_v26  ;;  %5630 = vmatprep.subr.bf16.mxu1 %v6630_v41 }
 0x664   :  { %5620 = vmatpush1.bf16.msra.mxu0 %v6610_v36  ;;  %5632 = vmatpush3.bf16.msra.mxu1 %v6630_v41 }
 0x665   :  { %5634 = vmatprep.subr.bf16.mxu1 %v6649_v45 }
 0x668   :  { %5636 = vmatpush3.bf16.msra.mxu1 %v6649_v45 }
 0x669   :  { %5638 = vmatprep.subr.bf16.mxu1 %v5637_v63  ;;  %v2334_v63 = vld [vmem:[%s7880_s5 + $0x70] sm:$0xff] }
 0x72a   :  { %v1944_v9 = vpop.f32.mrb[24].mxu0 }
 0x72b   :  { %v5993_v15 = vadd.f32 %v1944_v9, %v6800_v35  ;;  %v1946_v16 = vpop.f32.mrb[25].mxu0  ;;  %v2333_v9 = vld [vmem:[%s7880_s5 + $0x68] sm:$0xff] }
 0x72c   :  { %v5994_v23 = vadd.f32 %v1946_v16, %v6806_v40 }
 0x72d   :  { %v4681_v19 = vmul.f32 -1.442695, %v5993_v15  ;;  %v2336_v15 = vld [vmem:[%s7880_s5 + $0x80] sm:$0xff] }
 0x72e   :  { %v1950_v33 = vpop.f32.mrb[26].mxu0  ;;  %v5131_v39 = vpop.f32.mrb[28].mxu1  ;;  %v4683_v44 = vmul.f32 -1.442695, %v5994_v23  ;;  %v5645_v16 = vpack.c.bf16 %v2336_v15, %v2333_v9  ;;  %v2335_v23 = vld [vmem:[%s7880_s5 + $0x78] sm:$0xff] }
 0x72f   :  { %6218 = vpow2.f32 %v4681_v19  ;;  %v5995_v26 = vadd.f32 %v1950_v33, %v6811_v43  ;;  %v1952_v34 = vpop.f32.mrb[27].mxu0  ;;  %v2021_v36 = vpop.f32.mrb[29].mxu1  ;;  %v2059_v57 = vadd.f32 %v5131_v39, %v6830_v22  ;;  %v2332_v19 = vld [vmem:[%s7880_s5 + $0x60] sm:$0xff]  ;;  %v2339_v39 = vld [vmem:[%s7880_s5 + $0x98] sm:$0xff] }
 0x730   :  { %v5996_v41 = vadd.f32 %v1952_v34, %v6817_v48  ;;  %v2058_v43 = vadd.f32 %v2021_v36, %v6824_v5  ;;  %v5647_v33 = vpack.c.bf16 %v2335_v23, %v2332_v19  ;;  %v2338_v34 = vld [vmem:[%s7880_s5 + $0x90] sm:$0xff] }
 0x731   :  { %v4682_v42 = vmul.f32 -1.442695, %v5995_v26  ;;  %v2342_v26 = vld [vmem:[%s7880_s5 + $0xb0] sm:$0xff] }
 0x732   :  { %v4684_v45 = vmul.f32 -1.442695, %v5996_v41  ;;  %v5649_v36 = vpack.c.bf16 %v2342_v26, %v2339_v39  ;;  %v2345_v41 = vld [vmem:[%s7880_s5 + $0xc8] sm:$0xff] }
 0x733   :  { %6220 = vpow2.f32 %v4682_v42  ;;  %v2341_v42 = vld [vmem:[%s7880_s5 + $0xa8] sm:$0xff] }
 0x734   :  { %6222 = vpow2.f32 %v4683_v44  ;;  %v2348_v44 = vld [vmem:[%s7880_s5 + $0xe0] sm:$0xff]  ;;  %v6410_v39 = vld [vmem:[%s7878_s3 + $0x8] sm:$0xff] }
 0x735   :  { %6224 = vpow2.f32 %v4684_v45  ;;  %v5651_v45 = vpack.c.bf16 %v2341_v42, %v2338_v34 }
 0x739   :  { %v6219_v7 = vpop.eup %6218 }
 0x73a   :  { %v2038_v35 = vadd.f32 1.0, %v6219_v7  ;;  %v5653_v7 = vpack.c.bf16 %v2348_v44, %v2345_v41 }
 0x73c   :  { %6226 = vrcp.f32 %v2038_v35  ;;  %v2344_v35 = vld [vmem:[%s7880_s5 + $0xc0] sm:$0xff] }
 0x73d   :  { %v6221_v46 = vpop.eup %6220 }
 0x73e   :  { %v2039_v40 = vadd.f32 1.0, %v6221_v46  ;;  %v6223_v4 = vpop.eup %6222  ;;  %v2347_v46 = vld [vmem:[%s7880_s5 + $0xd8] sm:$0xff] }
 0x73f   :  { %v6225_v1 = vpop.eup %6224  ;;  %v2052_v25 = vadd.f32 1.0, %v6223_v4  ;;  %v2354_v4 = vld [vmem:[%s7880_s5 + $0x110] sm:$0xff] }
 0x740   :  { %6228 = vrcp.f32 %v2039_v40  ;;  %v2053_v51 = vadd.f32 1.0, %v6225_v1  ;;  %v2351_v40 = vld [vmem:[%s7880_s5 + $0xf8] sm:$0xff]  ;;  %v5655_v1 = vpack.c.bf16 %v2347_v46, %v2344_v35  ;;  %v6412_v35 = vld [vmem:[%s7878_s3 + $0x20] sm:$0xff] }
 0x741   :  { %6230 = vrcp.f32 %v2052_v25  ;;  %v5657_v25 = vpack.c.bf16 %v2354_v4, %v2351_v40 }
 0x742   :  { %6232 = vrcp.f32 %v2053_v51 }
 0x746   :  { %v6227_v50 = vpop.eup %6226 }
 0x747   :  { %v2060_v48 = vmul.f32 %v6227_v50, %v2058_v43  ;;  %v2350_v43 = vld [vmem:[%s7880_s5 + $0xf0] sm:$0xff]  ;;  %v2353_v50 = vld [vmem:[%s7880_s5 + $0x108] sm:$0xff] }
 0x748   :  { %v5659_v51 = vpack.c.bf16 %v2353_v50, %v2350_v43 }
 0x749   :  { %v2062_v60 = vadd.f32 %v2060_v48, %v6789_v27  ;;  %v2357_v48 = vld [vmem:[%s7880_s5 + $0x128] sm:$0xff] }
 0x74a   :  { %v6229_v52 = vpop.eup %6228 }
 0x74b   :  { %v2061_v56 = vmul.f32 %v6229_v52, %v2059_v57  ;;  %6234 = vtanh.f32 %v2062_v60  ;;  %v6231_v6 = vpop.eup %6230  ;;  %v2360_v57 = vld [vmem:[%s7880_s5 + $0x140] sm:$0xff] }
 0x74c   :  { %v6233_v2 = vpop.eup %6232  ;;  %v2066_v55 = vsub.f32 1.0, %v6231_v6  ;;  %v2070_v62 = vmul.f32 %v6231_v6, %v7064_v30  ;;  %v5661_v60 = vpack.c.bf16 %v2360_v57, %v2357_v48  ;;  %v2356_v52 = vld [vmem:[%s7880_s5 + $0x120] sm:$0xff]  ;;  %v2363_v6 = vld [vmem:[%s7880_s5 + $0x158] sm:$0xff] }
 0x74d   :  { %v2063_v10 = vadd.f32 %v2061_v56, %v6786_v24  ;;  %v2067_v0 = vsub.f32 1.0, %v6233_v2  ;;  %v2071_v27 = vmul.f32 %v6233_v2, %v7075_v38  ;;  %v2359_v56 = vld [vmem:[%s7880_s5 + $0x138] sm:$0xff]  ;;  %v2366_v2 = vld [vmem:[%s7880_s5 + $0x170] sm:$0xff] }
 0x74f   :  { %6236 = vtanh.f32 %v2063_v10  ;;  %v5663_v10 = vpack.c.bf16 %v2359_v56, %v2356_v52 }
 0x755   :  { %v6235_v59 = vpop.eup %6234 }
 0x756   :  { %v2068_v5 = vmul.f32 %v6235_v59, %v2066_v55  ;;  %v5665_v55 = vpack.c.bf16 %v2366_v2, %v2363_v6  ;;  %v2362_v59 = vld [vmem:[%s7880_s5 + $0x150] sm:$0xff]  ;;  %v6414_v2 = vld [vmem:[%s7879_s4 + $0x8] sm:$0xff] }
 0x758   :  { %v7106_v8 = vadd.f32 %v2070_v62, %v2068_v5  ;;  %v2365_v5 = vld [vmem:[%s7880_s5 + $0x168] sm:$0xff] }
 0x759   :  { %v6237_v22 = vpop.eup %6236  ;;  %v5667_v62 = vpack.c.bf16 %v2365_v5, %v2362_v59 }
 0x75a   :  { %2076 = vrot.lane.b32.xlu1 %v7106_v8, %s6419_s18  ;;  %2074 = vst.msk [vmem:[#allocation3 + $0x60] sm:$0xff] %vm762_vm2, %v7106_v8  ;;  %4685 = vmatmul.mubr.msk.f32.vlgmr.msra.gmra.mrb[28].mxu0 %vm562_vm1, %v7106_v8  ;;  %v2069_v24 = vmul.f32 %v6237_v22, %v2067_v0  ;;  %v2322_v0 = vld [vmem:[%s7880_s5 + $0x10] sm:$0xff]  ;;  %v2325_v22 = vld [vmem:[%s7880_s5 + $0x28] sm:$0xff] }
 0x75b   :  { %5148 = vmatprep.mubr.msk.f32.mxu1 %vm562_vm1, %v7106_v8  ;;  %2166 = vmatprep.mubr.f32.mxu0 %v7027_v11 }
 0x75c   :  { %v7118_v12 = vadd.f32 %v2071_v27, %v2069_v24  ;;  %v2328_v24 = vld [vmem:[%s7880_s5 + $0x40] sm:$0xff]  ;;  %v5669_v27 = vpack.c.bf16 %v2325_v22, %v2322_v0  ;;  %v2358_v0 = vld [vmem:[%s7880_s5 + $0x130] sm:$0xff]  ;;  %v2361_v22 = vld [vmem:[%s7880_s5 + $0x148] sm:$0xff] }
 0x75d   :  { %v5673_v13 = vpack.c.bf16 %v2331_v14, %v2328_v24  ;;  %v5693_v24 = vpack.c.bf16 %v2361_v22, %v2358_v0  ;;  %v2367_v14 = vld [vmem:[%s7880_s5 + $0x178] sm:$0xff]  ;;  %v2308_v0 = vld [vmem:[#allocation3 + $0x20] sm:$0xff] }
 0x75e   :  { %1858 = vrot.lane.b32.xlu1 %v7064_v30, %s6419_s18  ;;  %2080 = vst.msk [vmem:[#allocation3 + $0x10] sm:$0xff] %vm770_vm3, %v7118_v12  ;;  %4686 = vmatmul.mubr.msk.f32.gmra.mrb[30].mxu0 %vm562_vm1, %v7118_v12  ;;  %v2796_v22 = vld [vmem:[%s7881_s6 + $0xa0] sm:$0xff] }
 0x75f   :  { %5149 = vmatmul.mubr.msk.f32.vlgmr.msra.gmra.mrb[30].mxu1 %vm562_vm1, %v7118_v12  ;;  %5670 = vmatprep.subr.bf16.mxu0 %v5669_v27 }
 0x760   :  { %2432 = vmatprep.mubr.f32.mxu1 %v7027_v11  ;;  %5672 = vmatpush3.bf16.msra.mxu0 %v5669_v27 }
 0x761   :  { %5674 = vmatprep.subr.bf16.mxu0 %v5673_v13 }
 0x762   :  { %1640 = vrot.lane.b32.xlu1 %v7018_v3, %s6419_s18  ;;  %v2320_v3 = vld [vmem:[%s7880_s5] sm:$0xff] }
 0x764   :  { %5676 = vmatpush3.bf16.msra.mxu0 %v5673_v13 }
 0x766   :  { %1646 = vrot.lane.b32.xlu1 %v7031_v17, %s6419_s18  ;;  %v2323_v17 = vld [vmem:[%s7880_s5 + $0x18] sm:$0xff] }
 0x767   :  { %v5639_v61 = vpack.c.bf16 %v2323_v17, %v2320_v3  ;;  %v2337_v3 = vld [vmem:[%s7880_s5 + $0x88] sm:$0xff] }
 0x768   :  { %v5677_v17 = vpack.c.bf16 %v2337_v3, %v2334_v63  ;;  %v2777_v3 = vld [vmem:[%s7881_s6 + $0x8] sm:$0xff] }
 0x769   :  { %5640 = vmatpush1.bf16.msra.mxu1 %v5639_v61  ;;  %v2340_v61 = vld [vmem:[%s7880_s5 + $0xa0] sm:$0xff] }
 0x76a   :  { %1864 = vrot.lane.b32.xlu1 %v7075_v38, %s6419_s18  ;;  %v5643_v38 = vpack.c.bf16 %v2329_v21, %v2326_v18  ;;  %5642 = vmatprep.subr.bf16.mxu1 %v5641_v37  ;;  %v5681_v28 = vpack.c.bf16 %v2343_v53, %v2340_v61  ;;  %v2349_v37 = vld [vmem:[%s7880_s5 + $0xe8] sm:$0xff]  ;;  %v2352_v21 = vld [vmem:[%s7880_s5 + $0x100] sm:$0xff] }
 0x76b   :  { %5678 = vmatprep.subr.bf16.mxu0 %v5677_v17 }
 0x76c   :  { %5680 = vmatpush3.bf16.msra.mxu0 %v5677_v17 }
 0x76d   :  { %5644 = vmatpush1.bf16.msra.mxu1 %v5643_v38  ;;  %5682 = vmatprep.subr.bf16.mxu0 %v5681_v28  ;;  %v2355_v38 = vld [vmem:[%s7880_s5 + $0x118] sm:$0xff] }
 0x76e   :  { %2082 = vrot.lane.b32.xlu1 %v7118_v12, %s6419_s18  ;;  %5646 = vmatprep.subr.bf16.mxu1 %v5645_v16  ;;  %v5689_v9 = vpack.c.bf16 %v2355_v38, %v2352_v21  ;;  %v6409_v16 = vld [vmem:[%s7878_s3] sm:$0xff] }
 0x770   :  { %5684 = vmatpush3.bf16.msra.mxu0 %v5681_v28 }
 0x771   :  { %5648 = vmatpush1.bf16.msra.mxu1 %v5647_v33 }
 0x772   :  { %5650 = vmatprep.subr.bf16.mxu1 %v5649_v36  ;;  %v6411_v36 = vld [vmem:[%s7878_s3 + $0x18] sm:$0xff] }
 0x775   :  { %5652 = vmatpush1.bf16.msra.mxu1 %v5651_v45 }
 0x776   :  { %5654 = vmatprep.subr.bf16.mxu1 %v5653_v7 }
 0x779   :  { %5656 = vmatpush1.bf16.msra.mxu1 %v5655_v1 }
 0x77a   :  { %5658 = vmatprep.subr.bf16.mxu1 %v5657_v25 }
 0x77d   :  { %5660 = vmatpush1.bf16.msra.mxu1 %v5659_v51 }
 0x77e   :  { %5662 = vmatprep.subr.bf16.mxu1 %v5661_v60  ;;  %v6413_v60 = vld [vmem:[%s7879_s4] sm:$0xff] }
 0x781   :  { %5664 = vmatpush1.bf16.msra.mxu1 %v5663_v10 }
 0x782   :  { %5666 = vmatprep.subr.bf16.mxu1 %v5665_v55 }
 0x785   :  { %5668 = vmatpush1.bf16.msra.mxu1 %v5667_v62 }
 0x7cc   :  { %v2077_v30 = vpop.permute.xlu1 %2076 }
 0x7cd   :  { %2079 = vst.msk [vmem:[#allocation3 + $0x18] sm:$0xff] %vm768_vm5, %v2077_v30  ;;  %v2346_v30 = vld [vmem:[%s7880_s5 + $0xd0] sm:$0xff] }
 0x7ce   :  { %v5685_v18 = vpack.c.bf16 %v2349_v37, %v2346_v30 }
 0x7d0   :  { %5686 = vmatprep.subr.bf16.mxu0 %v5685_v18 }
 0x7d1   :  { %5688 = vmatpush3.bf16.msra.mxu0 %v5685_v18 }
 0x7d2   :  { %5690 = vmatprep.subr.bf16.mxu0 %v5689_v9 }
 0x7d5   :  { %5692 = vmatpush3.bf16.msra.mxu0 %v5689_v9 }
 0x7d6   :  { %5694 = vmatprep.subr.bf16.mxu0 %v5693_v24 }
 0x7d9   :  { %5696 = vmatpush3.bf16.msra.mxu0 %v5693_v24  ;;  %v2799_v24 = vld [vmem:[%s7881_s6 + $0xb8] sm:$0xff] }
 0x82d   :  { %v2162_v15 = vpop.f32.mrb[28].mxu0 }
 0x82e   :  { %v5997_v19 = vadd.f32 %v6409_v16, %v2162_v15  ;;  %v2164_v23 = vpop.f32.mrb[29].mxu0 }
 0x82f   :  { %v5998_v26 = vadd.f32 %v6410_v39, %v2164_v23  ;;  %v2782_v39 = vld [vmem:[%s7881_s6 + $0x30] sm:$0xff] }
 0x830   :  { %v4689_v33 = vmul.f32 -1.442695, %v5997_v19  ;;  %v2779_v19 = vld [vmem:[%s7881_s6 + $0x18] sm:$0xff] }
 0x831   :  { %v2168_v34 = vpop.f32.mrb[30].mxu0  ;;  %v4691_v40 = vmul.f32 -1.442695, %v5998_v26 }
 0x832   :  { %6238 = vpow2.f32 %v4689_v33  ;;  %v5999_v42 = vadd.f32 %v6411_v36, %v2168_v34  ;;  %v5150_v41 = vpop.f32.mrb[30].mxu1  ;;  %v2170_v44 = vpop.f32.mrb[31].mxu0  ;;  %v2792_v36 = vld [vmem:[%s7881_s6 + $0x80] sm:$0xff] }
 0x833   :  { %v2239_v45 = vpop.f32.mrb[31].mxu1  ;;  %v6000_v46 = vadd.f32 %v6412_v35, %v2170_v44  ;;  %v2277_v55 = vadd.f32 %v6414_v2, %v5150_v41  ;;  %v2795_v44 = vld [vmem:[%s7881_s6 + $0x98] sm:$0xff]  ;;  %v2797_v35 = vld [vmem:[%s7881_s6 + $0xa8] sm:$0xff]  ;;  %v2790_v2 = vld [vmem:[%s7881_s6 + $0x70] sm:$0xff] }
 0x834   :  { %v4690_v7 = vmul.f32 -1.442695, %v5999_v42  ;;  %v2276_v52 = vadd.f32 %v6413_v60, %v2239_v45  ;;  %v2788_v42 = vld [vmem:[%s7881_s6 + $0x60] sm:$0xff]  ;;  %v2794_v45 = vld [vmem:[%s7881_s6 + $0x90] sm:$0xff] }
 0x835   :  { %v4692_v4 = vmul.f32 -1.442695, %v6000_v46  ;;  %v7389_v46 = vpack.c.bf16 %v2797_v35, %v2794_v45 }
 0x836   :  { %6240 = vpow2.f32 %v4690_v7 }
 0x837   :  { %6242 = vpow2.f32 %v4691_v40  ;;  %v2778_v40 = vld [vmem:[%s7881_s6 + $0x10] sm:$0xff] }
 0x838   :  { %6244 = vpow2.f32 %v4692_v4  ;;  %v2781_v4 = vld [vmem:[%s7881_s6 + $0x28] sm:$0xff] }
 0x83c   :  { %v6239_v1 = vpop.eup %6238 }
 0x83d   :  { %v2256_v25 = vadd.f32 1.0, %v6239_v1  ;;  %v7400_v1 = vpack.c.bf16 %v2781_v4, %v2778_v40 }
 0x83f   :  { %6246 = vrcp.f32 %v2256_v25  ;;  %v1859_v25 = vpop.permute.xlu1 %1858 }
 0x840   :  { %v6241_v43 = vpop.eup %6240 }
 0x841   :  { %v2257_v50 = vadd.f32 1.0, %v6241_v43  ;;  %v6243_v51 = vpop.eup %6242 }
 0x842   :  { %v6245_v48 = vpop.eup %6244  ;;  %v2270_v57 = vadd.f32 1.0, %v6243_v51 }
 0x843   :  { %6248 = vrcp.f32 %v2257_v50  ;;  %v2271_v10 = vadd.f32 1.0, %v6245_v48  ;;  %v1641_v50 = vpop.permute.xlu1 %1640  ;;  %v2784_v48 = vld [vmem:[%s7881_s6 + $0x40] sm:$0xff] }
 0x844   :  { %6250 = vrcp.f32 %v2270_v57  ;;  %v2787_v57 = vld [vmem:[%s7881_s6 + $0x58] sm:$0xff] }
 0x845   :  { %6252 = vrcp.f32 %v2271_v10 }
 0x847   :  { %v1647_v10 = vpop.permute.xlu1 %1646 }
 0x849   :  { %v6247_v56 = vpop.eup %6246 }
 0x84a   :  { %v2278_v6 = vmul.f32 %v6247_v56, %v2276_v52  ;;  %v7412_v56 = vpack.c.bf16 %v2787_v57, %v2784_v48 }
 0x84c   :  { %v2280_v59 = vadd.f32 %v2278_v6, %v6795_v31  ;;  %v2364_v31 = vld [vmem:[%s7880_s5 + $0x160] sm:$0xff]  ;;  %v2306_v6 = vld [vmem:[#allocation3 + $0x10] sm:$0xff] }
 0x84d   :  { %v6249_v5 = vpop.eup %6248  ;;  %v5697_v13 = vpack.c.bf16 %v2367_v14, %v2364_v31 }
 0x84e   :  { %v2279_v62 = vmul.f32 %v6249_v5, %v2277_v55  ;;  %6254 = vtanh.f32 %v2280_v59  ;;  %v6251_v63 = vpop.eup %6250  ;;  %v2793_v55 = vld [vmem:[%s7881_s6 + $0x88] sm:$0xff]  ;;  %v2307_v5 = vld [vmem:[#allocation3 + $0x18] sm:$0xff] }
 0x84f   :  { %5698 = vmatprep.subr.bf16.mxu0 %v5697_v13  ;;  %v6253_v17 = vpop.eup %6252  ;;  %v2284_v61 = vsub.f32 1.0, %v6251_v63  ;;  %v2288_v37 = vmul.f32 %v6251_v63, %v7106_v8  ;;  %v2776_v8 = vld [vmem:[%s7881_s6] sm:$0xff]  ;;  %v2310_v63 = vld [vmem:[#allocation3 + $0x30] sm:$0xff] }
 0x850   :  { %v2281_v27 = vadd.f32 %v2279_v62, %v6792_v29  ;;  %v2780_v29 = vld [vmem:[%s7881_s6 + $0x20] sm:$0xff]  ;;  %5700 = vmatpush3.bf16.msra.mxu0 %v5697_v13  ;;  %v2285_v21 = vsub.f32 1.0, %v6253_v17  ;;  %v2289_v15 = vmul.f32 %v6253_v17, %v7118_v12  ;;  %v2783_v12 = vld [vmem:[%s7881_s6 + $0x38] sm:$0xff]  ;;  %v7333_v23 = vpack.c.bf16 %v2779_v19, %v2776_v8 }
 0x851   :  { %v7308_v53 = vpack.c.bf16 %v2780_v29, %v2777_v3  ;;  %5718 = vmatprep.subr.bf16.mxu0 %v7400_v1  ;;  %v7425_v62 = vpack.c.bf16 %v2793_v55, %v2790_v2  ;;  %v7438_v13 = vpack.c.bf16 %v2799_v24, %v2796_v22 }
 0x852   :  { %6256 = vtanh.f32 %v2281_v27  ;;  %v1865_v27 = vpop.permute.xlu1 %1864 }
 0x853   :  { %5702 = vmatprep.subr.bf16.mxu1 %v7308_v53 }
 0x856   :  { %v2083_v17 = vpop.permute.xlu1 %2082 }
 0x858   :  { %v6255_v28 = vpop.eup %6254 }
 0x859   :  { %v2286_v30 = vmul.f32 %v6255_v28, %v2284_v61  ;;  %v2312_v61 = vld [vmem:[#allocation3 + $0x40] sm:$0xff] }
 0x85b   :  { %v2290_v18 = vadd.f32 %v2288_v37, %v2286_v30 }
 0x85c   :  { %v6257_v38 = vpop.eup %6256 }
 0x85d   :  { %2294 = vrot.lane.b32.xlu0 %v2290_v18, %s6419_s18  ;;  %2292 = vst.msk [vmem:[#allocation3 + $0x70] sm:$0xff] %vm762_vm2, %v2290_v18  ;;  %v2287_v9 = vmul.f32 %v6257_v38, %v2285_v21  ;;  %v2314_v18 = vld [vmem:[#allocation3 + $0x50] sm:$0xff]  ;;  %v2316_v38 = vld [vmem:[#allocation3 + $0x60] sm:$0xff] }
 0x85f   :  { %v2291_v16 = vadd.f32 %v2289_v15, %v2287_v9 }
 0x861   :  { %1210 = vrot.lane.b32.xlu0 %v6941_v49, %s6419_s18  ;;  %2300 = vrot.lane.b32.xlu1 %v2291_v16, %s6419_s18  ;;  %2298 = vst.msk [vmem:[#allocation3] sm:$0xff] %vm770_vm3, %v2291_v16  ;;  %v2786_v49 = vld [vmem:[%s7881_s6 + $0x50] sm:$0xff] }
 0x862   :  { %v7335_v33 = vpack.c.bf16 %v2786_v49, %v2783_v12  ;;  %v7492_v12 = vld [vmem:[%s7882_s7 + $0x28] sm:$0xff] }
 0x864   :  { %v2318_v15 = vld [vmem:[#allocation3 + $0x70] sm:$0xff] }
 0x865   :  { %1428 = vrot.lane.b32.xlu0 %v6985_v54, %s6419_s18  ;;  %v2785_v54 = vld [vmem:[%s7881_s6 + $0x48] sm:$0xff] }
 0x866   :  { %v7346_v34 = vpack.c.bf16 %v2785_v54, %v2782_v39  ;;  %v7497_v39 = vld [vmem:[%s7882_s7 + $0x10] sm:$0xff] }
 0x868   :  { %v2304_v26 = vld [vmem:[#allocation3] sm:$0xff] }
 0x869   :  { %1422 = vrot.lane.b32.xlu0 %v6974_v58, %s6419_s18  ;;  %2433 = vmatmul.mubr.f32.vlgmr.msra.gmra.mrb[32].mxu1 %v2304_v26  ;;  %v2789_v58 = vld [vmem:[%s7881_s6 + $0x68] sm:$0xff] }
 0x86a   :  { %5183 = vmatprep.mubr.f32.mxu0 %v2304_v26  ;;  %5704 = vmatpush1.bf16.msra.mxu1 %v7333_v23 }
 0x86b   :  { %2438 = vmatprep.mubr.f32.mxu1 %v7027_v11  ;;  %5706 = vmatprep.subr.bf16.mxu1 %v7335_v33 }
 0x86d   :  { %1204 = vrot.lane.b32.xlu0 %v6930_v47, %s6419_s18  ;;  %v7366_v47 = vpack.c.bf16 %v2792_v36, %v2789_v58 }
 0x86e   :  { %5708 = vmatpush1.bf16.msra.mxu1 %v7346_v34 }
 0x86f   :  { %5710 = vmatprep.subr.bf16.mxu1 %v7366_v47 }
 0x871   :  { %986 = vrot.lane.b32.xlu0 %v6883_v20, %s6419_s18  ;;  %v2791_v20 = vld [vmem:[%s7881_s6 + $0x78] sm:$0xff] }
 0x872   :  { %v7371_v41 = vpack.c.bf16 %v2791_v20, %v2788_v42 }
 0x874   :  { %5712 = vmatpush1.bf16.msra.mxu1 %v7371_v41 }
 0x875   :  { %765 = vrot.lane.b32.xlu0 %v6837_v32, %s6419_s18  ;;  %v2798_v32 = vld [vmem:[%s7881_s6 + $0xb0] sm:$0xff] }
 0x876   :  { %v7384_v7 = vpack.c.bf16 %v2798_v32, %v2795_v44 }
 0x878   :  { %5714 = vmatprep.subr.bf16.mxu1 %v7384_v7 }
 0x879   :  { %5716 = vmatpush1.bf16.msra.mxu1 %v7389_v46 }
 0x87a   :  { %5734 = vmatprep.subr.bf16.mxu1 %v7308_v53 }
 0x8cf   :  { %v2295_v43 = vpop.permute.xlu0 %2294 }
 0x8d0   :  { %2297 = vst.msk [vmem:[#allocation3 + $0x8] sm:$0xff] %vm768_vm5, %v2295_v43 }
 0x8d3   :  { %v1211_v51 = vpop.permute.xlu0 %1210  ;;  %v2301_v37 = vpop.permute.xlu1 %2300 }
 0x8d4   :  { %1213 = vst.msk [vmem:[#allocation3 + $0x28] sm:$0xff] %vm776_vm4, %v1211_v51 }
 0x8d5   :  { %1861 = vst.msk [vmem:[#allocation3 + $0x28] sm:$0xff] %vm768_vm5, %v1859_v25 }
 0x8d7   :  { %v1429_v60 = vpop.permute.xlu0 %1428  ;;  %v2305_v52 = vld [vmem:[#allocation3 + $0x8] sm:$0xff] }
 0x8d8   :  { %1431 = vst.msk [vmem:[#allocation3 + $0x38] sm:$0xff] %vm776_vm4, %v1429_v60  ;;  %2439 = vmatmul.mubr.f32.gmra.mrb[34].mxu1 %v2305_v52  ;;  %5184 = vmatmul.mubr.f32.vlgmr.msra.gmra.mrb[32].mxu0 %v2305_v52 }
 0x8d9   :  { %1643 = vst.msk [vmem:[#allocation3 + $0x38] sm:$0xff] %vm768_vm5, %v1641_v50  ;;  %5186 = vmatprep.mubr.f32.mxu0 %v2306_v6  ;;  %2444 = vmatprep.mubr.f32.mxu1 %v7027_v11 }
 0x8da   :  { %5720 = vmatpush3.bf16.msra.mxu0 %v7400_v1 }
 0x8db   :  { %v1423_v59 = vpop.permute.xlu0 %1422  ;;  %5722 = vmatprep.subr.bf16.mxu0 %v7412_v56 }
 0x8dc   :  { %1425 = vst.msk [vmem:[#allocation3 + $0x48] sm:$0xff] %vm768_vm5, %v1423_v59  ;;  %2445 = vmatmul.mubr.f32.gmra.mrb[36].mxu1 %v2306_v6  ;;  %5187 = vmatmul.mubr.f32.gmra.mrb[34].mxu0 %v2307_v5  ;;  %v2309_v14 = vld [vmem:[#allocation3 + $0x28] sm:$0xff] }
 0x8dd   :  { %1649 = vst.msk [vmem:[#allocation3 + $0x48] sm:$0xff] %vm776_vm4, %v1647_v10  ;;  %5189 = vmatprep.mubr.f32.mxu0 %v2308_v0  ;;  %2450 = vmatprep.mubr.f32.mxu1 %v7027_v11 }
 0x8de   :  { %5724 = vmatpush3.bf16.msra.mxu0 %v7412_v56 }
 0x8df   :  { %v1205_v31 = vpop.permute.xlu0 %1204  ;;  %5726 = vmatprep.subr.bf16.mxu0 %v7425_v62 }
 0x8e0   :  { %1207 = vst.msk [vmem:[#allocation3 + $0x58] sm:$0xff] %vm768_vm5, %v1205_v31  ;;  %2451 = vmatmul.mubr.f32.gmra.mrb[38].mxu1 %v2307_v5  ;;  %5190 = vmatmul.mubr.f32.gmra.mrb[36].mxu0 %v2309_v14  ;;  %v2311_v29 = vld [vmem:[#allocation3 + $0x38] sm:$0xff]  ;;  %v7541_v31 = vld [vmem:[%s7882_s7] sm:$0xff] }
 0x8e1   :  { %1867 = vst.msk [vmem:[#allocation3 + $0x58] sm:$0xff] %vm776_vm4, %v1865_v27  ;;  %5192 = vmatprep.mubr.f32.mxu0 %v2310_v63  ;;  %2456 = vmatprep.mubr.f32.mxu1 %v7027_v11 }
 0x8e2   :  { %5728 = vmatpush3.bf16.msra.mxu0 %v7425_v62 }
 0x8e3   :  { %v987_v3 = vpop.permute.xlu0 %986  ;;  %5730 = vmatprep.subr.bf16.mxu0 %v7438_v13 }
 0x8e4   :  { %989 = vst.msk [vmem:[#allocation3 + $0x68] sm:$0xff] %vm768_vm5, %v987_v3  ;;  %2457 = vmatmul.mubr.f32.gmra.mrb[40].mxu1 %v2308_v0  ;;  %5193 = vmatmul.mubr.f32.gmra.mrb[38].mxu0 %v2311_v29  ;;  %v2313_v30 = vld [vmem:[#allocation3 + $0x48] sm:$0xff] }
 0x8e5   :  { %2085 = vst.msk [vmem:[#allocation3 + $0x68] sm:$0xff] %vm776_vm4, %v2083_v17  ;;  %5195 = vmatprep.mubr.f32.mxu0 %v2312_v61  ;;  %2462 = vmatprep.mubr.f32.mxu1 %v7027_v11  ;;  %v7547_v3 = vld [vmem:[%s7882_s7 + $0x8] sm:$0xff]  ;;  %v7552_v17 = vld [vmem:[%s7882_s7 + $0x18] sm:$0xff] }
 0x8e6   :  { %5732 = vmatpush3.bf16.msra.mxu0 %v7438_v13 }
 0x8e7   :  { %v766_v28 = vpop.permute.xlu0 %765  ;;  %5750 = vmatprep.subr.bf16.mxu0 %v7400_v1 }
 0x8e8   :  { %769 = vst.msk [vmem:[#allocation3 + $0x78] sm:$0xff] %vm768_vm5, %v766_v28  ;;  %2463 = vmatmul.mubr.f32.gmra.mrb[42].mxu1 %v2309_v14  ;;  %5196 = vmatmul.mubr.f32.gmra.mrb[40].mxu0 %v2313_v30  ;;  %v2315_v21 = vld [vmem:[#allocation3 + $0x58] sm:$0xff] }
 0x8e9   :  { %2303 = vst.msk [vmem:[#allocation3 + $0x78] sm:$0xff] %vm776_vm4, %v2301_v37  ;;  %5198 = vmatprep.mubr.f32.mxu0 %v2314_v18  ;;  %2468 = vmatprep.mubr.f32.mxu1 %v7027_v11  ;;  %v7558_v37 = vld [vmem:[%s7882_s7 + $0x20] sm:$0xff] }
 0x8ec   :  { %2469 = vmatmul.mubr.f32.gmra.mrb[44].mxu1 %v2310_v63  ;;  %5199 = vmatmul.mubr.f32.gmra.mrb[42].mxu0 %v2315_v21  ;;  %v2317_v9 = vld [vmem:[#allocation3 + $0x68] sm:$0xff] }
 0x8ed   :  { %5201 = vmatprep.mubr.f32.mxu0 %v2316_v38  ;;  %2474 = vmatprep.mubr.f32.mxu1 %v7027_v11 }
 0x8f0   :  { %2475 = vmatmul.mubr.f32.gmra.mrb[46].mxu1 %v2311_v29  ;;  %5202 = vmatmul.mubr.f32.gmra.mrb[44].mxu0 %v2317_v9  ;;  %v2319_v16 = vld [vmem:[#allocation3 + $0x78] sm:$0xff] }
 0x8f1   :  { %5204 = vmatprep.mubr.f32.mxu0 %v2318_v15  ;;  %2480 = vmatprep.mubr.f32.mxu1 %v7027_v11 }
 0x8f4   :  { %2481 = vmatmul.mubr.f32.gmra.mrb[48].mxu1 %v2312_v61  ;;  %5205 = vmatmul.mubr.f32.gmra.mrb[46].mxu0 %v2319_v16 }
 0x8f5   :  { %2486 = vmatprep.mubr.f32.mxu1 %v7027_v11  ;;  %5223 = vmatprep.mubr.f32.mxu0 %v7027_v11 }
 0x8f8   :  { %2487 = vmatmul.mubr.f32.gmra.mrb[50].mxu1 %v2313_v30  ;;  %5224 = vmatmul.mubr.f32.vlgmr.msra.gmra.mrb[48].mxu0 %v7027_v11 }
 0x8f9   :  { %2492 = vmatprep.mubr.f32.mxu1 %v7027_v11  ;;  %5752 = vmatpush3.bf16.msra.mxu0 %v7400_v1 }
 0x8fa   :  { %5754 = vmatprep.subr.bf16.mxu0 %v7412_v56 }
 0x8fc   :  { %2493 = vmatmul.mubr.f32.gmra.mrb[52].mxu1 %v2314_v18 }
 0x8fd   :  { %2498 = vmatprep.mubr.f32.mxu1 %v7027_v11  ;;  %5756 = vmatpush3.bf16.msra.mxu0 %v7412_v56 }
 0x8fe   :  { %5758 = vmatprep.subr.bf16.mxu0 %v7425_v62 }
 0x900   :  { %2499 = vmatmul.mubr.f32.gmra.mrb[54].mxu1 %v2315_v21 }
 0x901   :  { %2504 = vmatprep.mubr.f32.mxu1 %v7027_v11  ;;  %5760 = vmatpush3.bf16.msra.mxu0 %v7425_v62 }
 0x902   :  { %5762 = vmatprep.subr.bf16.mxu0 %v7438_v13 }
 0x904   :  { %2505 = vmatmul.mubr.f32.gmra.mrb[56].mxu1 %v2316_v38 }
 0x905   :  { %2510 = vmatprep.mubr.f32.mxu1 %v7027_v11  ;;  %5764 = vmatpush3.bf16.msra.mxu0 %v7438_v13 }
 0x906   :  { %5782 = vmatprep.subr.bf16.mxu0 %v7400_v1 }
 0x908   :  { %2511 = vmatmul.mubr.f32.gmra.mrb[58].mxu1 %v2317_v9 }
 0x909   :  { %2516 = vmatprep.mubr.f32.mxu1 %v7027_v11 }
 0x90c   :  { %2517 = vmatmul.mubr.f32.gmra.mrb[60].mxu1 %v2318_v15 }
 0x90d   :  { %2522 = vmatprep.mubr.f32.mxu1 %v7027_v11 }
 0x910   :  { %2523 = vmatmul.mubr.f32.gmra.mrb[62].mxu1 %v2319_v16 }
 0x911   :  { %2872 = vmatprep.mubr.f32.mxu1 %v7027_v11 }
 0x914   :  { %2873 = vmatmul.mubr.f32.vlgmr.msra.gmra.mrb[32].mxu1 %v7027_v11 }
 0x915   :  { %2878 = vmatprep.mubr.f32.mxu1 %v7027_v11  ;;  %5736 = vmatpush1.bf16.msra.mxu1 %v7333_v23 }
 0x916   :  { %5738 = vmatprep.subr.bf16.mxu1 %v7335_v33 }
 0x918   :  { %2879 = vmatmul.mubr.f32.gmra.mrb[34].mxu1 %v7027_v11 }
 0x919   :  { %5740 = vmatpush1.bf16.msra.mxu1 %v7346_v34  ;;  %3080 = vmatprep.mubr.f32.mxu1 %v7027_v11 }
 0x91a   :  { %5742 = vmatprep.subr.bf16.mxu1 %v7366_v47 }
 0x91d   :  { %5744 = vmatpush1.bf16.msra.mxu1 %v7371_v41 }
 0x91e   :  { %5746 = vmatprep.subr.bf16.mxu1 %v7384_v7 }
 0x921   :  { %5748 = vmatpush1.bf16.msra.mxu1 %v7389_v46 }
 0x922   :  { %5766 = vmatprep.subr.bf16.mxu1 %v7308_v53 }
 0x9ab   :  { %v7485_v8 = vpop.f32.mrb[32].mxu0 }
 0x9ac   :  { %v7487_v19 = vpop.f32.mrb[33].mxu0 }
 0x9af   :  { %v5188_v49 = vpop.f32.mrb[34].mxu0 }
 0x9b0   :  { %v7500_v54 = vadd.f32 %v5188_v49, %v7492_v12  ;;  %v2605_v26 = vpop.f32.mrb[35].mxu0 }
 0x9b1   :  { %v7503_v58 = vadd.f32 %v7497_v39, %v2605_v26 }
 0x9b3   :  { %v5191_v36 = vpop.f32.mrb[36].mxu0 }
 0x9b4   :  { %v7506_v42 = vadd.f32 %v5191_v36, %v7492_v12  ;;  %v2615_v20 = vpop.f32.mrb[37].mxu0 }
 0x9b5   :  { %v7509_v44 = vadd.f32 %v7497_v39, %v2615_v20 }
 0x9b7   :  { %v5194_v32 = vpop.f32.mrb[38].mxu0 }
 0x9b8   :  { %v7512_v45 = vadd.f32 %v5194_v32, %v7492_v12  ;;  %v2625_v35 = vpop.f32.mrb[39].mxu0 }
 0x9b9   :  { %v7515_v40 = vadd.f32 %v7497_v39, %v2625_v35  ;;  %v7565_v35 = vld [vmem:[%s7883_s8] sm:$0xff] }
 0x9bb   :  { %v5197_v4 = vpop.f32.mrb[40].mxu0 }
 0x9bc   :  { %v7518_v25 = vadd.f32 %v5197_v4, %v7492_v12  ;;  %v2635_v43 = vpop.f32.mrb[41].mxu0 }
 0x9bd   :  { %v7521_v50 = vadd.f32 %v7497_v39, %v2635_v43 }
 0x9bf   :  { %v5200_v51 = vpop.f32.mrb[42].mxu0 }
 0x9c0   :  { %v7524_v48 = vadd.f32 %v5200_v51, %v7492_v12  ;;  %v2645_v57 = vpop.f32.mrb[43].mxu0 }
 0x9c1   :  { %v7527_v60 = vadd.f32 %v7497_v39, %v2645_v57 }
 0x9c3   :  { %v5203_v52 = vpop.f32.mrb[44].mxu0 }
 0x9c4   :  { %v7530_v10 = vadd.f32 %v5203_v52, %v7492_v12  ;;  %v2655_v6 = vpop.f32.mrb[45].mxu0 }
 0x9c5   :  { %v7533_v2 = vadd.f32 %v7497_v39, %v2655_v6  ;;  %v7571_v6 = vld [vmem:[%s7883_s8 + $0x8] sm:$0xff] }
 0x9c7   :  { %v5206_v55 = vpop.f32.mrb[46].mxu0 }
 0x9c8   :  { %v2665_v59 = vpop.f32.mrb[47].mxu0  ;;  %v2682_v55 = vadd.f32 %v7497_v39, %v7487_v19 }
 0x9c9   :  { %v7536_v5 = vadd.f32 %v7497_v39, %v2665_v59 }
 0x9cb   :  { %v5225_v0 = vpop.f32.mrb[48].mxu0 }
 0x9cc   :  { %v2951_v22 = vpop.f32.mrb[49].mxu0 }
 0x9cd   :  { %v2988_v51 = vadd.f32 %v2951_v22, %v7565_v35  ;;  %v2685_v22 = vadd.f32 %v7485_v8, %v7492_v12 }
 0x9e3   :  { %v2524_v24 = vpop.f32.mrb[62].mxu1 }
 0x9e4   :  { %v2526_v27 = vpop.f32.mrb[63].mxu1  ;;  %v2989_v24 = vadd.f32 %v5225_v0, %v7571_v6 }
 0x9e7   :  { %v2874_v14 = vpop.f32.mrb[32].mxu1 }
 0x9e8   :  { %v6001_v63 = vadd.f32 %v2874_v14, %v7541_v31  ;;  %v2876_v29 = vpop.f32.mrb[33].mxu1 }
 0x9e9   :  { %v6002_v28 = vadd.f32 %v2876_v29, %v7547_v3 }
 0x9ea   :  { %v4693_v61 = vmul.f32 -1.442695, %v6001_v63 }
 0x9eb   :  { %v2880_v30 = vpop.f32.mrb[34].mxu1  ;;  %v4695_v15 = vmul.f32 -1.442695, %v6002_v28 }
 0x9ec   :  { %6258 = vpow2.f32 %v4693_v61  ;;  %v6003_v18 = vadd.f32 %v2880_v30, %v7552_v17  ;;  %v2882_v21 = vpop.f32.mrb[35].mxu1 }
 0x9ed   :  { %v6004_v9 = vadd.f32 %v2882_v21, %v7558_v37 }
 0x9ee   :  { %v4694_v38 = vmul.f32 -1.442695, %v6003_v18 }
 0x9ef   :  { %v4696_v16 = vmul.f32 -1.442695, %v6004_v9 }
 0x9f0   :  { %6260 = vpow2.f32 %v4694_v38 }
 0x9f1   :  { %6262 = vpow2.f32 %v4695_v15 }
 0x9f2   :  { %6264 = vpow2.f32 %v4696_v16 }
 0x9f6   :  { %v6259_v49 = vpop.eup %6258 }
 0x9f7   :  { %v2968_v26 = vadd.f32 1.0, %v6259_v49 }
 0x9f9   :  { %6266 = vrcp.f32 %v2968_v26 }
 0x9fa   :  { %v6261_v36 = vpop.eup %6260 }
 0x9fb   :  { %v2969_v20 = vadd.f32 1.0, %v6261_v36  ;;  %v6263_v32 = vpop.eup %6262 }
 0x9fc   :  { %v6265_v4 = vpop.eup %6264  ;;  %v2982_v43 = vadd.f32 1.0, %v6263_v32 }
 0x9fd   :  { %6268 = vrcp.f32 %v2969_v20  ;;  %v2983_v52 = vadd.f32 1.0, %v6265_v4 }
 0x9fe   :  { %6270 = vrcp.f32 %v2982_v43 }
 0x9ff   :  { %6272 = vrcp.f32 %v2983_v52 }
 0xa03   :  { %v6267_v57 = vpop.eup %6266 }
 0xa04   :  { %v2990_v59 = vmul.f32 %v6267_v57, %v2988_v51 }
 0xa06   :  { %v2992_v27 = vadd.f32 %v2990_v59, %v2682_v55 }
 0xa07   :  { %v6269_v14 = vpop.eup %6268 }
 0xa08   :  { %v2991_v63 = vmul.f32 %v6269_v14, %v2989_v24  ;;  %6274 = vtanh.f32 %v2992_v27  ;;  %v6271_v61 = vpop.eup %6270 }
 0xa09   :  { %v6273_v28 = vpop.eup %6272  ;;  %v2996_v30 = vsub.f32 1.0, %v6271_v61  ;;  %v3000_v21 = vmul.f32 0.0, %v6271_v61 }
 0xa0a   :  { %v2993_v29 = vadd.f32 %v2991_v63, %v2685_v22  ;;  %v2997_v38 = vsub.f32 1.0, %v6273_v28  ;;  %v3001_v12 = vmul.f32 0.0, %v6273_v28 }
 0xa0c   :  { %6276 = vtanh.f32 %v2993_v29 }
 0xa12   :  { %v6275_v18 = vpop.eup %6274 }
 0xa13   :  { %v2998_v19 = vmul.f32 %v6275_v18, %v2996_v30 }
 0xa15   :  { %v7578_v39 = vadd.f32 %v3000_v21, %v2998_v19 }
 0xa16   :  { %v6277_v0 = vpop.eup %6276 }
 0xa17   :  { %4697 = vmatmul.mubr.msk.f32.vlgmr.msra.gmra.mrb[36].mxu1 %vm562_vm1, %v7578_v39  ;;  %5242 = vmatprep.mubr.msk.f32.mxu0 %vm562_vm1, %v7578_v39  ;;  %v2999_v8 = vmul.f32 %v6277_v0, %v2997_v38 }
 0xa18   :  { %3086 = vmatprep.mubr.f32.mxu1 %v7027_v11  ;;  %5768 = vmatpush1.bf16.msra.mxu1 %v7333_v23 }
 0xa19   :  { %v7586_v9 = vadd.f32 %v3001_v12, %v2999_v8  ;;  %5770 = vmatprep.subr.bf16.mxu1 %v7335_v33 }
 0xa1b   :  { %4440 = vrot.lane.b32.xlu0 %v7586_v9, %s6420_s29  ;;  %4698 = vmatmul.mubr.msk.f32.gmra.mrb[38].mxu1 %vm562_vm1, %v7586_v9 }
 0xa1c   :  { %5243 = vmatmul.mubr.msk.f32.vlgmr.msra.gmra.mrb[50].mxu0 %vm562_vm1, %v7586_v9  ;;  %5772 = vmatpush1.bf16.msra.mxu1 %v7346_v34 }
 0xa1d   :  { %5784 = vmatpush3.bf16.msra.mxu0 %v7400_v1  ;;  %5774 = vmatprep.subr.bf16.mxu1 %v7366_v47 }
 0xa1e   :  { %5786 = vmatprep.subr.bf16.mxu0 %v7412_v56  ;;  %3288 = vmatprep.mubr.f32.mxu1 %v7027_v11 }
 0xa20   :  { %5776 = vmatpush1.bf16.msra.mxu1 %v7371_v41 }
 0xa21   :  { %5788 = vmatpush3.bf16.msra.mxu0 %v7412_v56  ;;  %5778 = vmatprep.subr.bf16.mxu1 %v7384_v7 }
 0xa22   :  { %5790 = vmatprep.subr.bf16.mxu0 %v7425_v62 }
 0xa24   :  { %5780 = vmatpush1.bf16.msra.mxu1 %v7389_v46 }
 0xa25   :  { %5792 = vmatpush3.bf16.msra.mxu0 %v7425_v62  ;;  %5798 = vmatprep.subr.bf16.mxu1 %v7308_v53 }
 0xa26   :  { %5794 = vmatprep.subr.bf16.mxu0 %v7438_v13 }
 0xa29   :  { %5796 = vmatpush3.bf16.msra.mxu0 %v7438_v13 }
 0xa2a   :  { %5814 = vmatprep.subr.bf16.mxu0 %v7400_v1 }
 0xaea   :  { %v3082_v15 = vpop.f32.mrb[36].mxu1 }
 0xaeb   :  { %v6005_v16 = vadd.f32 %v3082_v15, %v7541_v31  ;;  %v3084_v49 = vpop.f32.mrb[37].mxu1 }
 0xaec   :  { %v6006_v36 = vadd.f32 %v3084_v49, %v7547_v3 }
 0xaed   :  { %v4701_v26 = vmul.f32 -1.442695, %v6005_v16 }
 0xaee   :  { %v3088_v20 = vpop.f32.mrb[38].mxu1  ;;  %v4703_v55 = vmul.f32 -1.442695, %v6006_v36 }
 0xaef   :  { %6278 = vpow2.f32 %v4701_v26  ;;  %v6007_v32 = vadd.f32 %v3088_v20, %v7552_v17  ;;  %v5244_v4 = vpop.f32.mrb[50].mxu0  ;;  %v3090_v43 = vpop.f32.mrb[39].mxu1 }
 0xaf0   :  { %v3159_v51 = vpop.f32.mrb[51].mxu0  ;;  %v6008_v52 = vadd.f32 %v3090_v43, %v7558_v37  ;;  %v3197_v19 = vadd.f32 %v5244_v4, %v7571_v6 }
 0xaf1   :  { %v4702_v57 = vmul.f32 -1.442695, %v6007_v32  ;;  %v3196_v28 = vadd.f32 %v3159_v51, %v7565_v35 }
 0xaf2   :  { %v4704_v59 = vmul.f32 -1.442695, %v6008_v52 }
 0xaf3   :  { %6280 = vpow2.f32 %v4702_v57 }
 0xaf4   :  { %6282 = vpow2.f32 %v4703_v55 }
 0xaf5   :  { %6284 = vpow2.f32 %v4704_v59 }
 0xaf9   :  { %v6279_v24 = vpop.eup %6278 }
 0xafa   :  { %v3176_v27 = vadd.f32 1.0, %v6279_v24 }
 0xafc   :  { %6286 = vrcp.f32 %v3176_v27 }
 0xafd   :  { %v6281_v14 = vpop.eup %6280 }
 0xafe   :  { %v3177_v22 = vadd.f32 1.0, %v6281_v14  ;;  %v6283_v63 = vpop.eup %6282 }
 0xaff   :  { %v6285_v29 = vpop.eup %6284  ;;  %v3190_v61 = vadd.f32 1.0, %v6283_v63 }
 0xb00   :  { %6288 = vrcp.f32 %v3177_v22  ;;  %v3191_v18 = vadd.f32 1.0, %v6285_v29 }
 0xb01   :  { %6290 = vrcp.f32 %v3190_v61 }
 0xb02   :  { %6292 = vrcp.f32 %v3191_v18 }
 0xb06   :  { %v6287_v30 = vpop.eup %6286 }
 0xb07   :  { %v3198_v21 = vmul.f32 %v6287_v30, %v3196_v28 }
 0xb09   :  { %v3200_v38 = vadd.f32 %v3198_v21, %v7503_v58 }
 0xb0a   :  { %v6289_v0 = vpop.eup %6288 }
 0xb0b   :  { %v3199_v8 = vmul.f32 %v6289_v0, %v3197_v19  ;;  %6294 = vtanh.f32 %v3200_v38  ;;  %v6291_v15 = vpop.eup %6290 }
 0xb0c   :  { %v6293_v16 = vpop.eup %6292  ;;  %v3204_v49 = vsub.f32 1.0, %v6291_v15  ;;  %v3208_v36 = vmul.f32 %v6291_v15, %v7578_v39 }
 0xb0d   :  { %v3201_v12 = vadd.f32 %v3199_v8, %v7500_v54  ;;  %v3205_v43 = vsub.f32 1.0, %v6293_v16  ;;  %v3209_v54 = vmul.f32 %v6293_v16, %v7586_v9 }
 0xb0f   :  { %6296 = vtanh.f32 %v3201_v12 }
 0xb15   :  { %v6295_v26 = vpop.eup %6294 }
 0xb16   :  { %v3206_v20 = vmul.f32 %v6295_v26, %v3204_v49 }
 0xb18   :  { %v7618_v32 = vadd.f32 %v3208_v36, %v3206_v20 }
 0xb19   :  { %v6297_v4 = vpop.eup %6296 }
 0xb1a   :  { %4705 = vmatmul.mubr.msk.f32.vlgmr.msra.gmra.mrb[40].mxu1 %vm562_vm1, %v7618_v32  ;;  %5261 = vmatprep.mubr.msk.f32.mxu0 %vm562_vm1, %v7618_v32  ;;  %v3207_v58 = vmul.f32 %v6297_v4, %v3205_v43 }
 0xb1b   :  { %3294 = vmatprep.mubr.f32.mxu1 %v7027_v11  ;;  %5800 = vmatpush1.bf16.msra.mxu1 %v7333_v23 }
 0xb1c   :  { %v7627_v51 = vadd.f32 %v3209_v54, %v3207_v58  ;;  %5802 = vmatprep.subr.bf16.mxu1 %v7335_v33 }
 0xb1e   :  { %4706 = vmatmul.mubr.msk.f32.gmra.mrb[42].mxu1 %vm562_vm1, %v7627_v51  ;;  %5262 = vmatmul.mubr.msk.f32.vlgmr.msra.gmra.mrb[52].mxu0 %vm562_vm1, %v7627_v51 }
 0xb1f   :  { %5804 = vmatpush1.bf16.msra.mxu1 %v7346_v34  ;;  %5816 = vmatpush3.bf16.msra.mxu0 %v7400_v1 }
 0xb20   :  { %5806 = vmatprep.subr.bf16.mxu1 %v7366_v47  ;;  %5818 = vmatprep.subr.bf16.mxu0 %v7412_v56 }
 0xb21   :  { %3496 = vmatprep.mubr.f32.mxu1 %v7027_v11 }
 0xb23   :  { %5808 = vmatpush1.bf16.msra.mxu1 %v7371_v41  ;;  %5820 = vmatpush3.bf16.msra.mxu0 %v7412_v56 }
 0xb24   :  { %5810 = vmatprep.subr.bf16.mxu1 %v7384_v7  ;;  %5822 = vmatprep.subr.bf16.mxu0 %v7425_v62 }
 0xb27   :  { %5812 = vmatpush1.bf16.msra.mxu1 %v7389_v46  ;;  %5824 = vmatpush3.bf16.msra.mxu0 %v7425_v62 }
 0xb28   :  { %5826 = vmatprep.subr.bf16.mxu0 %v7438_v13  ;;  %5830 = vmatprep.subr.bf16.mxu1 %v7308_v53 }
 0xb2b   :  { %5828 = vmatpush3.bf16.msra.mxu0 %v7438_v13 }
 0xb2c   :  { %5846 = vmatprep.subr.bf16.mxu0 %v7400_v1 }
 0xbed   :  { %v3290_v39 = vpop.f32.mrb[40].mxu1 }
 0xbee   :  { %v6009_v9 = vadd.f32 %v3290_v39, %v7541_v31  ;;  %v3292_v57 = vpop.f32.mrb[41].mxu1 }
 0xbef   :  { %v6010_v55 = vadd.f32 %v3292_v57, %v7547_v3 }
 0xbf0   :  { %v4709_v52 = vmul.f32 -1.442695, %v6009_v9 }
 0xbf1   :  { %v3296_v59 = vpop.f32.mrb[42].mxu1  ;;  %v5263_v24 = vpop.f32.mrb[52].mxu0  ;;  %v4711_v61 = vmul.f32 -1.442695, %v6010_v55 }
 0xbf2   :  { %6298 = vpow2.f32 %v4709_v52  ;;  %v6011_v27 = vadd.f32 %v3296_v59, %v7552_v17  ;;  %v3298_v14 = vpop.f32.mrb[43].mxu1  ;;  %v3367_v22 = vpop.f32.mrb[53].mxu0  ;;  %v3405_v26 = vadd.f32 %v5263_v24, %v7571_v6 }
 0xbf3   :  { %v6012_v29 = vadd.f32 %v3298_v14, %v7558_v37  ;;  %v3404_v12 = vadd.f32 %v3367_v22, %v7565_v35 }
 0xbf4   :  { %v4710_v63 = vmul.f32 -1.442695, %v6011_v27 }
 0xbf5   :  { %v4712_v28 = vmul.f32 -1.442695, %v6012_v29 }
 0xbf6   :  { %6300 = vpow2.f32 %v4710_v63 }
 0xbf7   :  { %6302 = vpow2.f32 %v4711_v61 }
 0xbf8   :  { %6304 = vpow2.f32 %v4712_v28 }
 0xbfc   :  { %v6299_v30 = vpop.eup %6298 }
 0xbfd   :  { %v3384_v18 = vadd.f32 1.0, %v6299_v30 }
 0xbff   :  { %6306 = vrcp.f32 %v3384_v18 }
 0xc00   :  { %v6301_v21 = vpop.eup %6300 }
 0xc01   :  { %v3385_v19 = vadd.f32 1.0, %v6301_v21  ;;  %v6303_v38 = vpop.eup %6302 }
 0xc02   :  { %v6305_v0 = vpop.eup %6304  ;;  %v3398_v8 = vadd.f32 1.0, %v6303_v38 }
 0xc03   :  { %6308 = vrcp.f32 %v3385_v19  ;;  %v3399_v16 = vadd.f32 1.0, %v6305_v0 }
 0xc04   :  { %6310 = vrcp.f32 %v3398_v8 }
 0xc05   :  { %6312 = vrcp.f32 %v3399_v16 }
 0xc09   :  { %v6307_v15 = vpop.eup %6306 }
 0xc0a   :  { %v3406_v49 = vmul.f32 %v6307_v15, %v3404_v12 }
 0xc0c   :  { %v3408_v36 = vadd.f32 %v3406_v49, %v7509_v44 }
 0xc0d   :  { %v6309_v20 = vpop.eup %6308 }
 0xc0e   :  { %v3407_v43 = vmul.f32 %v6309_v20, %v3405_v26  ;;  %6314 = vtanh.f32 %v3408_v36  ;;  %v6311_v58 = vpop.eup %6310 }
 0xc0f   :  { %v6313_v54 = vpop.eup %6312  ;;  %v3412_v39 = vsub.f32 1.0, %v6311_v58  ;;  %v3416_v57 = vmul.f32 %v6311_v58, %v7618_v32 }
 0xc10   :  { %v3409_v4 = vadd.f32 %v3407_v43, %v7506_v42  ;;  %v3413_v59 = vsub.f32 1.0, %v6313_v54  ;;  %v3417_v42 = vmul.f32 %v6313_v54, %v7627_v51 }
 0xc12   :  { %6316 = vtanh.f32 %v3409_v4 }
 0xc18   :  { %v6315_v9 = vpop.eup %6314 }
 0xc19   :  { %v3414_v52 = vmul.f32 %v6315_v9, %v3412_v39 }
 0xc1b   :  { %v7658_v55 = vadd.f32 %v3416_v57, %v3414_v52 }
 0xc1c   :  { %v6317_v24 = vpop.eup %6316 }
 0xc1d   :  { %4713 = vmatmul.mubr.msk.f32.vlgmr.msra.gmra.mrb[44].mxu1 %vm562_vm1, %v7658_v55  ;;  %5280 = vmatprep.mubr.msk.f32.mxu0 %vm562_vm1, %v7658_v55  ;;  %v3415_v44 = vmul.f32 %v6317_v24, %v3413_v59 }
 0xc1e   :  { %3502 = vmatprep.mubr.f32.mxu1 %v7027_v11  ;;  %5832 = vmatpush1.bf16.msra.mxu1 %v7333_v23 }
 0xc1f   :  { %v7667_v27 = vadd.f32 %v3417_v42, %v3415_v44  ;;  %5834 = vmatprep.subr.bf16.mxu1 %v7335_v33 }
 0xc21   :  { %4714 = vmatmul.mubr.msk.f32.gmra.mrb[46].mxu1 %vm562_vm1, %v7667_v27  ;;  %5281 = vmatmul.mubr.msk.f32.vlgmr.msra.gmra.mrb[54].mxu0 %vm562_vm1, %v7667_v27 }
 0xc22   :  { %5836 = vmatpush1.bf16.msra.mxu1 %v7346_v34  ;;  %5848 = vmatpush3.bf16.msra.mxu0 %v7400_v1 }
 0xc23   :  { %5838 = vmatprep.subr.bf16.mxu1 %v7366_v47  ;;  %5850 = vmatprep.subr.bf16.mxu0 %v7412_v56 }
 0xc24   :  { %3704 = vmatprep.mubr.f32.mxu1 %v7027_v11 }
 0xc26   :  { %5840 = vmatpush1.bf16.msra.mxu1 %v7371_v41  ;;  %5852 = vmatpush3.bf16.msra.mxu0 %v7412_v56 }
 0xc27   :  { %5842 = vmatprep.subr.bf16.mxu1 %v7384_v7  ;;  %5854 = vmatprep.subr.bf16.mxu0 %v7425_v62 }
 0xc2a   :  { %5844 = vmatpush1.bf16.msra.mxu1 %v7389_v46  ;;  %5856 = vmatpush3.bf16.msra.mxu0 %v7425_v62 }
 0xc2b   :  { %5858 = vmatprep.subr.bf16.mxu0 %v7438_v13  ;;  %5862 = vmatprep.subr.bf16.mxu1 %v7308_v53 }
 0xc2e   :  { %5860 = vmatpush3.bf16.msra.mxu0 %v7438_v13 }
 0xc2f   :  { %5878 = vmatprep.subr.bf16.mxu0 %v7400_v1 }
 0xcf0   :  { %v3498_v32 = vpop.f32.mrb[44].mxu1 }
 0xcf1   :  { %v6013_v51 = vadd.f32 %v3498_v32, %v7541_v31  ;;  %v3500_v14 = vpop.f32.mrb[45].mxu1 }
 0xcf2   :  { %v6014_v63 = vadd.f32 %v3500_v14, %v7547_v3 }
 0xcf3   :  { %v4717_v22 = vmul.f32 -1.442695, %v6013_v51 }
 0xcf4   :  { %v3504_v29 = vpop.f32.mrb[46].mxu1  ;;  %v5282_v61 = vpop.f32.mrb[54].mxu0  ;;  %v4719_v38 = vmul.f32 -1.442695, %v6014_v63 }
 0xcf5   :  { %6318 = vpow2.f32 %v4717_v22  ;;  %v6015_v28 = vadd.f32 %v3504_v29, %v7552_v17  ;;  %v3506_v30 = vpop.f32.mrb[47].mxu1  ;;  %v3575_v18 = vpop.f32.mrb[55].mxu0  ;;  %v3613_v54 = vadd.f32 %v5282_v61, %v7571_v6 }
 0xcf6   :  { %v6016_v19 = vadd.f32 %v3506_v30, %v7558_v37  ;;  %v3612_v20 = vadd.f32 %v3575_v18, %v7565_v35 }
 0xcf7   :  { %v4718_v21 = vmul.f32 -1.442695, %v6015_v28 }
 0xcf8   :  { %v4720_v0 = vmul.f32 -1.442695, %v6016_v19 }
 0xcf9   :  { %6320 = vpow2.f32 %v4718_v21 }
 0xcfa   :  { %6322 = vpow2.f32 %v4719_v38 }
 0xcfb   :  { %6324 = vpow2.f32 %v4720_v0 }
 0xcff   :  { %v6319_v8 = vpop.eup %6318 }
 0xd00   :  { %v3592_v12 = vadd.f32 1.0, %v6319_v8 }
 0xd02   :  { %6326 = vrcp.f32 %v3592_v12 }
 0xd03   :  { %v6321_v15 = vpop.eup %6320 }
 0xd04   :  { %v3593_v16 = vadd.f32 1.0, %v6321_v15  ;;  %v6323_v49 = vpop.eup %6322 }
 0xd05   :  { %v6325_v26 = vpop.eup %6324  ;;  %v3606_v36 = vadd.f32 1.0, %v6323_v49 }
 0xd06   :  { %6328 = vrcp.f32 %v3593_v16  ;;  %v3607_v4 = vadd.f32 1.0, %v6325_v26 }
 0xd07   :  { %6330 = vrcp.f32 %v3606_v36 }
 0xd08   :  { %6332 = vrcp.f32 %v3607_v4 }
 0xd0c   :  { %v6327_v43 = vpop.eup %6326 }
 0xd0d   :  { %v3614_v58 = vmul.f32 %v6327_v43, %v3612_v20 }
 0xd0f   :  { %v3616_v39 = vadd.f32 %v3614_v58, %v7515_v40 }
 0xd10   :  { %v6329_v9 = vpop.eup %6328 }
 0xd11   :  { %v3615_v57 = vmul.f32 %v6329_v9, %v3613_v54  ;;  %6334 = vtanh.f32 %v3616_v39  ;;  %v6331_v59 = vpop.eup %6330 }
 0xd12   :  { %v6333_v24 = vpop.eup %6332  ;;  %v3620_v44 = vsub.f32 1.0, %v6331_v59  ;;  %v3624_v32 = vmul.f32 %v6331_v59, %v7658_v55 }
 0xd13   :  { %v3617_v52 = vadd.f32 %v3615_v57, %v7512_v45  ;;  %v3621_v22 = vsub.f32 1.0, %v6333_v24  ;;  %v3625_v45 = vmul.f32 %v6333_v24, %v7667_v27 }
 0xd15   :  { %6336 = vtanh.f32 %v3617_v52 }
 0xd1b   :  { %v6335_v42 = vpop.eup %6334 }
 0xd1c   :  { %v3622_v51 = vmul.f32 %v6335_v42, %v3620_v44 }
 0xd1e   :  { %v7698_v14 = vadd.f32 %v3624_v32, %v3622_v51 }
 0xd1f   :  { %v6337_v63 = vpop.eup %6336 }
 0xd20   :  { %4721 = vmatmul.mubr.msk.f32.vlgmr.msra.gmra.mrb[48].mxu1 %vm562_vm1, %v7698_v14  ;;  %5299 = vmatprep.mubr.msk.f32.mxu0 %vm562_vm1, %v7698_v14  ;;  %v3623_v40 = vmul.f32 %v6337_v63, %v3621_v22 }
 0xd21   :  { %3710 = vmatprep.mubr.f32.mxu1 %v7027_v11  ;;  %5864 = vmatpush1.bf16.msra.mxu1 %v7333_v23 }
 0xd22   :  { %v7707_v29 = vadd.f32 %v3625_v45, %v3623_v40  ;;  %5866 = vmatprep.subr.bf16.mxu1 %v7335_v33 }
 0xd24   :  { %4722 = vmatmul.mubr.msk.f32.gmra.mrb[50].mxu1 %vm562_vm1, %v7707_v29  ;;  %5300 = vmatmul.mubr.msk.f32.vlgmr.msra.gmra.mrb[56].mxu0 %vm562_vm1, %v7707_v29 }
 0xd25   :  { %5868 = vmatpush1.bf16.msra.mxu1 %v7346_v34  ;;  %5880 = vmatpush3.bf16.msra.mxu0 %v7400_v1 }
 0xd26   :  { %5870 = vmatprep.subr.bf16.mxu1 %v7366_v47  ;;  %5882 = vmatprep.subr.bf16.mxu0 %v7412_v56 }
 0xd27   :  { %3912 = vmatprep.mubr.f32.mxu1 %v7027_v11 }
 0xd29   :  { %5872 = vmatpush1.bf16.msra.mxu1 %v7371_v41  ;;  %5884 = vmatpush3.bf16.msra.mxu0 %v7412_v56 }
 0xd2a   :  { %5874 = vmatprep.subr.bf16.mxu1 %v7384_v7  ;;  %5886 = vmatprep.subr.bf16.mxu0 %v7425_v62 }
 0xd2d   :  { %5876 = vmatpush1.bf16.msra.mxu1 %v7389_v46  ;;  %5888 = vmatpush3.bf16.msra.mxu0 %v7425_v62 }
 0xd2e   :  { %5890 = vmatprep.subr.bf16.mxu0 %v7438_v13  ;;  %5894 = vmatprep.subr.bf16.mxu1 %v7308_v53 }
 0xd31   :  { %5892 = vmatpush3.bf16.msra.mxu0 %v7438_v13 }
 0xd32   :  { %5910 = vmatprep.subr.bf16.mxu0 %v7400_v1 }
 0xdf3   :  { %v3706_v55 = vpop.f32.mrb[48].mxu1 }
 0xdf4   :  { %v6017_v27 = vadd.f32 %v3706_v55, %v7541_v31  ;;  %v3708_v61 = vpop.f32.mrb[49].mxu1 }
 0xdf5   :  { %v6018_v30 = vadd.f32 %v3708_v61, %v7547_v3 }
 0xdf6   :  { %v4725_v28 = vmul.f32 -1.442695, %v6017_v27 }
 0xdf7   :  { %v3712_v18 = vpop.f32.mrb[50].mxu1  ;;  %v5301_v21 = vpop.f32.mrb[56].mxu0  ;;  %v4727_v15 = vmul.f32 -1.442695, %v6018_v30 }
 0xdf8   :  { %6338 = vpow2.f32 %v4725_v28  ;;  %v6019_v19 = vadd.f32 %v3712_v18, %v7552_v17  ;;  %v3714_v38 = vpop.f32.mrb[51].mxu1  ;;  %v3783_v0 = vpop.f32.mrb[57].mxu0  ;;  %v3821_v52 = vadd.f32 %v5301_v21, %v7571_v6 }
 0xdf9   :  { %v6020_v12 = vadd.f32 %v3714_v38, %v7558_v37  ;;  %v3820_v54 = vadd.f32 %v3783_v0, %v7565_v35 }
 0xdfa   :  { %v4726_v8 = vmul.f32 -1.442695, %v6019_v19 }
 0xdfb   :  { %v4728_v16 = vmul.f32 -1.442695, %v6020_v12 }
 0xdfc   :  { %6340 = vpow2.f32 %v4726_v8 }
 0xdfd   :  { %6342 = vpow2.f32 %v4727_v15 }
 0xdfe   :  { %6344 = vpow2.f32 %v4728_v16 }
 0xe02   :  { %v6339_v49 = vpop.eup %6338 }
 0xe03   :  { %v3800_v26 = vadd.f32 1.0, %v6339_v49 }
 0xe05   :  { %6346 = vrcp.f32 %v3800_v26 }
 0xe06   :  { %v6341_v36 = vpop.eup %6340 }
 0xe07   :  { %v3801_v20 = vadd.f32 1.0, %v6341_v36  ;;  %v6343_v43 = vpop.eup %6342 }
 0xe08   :  { %v6345_v4 = vpop.eup %6344  ;;  %v3814_v58 = vadd.f32 1.0, %v6343_v43 }
 0xe09   :  { %6348 = vrcp.f32 %v3801_v20  ;;  %v3815_v9 = vadd.f32 1.0, %v6345_v4 }
 0xe0a   :  { %6350 = vrcp.f32 %v3814_v58 }
 0xe0b   :  { %6352 = vrcp.f32 %v3815_v9 }
 0xe0f   :  { %v6347_v39 = vpop.eup %6346 }
 0xe10   :  { %v3822_v57 = vmul.f32 %v6347_v39, %v3820_v54 }
 0xe12   :  { %v3824_v59 = vadd.f32 %v3822_v57, %v7521_v50 }
 0xe13   :  { %v6349_v24 = vpop.eup %6348 }
 0xe14   :  { %v3823_v44 = vmul.f32 %v6349_v24, %v3821_v52  ;;  %6354 = vtanh.f32 %v3824_v59  ;;  %v6351_v32 = vpop.eup %6350 }
 0xe15   :  { %v6353_v51 = vpop.eup %6352  ;;  %v3828_v22 = vsub.f32 1.0, %v6351_v32  ;;  %v3832_v40 = vmul.f32 %v6351_v32, %v7698_v14 }
 0xe16   :  { %v3825_v42 = vadd.f32 %v3823_v44, %v7518_v25  ;;  %v3829_v27 = vsub.f32 1.0, %v6353_v51  ;;  %v3833_v25 = vmul.f32 %v6353_v51, %v7707_v29 }
 0xe18   :  { %6356 = vtanh.f32 %v3825_v42 }
 0xe1e   :  { %v6355_v63 = vpop.eup %6354 }
 0xe1f   :  { %v3830_v45 = vmul.f32 %v6355_v63, %v3828_v22 }
 0xe21   :  { %v7738_v55 = vadd.f32 %v3832_v40, %v3830_v45 }
 0xe22   :  { %v6357_v61 = vpop.eup %6356 }
 0xe23   :  { %4729 = vmatmul.mubr.msk.f32.vlgmr.msra.gmra.mrb[52].mxu1 %vm562_vm1, %v7738_v55  ;;  %5318 = vmatprep.mubr.msk.f32.mxu0 %vm562_vm1, %v7738_v55  ;;  %v3831_v50 = vmul.f32 %v6357_v61, %v3829_v27 }
 0xe24   :  { %3918 = vmatprep.mubr.f32.mxu1 %v7027_v11  ;;  %5896 = vmatpush1.bf16.msra.mxu1 %v7333_v23 }
 0xe25   :  { %v7747_v28 = vadd.f32 %v3833_v25, %v3831_v50  ;;  %5898 = vmatprep.subr.bf16.mxu1 %v7335_v33 }
 0xe27   :  { %4730 = vmatmul.mubr.msk.f32.gmra.mrb[54].mxu1 %vm562_vm1, %v7747_v28  ;;  %5319 = vmatmul.mubr.msk.f32.vlgmr.msra.gmra.mrb[58].mxu0 %vm562_vm1, %v7747_v28 }
 0xe28   :  { %5900 = vmatpush1.bf16.msra.mxu1 %v7346_v34  ;;  %5912 = vmatpush3.bf16.msra.mxu0 %v7400_v1 }
 0xe29   :  { %5902 = vmatprep.subr.bf16.mxu1 %v7366_v47  ;;  %5914 = vmatprep.subr.bf16.mxu0 %v7412_v56 }
 0xe2a   :  { %4120 = vmatprep.mubr.f32.mxu1 %v7027_v11 }
 0xe2c   :  { %5904 = vmatpush1.bf16.msra.mxu1 %v7371_v41  ;;  %5916 = vmatpush3.bf16.msra.mxu0 %v7412_v56 }
 0xe2d   :  { %5906 = vmatprep.subr.bf16.mxu1 %v7384_v7  ;;  %5918 = vmatprep.subr.bf16.mxu0 %v7425_v62 }
 0xe30   :  { %5908 = vmatpush1.bf16.msra.mxu1 %v7389_v46  ;;  %5920 = vmatpush3.bf16.msra.mxu0 %v7425_v62 }
 0xe31   :  { %5922 = vmatprep.subr.bf16.mxu0 %v7438_v13  ;;  %5926 = vmatprep.subr.bf16.mxu1 %v7308_v53 }
 0xe34   :  { %5924 = vmatpush3.bf16.msra.mxu0 %v7438_v13 }
 0xe35   :  { %5942 = vmatprep.subr.bf16.mxu0 %v7400_v1 }
 0xef6   :  { %v3914_v14 = vpop.f32.mrb[52].mxu1 }
 0xef7   :  { %v6021_v29 = vadd.f32 %v3914_v14, %v7541_v31  ;;  %v3916_v30 = vpop.f32.mrb[53].mxu1 }
 0xef8   :  { %v6022_v21 = vadd.f32 %v3916_v30, %v7547_v3 }
 0xef9   :  { %v4733_v18 = vmul.f32 -1.442695, %v6021_v29 }
 0xefa   :  { %v3920_v19 = vpop.f32.mrb[54].mxu1  ;;  %v5320_v38 = vpop.f32.mrb[58].mxu0  ;;  %v4735_v16 = vmul.f32 -1.442695, %v6022_v21 }
 0xefb   :  { %6358 = vpow2.f32 %v4733_v18  ;;  %v6023_v0 = vadd.f32 %v3920_v19, %v7552_v17  ;;  %v3922_v8 = vpop.f32.mrb[55].mxu1  ;;  %v3991_v12 = vpop.f32.mrb[59].mxu0  ;;  %v4029_v59 = vadd.f32 %v5320_v38, %v7571_v6 }
 0xefc   :  { %v6024_v53 = vadd.f32 %v3922_v8, %v7558_v37  ;;  %v4028_v39 = vadd.f32 %v3991_v12, %v7565_v35 }
 0xefd   :  { %v4734_v15 = vmul.f32 -1.442695, %v6023_v0 }
 0xefe   :  { %v4736_v49 = vmul.f32 -1.442695, %v6024_v53 }
 0xeff   :  { %6360 = vpow2.f32 %v4734_v15 }
 0xf00   :  { %6362 = vpow2.f32 %v4735_v16 }
 0xf01   :  { %6364 = vpow2.f32 %v4736_v49 }
 0xf05   :  { %v6359_v26 = vpop.eup %6358 }
 0xf06   :  { %v4008_v36 = vadd.f32 1.0, %v6359_v26 }
 0xf08   :  { %6366 = vrcp.f32 %v4008_v36 }
 0xf09   :  { %v6361_v20 = vpop.eup %6360 }
 0xf0a   :  { %v4009_v43 = vadd.f32 1.0, %v6361_v20  ;;  %v6363_v4 = vpop.eup %6362 }
 0xf0b   :  { %v6365_v58 = vpop.eup %6364  ;;  %v4022_v54 = vadd.f32 1.0, %v6363_v4 }
 0xf0c   :  { %6368 = vrcp.f32 %v4009_v43  ;;  %v4023_v57 = vadd.f32 1.0, %v6365_v58 }
 0xf0d   :  { %6370 = vrcp.f32 %v4022_v54 }
 0xf0e   :  { %6372 = vrcp.f32 %v4023_v57 }
 0xf12   :  { %v6367_v9 = vpop.eup %6366 }
 0xf13   :  { %v4030_v52 = vmul.f32 %v6367_v9, %v4028_v39 }
 0xf15   :  { %v4032_v24 = vadd.f32 %v4030_v52, %v7527_v60 }
 0xf16   :  { %v6369_v44 = vpop.eup %6368 }
 0xf17   :  { %v4031_v42 = vmul.f32 %v6369_v44, %v4029_v59  ;;  %6374 = vtanh.f32 %v4032_v24  ;;  %v6371_v51 = vpop.eup %6370  ;;  %v4438_v24 = vld [vmem:[%s7884_s9 + $0x30] sm:$0xff]  ;;  %v4439_v44 = vld [vmem:[%s7884_s9 + $0x38] sm:$0xff] }
 0xf18   :  { %v6373_v22 = vpop.eup %6372  ;;  %v4036_v63 = vsub.f32 1.0, %v6371_v51  ;;  %v4040_v45 = vmul.f32 %v6371_v51, %v7738_v55  ;;  %v4432_v51 = vld [vmem:[%s7884_s9] sm:$0xff] }
 0xf19   :  { %v4033_v32 = vadd.f32 %v4031_v42, %v7524_v48  ;;  %v4037_v50 = vsub.f32 1.0, %v6373_v22  ;;  %v4041_v48 = vmul.f32 %v6373_v22, %v7747_v28  ;;  %v5961_v42 = vpack.c.bf16 %v4439_v44, %v4438_v24  ;;  %v4433_v22 = vld [vmem:[%s7884_s9 + $0x8] sm:$0xff] }
 0xf1b   :  { %6376 = vtanh.f32 %v4033_v32  ;;  %v4441_v32 = vpop.permute.xlu0 %4440 }
 0xf21   :  { %v6375_v40 = vpop.eup %6374 }
 0xf22   :  { %v4038_v27 = vmul.f32 %v6375_v40, %v4036_v63  ;;  %v5964_v63 = vpack.c.bf16 %v4433_v22, %v4432_v51  ;;  %v4435_v40 = vld [vmem:[%s7884_s9 + $0x18] sm:$0xff] }
 0xf24   :  { %v7778_v61 = vadd.f32 %v4040_v45, %v4038_v27 }
 0xf25   :  { %v6377_v25 = vpop.eup %6376 }
 0xf26   :  { %4737 = vmatmul.mubr.msk.f32.vlgmr.msra.gmra.mrb[56].mxu1 %vm562_vm1, %v7778_v61  ;;  %5337 = vmatprep.mubr.msk.f32.mxu0 %vm562_vm1, %v7778_v61  ;;  %v4039_v60 = vmul.f32 %v6377_v25, %v4037_v50 }
 0xf27   :  { %4126 = vmatprep.mubr.f32.mxu1 %v7027_v11  ;;  %5928 = vmatpush1.bf16.msra.mxu1 %v7333_v23  ;;  %v6421_v23 = vmov 0.0|0.0  }
 0xf28   :  { %v7787_v14 = vadd.f32 %v4041_v48, %v4039_v60  ;;  %5930 = vmatprep.subr.bf16.mxu1 %v7335_v33  ;;  %v6416_v48 = vld [vmem:[%s7882_s7 + $0x8] sm:$0xff] }
 0xf2a   :  { %4738 = vmatmul.mubr.msk.f32.gmra.mrb[58].mxu1 %vm562_vm1, %v7787_v14  ;;  %5338 = vmatmul.mubr.msk.f32.vlgmr.msra.gmra.mrb[60].mxu0 %vm562_vm1, %v7787_v14 }
 0xf2b   :  { %5944 = vmatpush3.bf16.msra.mxu0 %v7400_v1  ;;  %5932 = vmatpush1.bf16.msra.mxu1 %v7346_v34 }
 0xf2c   :  { %5946 = vmatprep.subr.bf16.mxu0 %v7412_v56  ;;  %5934 = vmatprep.subr.bf16.mxu1 %v7366_v47 }
 0xf2d   :  { %4325 = vmatprep.mubr.f32.mxu1 %v7027_v11 }
 0xf2f   :  { %5948 = vmatpush3.bf16.msra.mxu0 %v7412_v56  ;;  %5936 = vmatpush1.bf16.msra.mxu1 %v7371_v41 }
 0xf30   :  { %5950 = vmatprep.subr.bf16.mxu0 %v7425_v62  ;;  %5938 = vmatprep.subr.bf16.mxu1 %v7384_v7 }
 0xf33   :  { %5952 = vmatpush3.bf16.msra.mxu0 %v7425_v62  ;;  %5940 = vmatpush1.bf16.msra.mxu1 %v7389_v46 }
 0xf34   :  { %5954 = vmatprep.subr.bf16.mxu0 %v7438_v13  ;;  %5963 = vmatprep.subr.bf16.mxu1 %v6421_v23 }
 0xf37   :  { %5956 = vmatpush3.bf16.msra.mxu0 %v7438_v13 }
 0xf38   :  { %5957 = vmatprep.subr.bf16.mxu0 %v6421_v23 }
 0xff9   :  { %v4122_v33 = vpop.f32.mrb[56].mxu1 }
 0xffa   :  { %v6025_v34 = vadd.f32 %v4122_v33, %v7541_v31  ;;  %v4124_v47 = vpop.f32.mrb[57].mxu1 }
 0xffb   :  { %v6026_v7 = vadd.f32 %v4124_v47, %v7547_v3 }
 0xffc   :  { %v4741_v41 = vmul.f32 -1.442695, %v6025_v34 }
 0xffd   :  { %v4128_v1 = vpop.f32.mrb[58].mxu1  ;;  %v5339_v56 = vpop.f32.mrb[60].mxu0  ;;  %v4743_v29 = vmul.f32 -1.442695, %v6026_v7 }
 0xffe   :  { %6378 = vpow2.f32 %v4741_v41  ;;  %v6027_v46 = vadd.f32 %v4128_v1, %v7552_v17  ;;  %v4130_v62 = vpop.f32.mrb[59].mxu1  ;;  %v4199_v55 = vpop.f32.mrb[61].mxu0  ;;  %v4237_v15 = vadd.f32 %v5339_v56, %v7571_v6  ;;  %v4437_v6 = vld [vmem:[%s7884_s9 + $0x28] sm:$0xff] }
 0xfff   :  { %v6028_v28 = vadd.f32 %v4130_v62, %v7558_v37  ;;  %v4236_v17 = vadd.f32 %v4199_v55, %v7565_v35 }
0x1000   :  { %v4742_v13 = vmul.f32 -1.442695, %v6027_v46 }
0x1001   :  { %v4744_v30 = vmul.f32 -1.442695, %v6028_v28 }
0x1002   :  { %6380 = vpow2.f32 %v4742_v13  ;;  %v6417_v13 = vld [vmem:[%s7883_s8] sm:$0xff] }
0x1003   :  { %6382 = vpow2.f32 %v4743_v29 }
0x1004   :  { %6384 = vpow2.f32 %v4744_v30 }
0x1008   :  { %v6379_v18 = vpop.eup %6378 }
0x1009   :  { %v4216_v31 = vadd.f32 1.0, %v6379_v18 }
0x100b   :  { %6386 = vrcp.f32 %v4216_v31 }
0x100c   :  { %v6381_v21 = vpop.eup %6380 }
0x100d   :  { %v4217_v3 = vadd.f32 1.0, %v6381_v21  ;;  %v6383_v19 = vpop.eup %6382 }
0x100e   :  { %v6385_v38 = vpop.eup %6384  ;;  %v4230_v0 = vadd.f32 1.0, %v6383_v19 }
0x100f   :  { %6388 = vrcp.f32 %v4217_v3  ;;  %v4231_v12 = vadd.f32 1.0, %v6385_v38 }
0x1010   :  { %6390 = vrcp.f32 %v4230_v0 }
0x1011   :  { %6392 = vrcp.f32 %v4231_v12 }
0x1015   :  { %v6387_v8 = vpop.eup %6386 }
0x1016   :  { %v4238_v37 = vmul.f32 %v6387_v8, %v4236_v17  ;;  %v4753_v8 = vld [vmem:[%s7885_s10] ss:$0 sm:$0xff] }
0x1018   :  { %v4240_v53 = vadd.f32 %v4238_v37, %v7533_v2  ;;  %v4436_v2 = vld [vmem:[%s7884_s9 + $0x20] sm:$0xff] }
0x1019   :  { %v6389_v16 = vpop.eup %6388  ;;  %v5958_v52 = vpack.c.bf16 %v4437_v6, %v4436_v2 }
0x101a   :  { %v4239_v49 = vmul.f32 %v6389_v16, %v4237_v15  ;;  %6394 = vtanh.f32 %v4240_v53  ;;  %v6391_v36 = vpop.eup %6390 }
0x101b   :  { %v6393_v20 = vpop.eup %6392  ;;  %v4244_v43 = vsub.f32 1.0, %v6391_v36  ;;  %v4248_v35 = vmul.f32 %v6391_v36, %v7778_v61  ;;  %v6415_v61 = vld [vmem:[%s7882_s7] sm:$0xff] }
0x101c   :  { %v4241_v26 = vadd.f32 %v4239_v49, %v7530_v10  ;;  %v4245_v39 = vsub.f32 1.0, %v6393_v20  ;;  %v4249_v57 = vmul.f32 %v6393_v20, %v7787_v14 }
0x101e   :  { %6396 = vtanh.f32 %v4241_v26 }
0x1024   :  { %v6395_v4 = vpop.eup %6394 }
0x1025   :  { %v4246_v58 = vmul.f32 %v6395_v4, %v4244_v43 }
0x1027   :  { %v7818_v54 = vadd.f32 %v4248_v35, %v4246_v58 }
0x1028   :  { %v6397_v10 = vpop.eup %6396 }
0x1029   :  { %4745 = vmatmul.mubr.msk.f32.vlgmr.msra.gmra.mrb[60].mxu1 %vm562_vm1, %v7818_v54  ;;  %5356 = vmatprep.mubr.msk.f32.mxu0 %vm562_vm1, %v7818_v54  ;;  %v4247_v9 = vmul.f32 %v6397_v10, %v4245_v39 }
0x102a   :  { %4331 = vmatprep.mubr.f32.mxu1 %v7027_v11  ;;  %5965 = vmatpush3.bf16.msra.mxu1 %v5964_v63 }
0x102b   :  { %v4251_v59 = vadd.f32 %v4249_v57, %v4247_v9  ;;  %5966 = vmatprep.subr.bf16.mxu1 %v6421_v23 }
0x102d   :  { %4746 = vmatmul.mubr.msk.f32.gmra.mrb[64].mxu1 %vm562_vm1, %v4251_v59  ;;  %5357 = vmatmul.mubr.msk.f32.vlgmr.msra.gmra.mrb[62].mxu0 %vm562_vm1, %v4251_v59 }
0x102e   :  { %5959 = vmatpush3.bf16.msra.mxu0 %v5958_v52  ;;  %5367 = vmatprep.mubr.msk.f32.mxu0 %vm6422_vm6, %v7027_v11 }
0x102f   :  { %5960 = vmatprep.subr.bf16.mxu0 %v6421_v23  ;;  %5378 = vmatprep.mubr.msk.f32.mxu1 %vm6422_vm6, %v7027_v11  ;;  %v4434_v11 = vld [vmem:[%s7884_s9 + $0x10] sm:$0xff] }
0x1030   :  { %v5967_v45 = vpack.c.bf16 %v4435_v40, %v4434_v11 }
0x1032   :  { %5962 = vmatpush3.bf16.msra.mxu0 %v5961_v42  ;;  %5968 = vmatpush3.bf16.msra.mxu1 %v5967_v45 }
0x1035   :  { %5368 = vmatmul.mubr.msk.f32.vlgmr.msra.gmra.mrb[64].mxu0 %vm762_vm2, %v4441_v32 }
0x10fc   :  { %v4327_v27 = vpop.f32.mrb[60].mxu1 }
0x10fd   :  { %v6029_v50 = vadd.f32 %v6415_v61, %v4327_v27  ;;  %v4329_v25 = vpop.f32.mrb[61].mxu1 }
0x10fe   :  { %v6030_v14 = vadd.f32 %v6416_v48, %v4329_v25 }
0x10ff   :  { %v4749_v60 = vmul.f32 -1.442695, %v6029_v50 }
0x1100   :  { %v4333_v23 = vpop.f32.mrb[64].mxu1  ;;  %v5358_v33 = vpop.f32.mrb[62].mxu0  ;;  %v4750_v41 = vmul.f32 -1.442695, %v6030_v14 }
0x1101   :  { %6398 = vpow2.f32 %v4749_v60  ;;  %v4334_v34 = vpop.f32.mrb[65].mxu1  ;;  %v4402_v47 = vpop.f32.mrb[63].mxu0 }
0x1102   :  { %6400 = vpow2.f32 %v4750_v41  ;;  %v4424_v28 = vadd.f32 %v6417_v13, %v4402_v47 }
0x1108   :  { %v4510_v7 = vpop.f32.mrb[64].mxu0 }
0x1109   :  { %v5369_v1 = vpop.f32.mrb[65].mxu0 }
0x110b   :  { %v6399_v56 = vpop.eup %6398 }
0x110c   :  { %v4414_v46 = vadd.f32 1.0, %v6399_v56  ;;  %v6401_v62 = vpop.eup %6400 }
0x110d   :  { %v4421_v55 = vadd.f32 1.0, %v6401_v62 }
0x110e   :  { %6402 = vrcp.f32 %v4414_v46 }
0x110f   :  { %6404 = vrcp.f32 %v4421_v55 }
0x1118   :  { %v6403_v29 = vpop.eup %6402 }
0x1119   :  { %v4425_v30 = vmul.f32 %v6403_v29, %v4424_v28  ;;  %v6405_v31 = vpop.eup %6404 }
0x111a   :  { %v4428_v21 = vsub.f32 1.0, %v6405_v31  ;;  %v4430_v19 = vmul.f32 %v6405_v31, %v7818_v54 }
0x111b   :  { %v4426_v18 = vadd.f32 %v4425_v30, %v7536_v5 }
0x111d   :  { %6406 = vtanh.f32 %v4426_v18 }
0x1127   :  { %v6407_v3 = vpop.eup %6406 }
0x1128   :  { %v4429_v38 = vmul.f32 %v6407_v3, %v4428_v21 }
0x112a   :  { %v4431_v0 = vadd.f32 %v4430_v19, %v4429_v38 }
0x112c   :  { %5379 = vmatmul.mubr.msk.f32.vlgmr.msra.gmra.mrb[66].mxu1 %vm762_vm2, %v4431_v0 }
0x11ff   :  { %v4583_v17 = vpop.f32.mrb[66].mxu1 }
0x1200   :  { %v4584_v12 = vadd.f32 %v4583_v17, %v4510_v7  ;;  %v5380_v37 = vpop.f32.mrb[67].mxu1 }
0x1202   :  { %v4594_v15 = vadd.f32 %v4753_v8, %v4584_v12 }
0x1204   :  { %4596 = vst.msk [vmem:[%s7886_s11] sm:$0xff] %vm4595_vm7, %v4594_v15 }

</bundles_post_ra>
